<compile_context>
chip_gen: v7x
topology: tpu7x:2x2x1
jax: 0.10.0
libtpu: 0.0.40
codegen_flags: <defaults>
</compile_context>

<pallas_src>
import jax
import jax.numpy as jnp
from jax.experimental import pallas as pl
from jax.experimental.pallas import tpu as pltpu


def basic_nn_kernel(params_ref, x_ref, o_ref):
    # params_ref is in SMEM (scalar prefetch): [w00, b00, w01, w10, b10, w11, bf]
    w00 = params_ref[0]
    b00 = params_ref[1]
    w01 = params_ref[2]
    w10 = params_ref[3]
    b10 = params_ref[4]
    w11 = params_ref[5]
    bf = params_ref[6]

    x = x_ref[...]

    top = jnp.maximum(x * w00 + b00, 0.0) * w01
    bot = jnp.maximum(x * w10 + b10, 0.0) * w11
    o_ref[...] = jnp.maximum(top + bot + bf, 0.0)


def basic_nn(x, params, *, max_tile_bytes=2 * 1024 * 1024, max_tile_rows=512):
    """x: f32[R, C]; params: f32[7] = (w00, b00, w01, w10, b10, w11, bf)."""
    R, C = x.shape
    itemsize = jnp.dtype(x.dtype).itemsize

    # Pick a row-tile: full-width in C (lane-dense), rows a multiple of 8,
    # capped so one tile is ~<=2 MiB (4 x tile = in/out double-buffered fits
    # even v5e's 16 MiB default scoped VMEM).
    rows_budget = max(8, (max_tile_bytes // max(1, C * itemsize)) // 8 * 8)
    tr = min(max_tile_rows, rows_budget)
    if R <= tr:
        tr = R  # single block: full-extent dims are always legal

    # Pad rows up to a multiple of the tile (padded rows computed then dropped;
    # the op is elementwise so padding cannot contaminate real rows).
    n_tiles = pl.cdiv(R, tr)
    Rp = n_tiles * tr
    xp = x if Rp == R else jnp.pad(x, ((0, Rp - R), (0, 0)))

    out = pl.pallas_call(
        basic_nn_kernel,
        out_shape=jax.ShapeDtypeStruct((Rp, C), x.dtype),
        grid_spec=pltpu.PrefetchScalarGridSpec(
            num_scalar_prefetch=1,  # params -> SMEM, passed first to kernel
            grid=(n_tiles,),
            in_specs=[pl.BlockSpec((tr, C), lambda i, p: (i, 0))],
            out_specs=pl.BlockSpec((tr, C), lambda i, p: (i, 0)),
        ),
        compiler_params=pltpu.CompilerParams(
            dimension_semantics=("parallel",),  # shard rows across TCs on v7x
        ),
    )(params, xp)

    return out if Rp == R else out[:R]


def _reference(x, params):
    w00, b00, w01, w10, b10, w11, bf = [params[i] for i in range(7)]
    top = jnp.maximum(x * w00 + b00, 0.0) * w01
    bot = jnp.maximum(x * w10 + b10, 0.0) * w11
    return jnp.maximum(top + bot + bf, 0.0)


if __name__ == "__main__":
    # Parameters exactly as in BasicNN.__init__ (deterministic, no checkpoint).
    params = jnp.array([1.7, -0.85, -40.8, 12.6, 0.0, 2.7, -16.0],
                       dtype=jnp.float32)

    key = jax.random.PRNGKey(0)
    k1, k2 = jax.random.split(key)

    # Case 1: aligned shape -> grid of 2 row-tiles of (512, 512).
    x1 = jax.random.uniform(k1, (1024, 512), dtype=jnp.float32)
    out1 = jax.block_until_ready(basic_nn(x1, params))
    assert jnp.allclose(out1, _reference(x1, params), atol=1e-5, rtol=1e-5)

    # Case 2: ragged row count -> exercises the padding + slice path.
    x2 = jax.random.uniform(k2, (520, 256), dtype=jnp.float32)
    out2 = jax.block_until_ready(basic_nn(x2, params))
    assert out2.shape == x2.shape
    assert jnp.allclose(out2, _reference(x2, params), atol=1e-5, rtol=1e-5)

    print("KERNEL_OK")
</pallas_src>

<mosaic_0001>
module attributes {stable_mosaic.version = 11 : i64} {
  func.func @basic_nn_kernel(%arg0: i32, %arg1: memref<7xf32, #tpu.memory_space<smem>>, %arg2: memref<512x512xf32, #tpu.memory_space<vmem>>, %arg3: memref<512x512xf32, #tpu.memory_space<vmem>>) attributes {dimension_semantics = [#tpu.dimension_semantics<parallel>], iteration_bounds = array<i64: 2>, scalar_prefetch = 1 : i64, scratch_operands = 0 : i64, tpu.core_type = #tpu.core_type<tc>, window_params = [{transform_indices = @transform_0, window_bounds = array<i64: 512, 512>}, {transform_indices = @transform_1, window_bounds = array<i64: 512, 512>}]} {
    %c0 = arith.constant 0 : index
    %0 = memref.load %arg1[%c0] : memref<7xf32, #tpu.memory_space<smem>>
    %c1 = arith.constant 1 : index
    %1 = memref.load %arg1[%c1] : memref<7xf32, #tpu.memory_space<smem>>
    %c2 = arith.constant 2 : index
    %2 = memref.load %arg1[%c2] : memref<7xf32, #tpu.memory_space<smem>>
    %c3 = arith.constant 3 : index
    %3 = memref.load %arg1[%c3] : memref<7xf32, #tpu.memory_space<smem>>
    %c4 = arith.constant 4 : index
    %4 = memref.load %arg1[%c4] : memref<7xf32, #tpu.memory_space<smem>>
    %c5 = arith.constant 5 : index
    %5 = memref.load %arg1[%c5] : memref<7xf32, #tpu.memory_space<smem>>
    %c6 = arith.constant 6 : index
    %6 = memref.load %arg1[%c6] : memref<7xf32, #tpu.memory_space<smem>>
    %c0_0 = arith.constant 0 : index
    %c0_1 = arith.constant 0 : index
    %7 = vector.load %arg2[%c0_0, %c0_1] : memref<512x512xf32, #tpu.memory_space<vmem>>, vector<512x512xf32>
    %8 = vector.broadcast %0 : f32 to vector<512x512xf32>
    %9 = arith.mulf %7, %8 : vector<512x512xf32>
    %10 = vector.broadcast %1 : f32 to vector<512x512xf32>
    %11 = arith.addf %9, %10 : vector<512x512xf32>
    %cst = arith.constant 0.000000e+00 : f32
    %12 = vector.broadcast %cst : f32 to vector<512x512xf32>
    %13 = arith.maximumf %11, %12 : vector<512x512xf32>
    %14 = vector.broadcast %2 : f32 to vector<512x512xf32>
    %15 = arith.mulf %13, %14 : vector<512x512xf32>
    %16 = vector.broadcast %3 : f32 to vector<512x512xf32>
    %17 = arith.mulf %7, %16 : vector<512x512xf32>
    %18 = vector.broadcast %4 : f32 to vector<512x512xf32>
    %19 = arith.addf %17, %18 : vector<512x512xf32>
    %cst_2 = arith.constant 0.000000e+00 : f32
    %20 = vector.broadcast %cst_2 : f32 to vector<512x512xf32>
    %21 = arith.maximumf %19, %20 : vector<512x512xf32>
    %22 = vector.broadcast %5 : f32 to vector<512x512xf32>
    %23 = arith.mulf %21, %22 : vector<512x512xf32>
    %24 = arith.addf %15, %23 : vector<512x512xf32>
    %25 = vector.broadcast %6 : f32 to vector<512x512xf32>
    %26 = arith.addf %24, %25 : vector<512x512xf32>
    %cst_3 = arith.constant 0.000000e+00 : f32
    %27 = vector.broadcast %cst_3 : f32 to vector<512x512xf32>
    %28 = arith.maximumf %26, %27 : vector<512x512xf32>
    %c0_4 = arith.constant 0 : index
    %c0_5 = arith.constant 0 : index
    %29 = vector.load %arg3[%c0_4, %c0_5] : memref<512x512xf32, #tpu.memory_space<vmem>>, vector<512x512xf32>
    tpu.vector_store %arg3[%c0_4, %c0_5], %28 {strides = array<i32>} : memref<512x512xf32, #tpu.memory_space<vmem>>, vector<512x512xf32>,
    return
  }
  func.func @transform_0(%arg0: i32, %arg1: memref<7xf32, #tpu.memory_space<smem>>) -> (i32, i32) {
    %c0_i32 = arith.constant 0 : i32
    %c0_i32_0 = arith.constant 0 : i32
    return %arg0, %c0_i32 : i32, i32
  }
  func.func @transform_1(%arg0: i32, %arg1: memref<7xf32, #tpu.memory_space<smem>>) -> (i32, i32) {
    %c0_i32 = arith.constant 0 : i32
    %c0_i32_0 = arith.constant 0 : i32
    return %arg0, %c0_i32 : i32, i32
  }
}

</mosaic_0001>

<bundles_post_ra>
// kernel: tpu_custom_call.1
= control target key start
LH: loop header
LB: loop body
LE: loop exit
PB: predicated region body
PF: predicated region fallthrough
CT: control target
= control target key end

     0   :  { %s6283_s0 = inlined_call_operand.hbm [shape: f32[7], index: 0, kind: input, shape index: {}]   ;;  %s6284_s1 = inlined_call_operand.hbm [shape: f32[1024,512], index: 1, kind: input, shape index: {}]   ;;  %s6285_s2 = inlined_call_operand.hbm [shape: f32[1024,512], index: 2, kind: output, shape index: {}]  }
   0x1   :  { %s3650_s11 = scalar_lea.hbm %s6283_s0, 16 }
   0x2   :  { %p3651_p0 = scmp.ne.s32.totalorder %s6283_s0, %s3650_s11  ;;  %p3654_p1 = scmp.lt.u32.totalorder %s3650_s11, %s6283_s0 }
   0x4   :  { %p3656_p2 = pnand %p3654_p1, %p3651_p0 }
   0x6   :  { %3659 = shalt.err (!%p3656_p2)  }
   0x7   :  { %s3760_s16 = smov [#allocation3]  }
   0x8   :  { %8 = dma.hbm_to_smem %s6283_s0, 16, %s3760_s16, [#allocation2] }
   0x9   :  { %3734 = dma.done.wait [#allocation2], 16 }
   0xa   :  { %3735 = vsyncadd [#allocation2], 4294967280 }
   0xb   :  { %10 = sfence }
   0xc   :  { %11 = vsyncpa [#allocation5], 0 }
   0xd   :  { %13 = vsyncpa [#allocation5 + $0x1], 0 }
   0xe   :  { %14 = vsyncpa [#allocation6], 0 }
   0xf   :  { %16 = vsyncpa [#allocation6 + $0x1], 0  ;;  %s3794_s19 = smov 0   ;;  %s3796_s20 = smov 0  }
  0x10   :  { %s3798_s21 = smov 0   ;;  %s3800_s22 = smov 0  }
  0x11 LB: > { %s3815_s0 = sadd.s32 4294967295, %s3758_s22   ;;  %s3573_s23 = sadd.s32 4294967294, %s3758_s22   ;;  %s3758_s22 = sphi %s3800_s22, %s6298_s22   ;;  %s3754_s21 = sphi %s3798_s21, %s6297_s21   ;;  %s3750_s20 = sphi %s3796_s20, %s6296_s20   ;;  %s3746_s19 = sphi %s3794_s19, %s6295_s19  }
  0x12   : > { %s3819_s24 = sadd.s32 1, %s3758_s22   ;;  %s29_s25 = sadd.s32 1, %s3754_s21 }
  0x13   : > { %s26_s26 = ssub.s32 %s3758_s22, %s3819_s24  ;;  %p36_p3 = scmp.ne.s32.totalorder %s3754_s21, %s3750_s20 }
  0x14   : > { %p27_p4 = scmp.eq.s32.totalorder %s26_s26, 0  ;;  %p37_p5 = scmp.eq.s32.totalorder %s3758_s22, 0 }
  0x15   : > { %p42_p6 = scmp.ne.s32.totalorder %s3750_s20, %s3746_s19  ;;  %p43_p7 = scmp.eq.s32.totalorder %s3815_s0, 0 }
  0x16   : > { %s3831_s27 = scalar_select %p27_p4, %s3754_s21, %s29_s25  }
  0x17   : > { %p3833_p8 = por %p37_p5, %p36_p3  ;;  %p3837_p9 = por %p43_p7, %p42_p6 }
  0x18   : > { %p66_p10 = scmp.eq.s32.totalorder %s3815_s0, 1  ;;  %p72_p11 = scmp.eq.s32.totalorder %s3573_s23, 1 }
  0x19   : > { %p3611_p13 = scmp.lt.s32.totalorder %s3758_s22, 2  ;;  %s92_s4 = sand.u32 1, %s3754_s21  }
  0x1a   : > { %p3844_p0 = por %p66_p10, %p36_p3  ;;  %p3848_p1 = por %p72_p11, %p42_p6 }
  0x1b   : > { %s3596_s5 = sshll.u32 %s3758_s22, 15  ;;  %s3576_s6 = sshll.u32 %s92_s4, 11 }
  0x1c   : > { %s6289_s30 = scalar_select %p3844_p0, 1, 0 }
  0x1d   : > { %s6290_s3 = scalar_select %p3848_p1, 1, 0 }
  0x1e   : > { %s3857_s9 = scalar_lea.hbm %s6284_s1, %s3596_s5  ;;  %s96_s10 = scalar_lea.vmem [#allocation4], %s3576_s6 }
  0x1f   : > { %s104_s11 = sshll.u32 %s96_s10, 4  ;;  %p3861_p2 = pnand %p3611_p13, %p3833_p8  ;;  %s3865_s11 = int_to_ptr.vmem [resolvable:$true] %s104_s11 }
  0x20   : > { %s3867_s13 = scalar_lea.sflag [#allocation5], %s92_s4  ;;  %s3660_s14 = scalar_lea.hbm %s3857_s9, 32768 }
  0x21   : > { %p3661_p3 = scmp.ne.s32.totalorder %s3857_s9, %s3660_s14  ;;  %p3662_p4 = pneg %p3861_p2 }
  0x22   : > { %s3665_s17 = scalar_lea.hbm %s6284_s1, 65536  ;;  %p3666_p7 = scmp.lt.u32.totalorder %s3857_s9, %s6284_s1 }
  0x23   : > { %p3663_p5 = pnand %p3662_p4, %p3661_p3  ;;  %p3667_p8 = scmp.lt.u32.totalorder %s3665_s17, %s3660_s14 }
  0x24   : > { %p3669_p11 = scmp.lt.u32.totalorder %s3660_s14, %s3857_s9 }
  0x25   : > { %p3664_p6 = pneg %p3663_p5  ;;  %p3668_p10 = por %p3667_p8, %p3666_p7 }
  0x27   : > { %p3670_p13 = por %p3669_p11, %p3668_p10 }
  0x29   : > { %p3671_p12 = pnand %p3670_p13, %p3664_p6 }
  0x2b   : > { %3674 = shalt.err (!%p3671_p12)
}
  0x2c   : > { %s3675_s25 = scalar_lea.vmem %s3865_s11, 32768  ;;  %s3761_s26 = smov [#allocation4]  }
  0x2d   : > { %p3676_p3 = scmp.ne.s32.totalorder %s3865_s11, %s3675_s25  ;;  %s3680_s28 = sshll.u32 %s3761_s26, 4  ;;  %s3681_s28 = int_to_ptr.vmem [resolvable:$false] %s3680_s28 }
  0x2e   : > { %s3682_s4 = scalar_lea.vmem %s3681_s28, 65536  ;;  %p3683_p0 = scmp.lt.s32.totalorder %s3865_s11, %s3681_s28 }
  0x2f   : > { %p3678_p5 = pnand %p3676_p3, %p3662_p4  ;;  %p3684_p7 = scmp.lt.s32.totalorder %s3682_s4, %s3675_s25 }
  0x31   : > { %p3679_p1 = pneg %p3678_p5  ;;  %p3685_p8 = por %p3684_p7, %p3683_p0 }
  0x33   : > { %p3686_p10 = pnand %p3685_p8, %p3679_p1 }
  0x35   : > { %3689 = shalt.err (!%p3686_p10)
}
  0x36   : > { %s3762_s5 = smov 512   ;;  %s3763_s6 = smov 32  }
  0x37   : > { %3606 = dma.hbm_to_vmem [thread:$0]  (!%p3861_p2), %s3857_s9, 32768, %s3865_s11, %s3867_s13, %s3762_s5, %s3762_s5, %s3763_s6  }
  0x38   : > { %p3580_p12 = scmp.ge.s32.totalorder %s3758_s22, 1  ;;  %p112_p4 = scmp.lt.s32.totalorder %s3758_s22, 3 }
  0x3a   : > { %p113_p6 = pnand %p3580_p12, %p112_p4 }
  0x3b   : > { %s3898_s7 = sand.u32 (!%p113_p6), 1, %s3750_s20  }
  0x3c   : > { %116 = sbr.rel (%p113_p6) target bundleno = 803 (0x323), region = 24  ;;  %s3581_s8 = sshll.u32 (!%p113_p6), %s3898_s7, 11 }
  0x3d   : > { %s119_s10 = scalar_lea.sflag (!%p113_p6), [#allocation5], %s3898_s7  ;;  %s3904_s14 = scalar_lea.vmem (!%p113_p6), [#allocation4], %s3581_s8 }
  0x43   : > { %3737 = dma.done.wait (%p3837_p9), %s119_s10, 32768  }
  0x44   : > { %3739 = vsyncadd (%p3837_p9), %s119_s10, 4294934528  ;;  %s143_s9 = sld [smem:[#allocation3]]  ;;  %s3583_s11 = sld [smem:[#allocation3 + $0x1]]  ;;  %v150_v0 = vld [vmem:[%s3904_s14] sm:$0xff]  ;;  %v151_v3 = vld [vmem:[%s3904_s14 + $0x8] sm:$0xff] }
  0x45   : > { %s3584_s12 = sld [smem:[#allocation3 + $0x2]]  ;;  %s3585_s13 = sld [smem:[#allocation3 + $0x3]]  ;;  %v152_v8 = vld [vmem:[%s3904_s14 + $0x10] sm:$0xff]  ;;  %v153_v9 = vld [vmem:[%s3904_s14 + $0x18] sm:$0xff]  ;;  %v154_v30 = vld [vmem:[%s3904_s14 + $0x20] sm:$0xff] }
  0x46   : > { %s3586_s15 = sld [smem:[#allocation3 + $0x4]]  ;;  %s3587_s16 = sld [smem:[#allocation3 + $0x5]]  ;;  %v155_v39 = vld [vmem:[%s3904_s14 + $0x28] sm:$0xff]  ;;  %v156_v60 = vld [vmem:[%s3904_s14 + $0x30] sm:$0xff] }
  0x47   : > { %s3588_s17 = sld [smem:[#allocation3 + $0x6]]  ;;  %s3972_s29 = scalar_lea.vmem [#allocation7], %s3581_s8 }
  0x48   : > { %s3598_s18 = sshll.u32 %s3815_s0, 15  ;;  %s3500_s23 = sshll.u32 %s3972_s29, 4  ;;  %s6237_s23 = int_to_ptr.vmem [resolvable:$true] %s3500_s23 }
  0x49   : > { %s6235_s28 = scalar_lea.hbm %s6285_s2, %s3598_s18  ;;  %s3486_s4 = scalar_lea.sflag [#allocation6], %s3898_s7 }
  0x4a   : > { %v3911_v1 = vstv %s143_s9  ;;  %v3913_v2 = vstv %s3583_s11  ;;  %s3690_s0 = scalar_lea.vmem %s6237_s23, 32768  ;;  %p6292_p0 = scmp.ne.s32.totalorder %s6289_s30, 0 }
  0x4b   : > { %v407_v4 = vmul.f32 %v3911_v1, %v150_v0  ;;  %v3917_v5 = vstv %s3584_s12  ;;  %v3919_v6 = vstv %s3585_s13  ;;  %v408_v7 = vmul.f32 %v3911_v1, %v151_v3  ;;  %p3691_p9 = scmp.ne.s32.totalorder %s6237_s23, %s3690_s0  ;;  %s3764_s5 = smov [#allocation7]  }
  0x4c   : > { %v1434_v10 = vmul.f32 %v3919_v6, %v150_v0  ;;  %v3925_v11 = vstv %s3586_s15  ;;  %v3927_v12 = vstv %s3587_s16  ;;  %v1435_v13 = vmul.f32 %v3919_v6, %v151_v3  ;;  %v157_v3 = vld [vmem:[%s3904_s14 + $0x38] sm:$0xff]  ;;  %s3694_s6 = sshll.u32 %s3764_s5, 4  ;;  %s3695_s6 = int_to_ptr.vmem [resolvable:$false] %s3694_s6 }
  0x4d   : > { %v664_v14 = vadd.f32 %v3913_v2, %v407_v4  ;;  %v3931_v15 = vstv %s3588_s17  ;;  %v665_v16 = vadd.f32 %v3913_v2, %v408_v7  ;;  %v409_v17 = vmul.f32 %v3911_v1, %v152_v8  ;;  %p3692_p1 = pnand %p3691_p9, %p6292_p0  ;;  %s3696_s8 = scalar_lea.vmem %s3695_s6, 65536 }
  0x4e   : > { %v1691_v18 = vadd.f32 %v3925_v11, %v1434_v10  ;;  %v1692_v19 = vadd.f32 %v3925_v11, %v1435_v13  ;;  %v1436_v20 = vmul.f32 %v3919_v6, %v152_v8  ;;  %v410_v21 = vmul.f32 %v3911_v1, %v153_v9  ;;  %p3697_p11 = scmp.lt.s32.totalorder %s6237_s23, %s3695_s6  ;;  %p3698_p13 = scmp.lt.s32.totalorder %s3696_s8, %s3690_s0 }
  0x4f   : > { %v920_v22 = vmax.f32 %v664_v14, 0.0  ;;  %v921_v23 = vmax.f32 %v665_v16, 0.0  ;;  %v666_v24 = vadd.f32 %v3913_v2, %v409_v17  ;;  %v1437_v25 = vmul.f32 %v3919_v6, %v153_v9  ;;  %v158_v17 = vld [vmem:[%s3904_s14 + $0x40] sm:$0xff]  ;;  %p3693_p2 = pneg %p3692_p1 }
  0x50   : > { %v1947_v26 = vmax.f32 %v1691_v18, 0.0  ;;  %v1948_v27 = vmax.f32 %v1692_v19, 0.0  ;;  %v1693_v28 = vadd.f32 %v3925_v11, %v1436_v20  ;;  %v667_v29 = vadd.f32 %v3913_v2, %v410_v21  ;;  %p3699_p3 = por %p3698_p13, %p3697_p11 }
  0x51   : > { %v1177_v31 = vmul.f32 %v3917_v5, %v920_v22  ;;  %v1178_v32 = vmul.f32 %v3917_v5, %v921_v23  ;;  %v922_v33 = vmax.f32 %v666_v24, 0.0  ;;  %v1694_v34 = vadd.f32 %v3925_v11, %v1437_v25 }
  0x52   : > { %v2204_v35 = vmul.f32 %v3927_v12, %v1947_v26  ;;  %v2205_v36 = vmul.f32 %v3927_v12, %v1948_v27  ;;  %v1949_v37 = vmax.f32 %v1693_v28, 0.0  ;;  %v923_v38 = vmax.f32 %v667_v29, 0.0  ;;  %p3700_p5 = pnand %p3699_p3, %p3693_p2 }
  0x53   : > { %v1179_v40 = vmul.f32 %v3917_v5, %v922_v33  ;;  %v1950_v41 = vmax.f32 %v1694_v34, 0.0  ;;  %v411_v42 = vmul.f32 %v3911_v1, %v154_v30  ;;  %v1438_v43 = vmul.f32 %v3919_v6, %v154_v30  ;;  %v159_v34 = vld [vmem:[%s3904_s14 + $0x48] sm:$0xff] }
  0x54   : > { %v2460_v44 = vadd.f32 %v2204_v35, %v1177_v31  ;;  %v2461_v45 = vadd.f32 %v2205_v36, %v1178_v32  ;;  %v2206_v46 = vmul.f32 %v3927_v12, %v1949_v37  ;;  %v1180_v47 = vmul.f32 %v3917_v5, %v923_v38 }
  0x55   : > { %v2207_v48 = vmul.f32 %v3927_v12, %v1950_v41  ;;  %v668_v49 = vadd.f32 %v3913_v2, %v411_v42  ;;  %v1695_v50 = vadd.f32 %v3925_v11, %v1438_v43  ;;  %v412_v51 = vmul.f32 %v3911_v1, %v155_v39  ;;  %v160_v43 = vld [vmem:[%s3904_s14 + $0x50] sm:$0xff] }
  0x56   : > { %v2717_v52 = vadd.f32 %v3931_v15, %v2460_v44  ;;  %v2718_v53 = vadd.f32 %v3931_v15, %v2461_v45  ;;  %v2462_v54 = vadd.f32 %v2206_v46, %v1179_v40  ;;  %v1439_v55 = vmul.f32 %v3919_v6, %v155_v39 }
  0x57   : > { %v2463_v56 = vadd.f32 %v2207_v48, %v1180_v47  ;;  %v924_v57 = vmax.f32 %v668_v49, 0.0  ;;  %v1951_v58 = vmax.f32 %v1695_v50, 0.0  ;;  %v669_v59 = vadd.f32 %v3913_v2, %v412_v51 }
  0x58   : > { %v2973_v61 = vmax.f32 %v2717_v52, 0.0  ;;  %v2974_v62 = vmax.f32 %v2718_v53, 0.0  ;;  %v2719_v63 = vadd.f32 %v3931_v15, %v2462_v54  ;;  %v1696_v0 = vadd.f32 %v3925_v11, %v1439_v55  ;;  %v161_v52 = vld [vmem:[%s3904_s14 + $0x58] sm:$0xff] }
  0x59   : > { %v2720_v4 = vadd.f32 %v3931_v15, %v2463_v56  ;;  %v1181_v7 = vmul.f32 %v3917_v5, %v924_v57  ;;  %v2208_v8 = vmul.f32 %v3927_v12, %v1951_v58  ;;  %v925_v9 = vmax.f32 %v669_v59, 0.0 }
  0x5a   : > { %3229 = vst [vmem:[%s3972_s29] sm:$0xff] %v2973_v61  ;;  %3230 = vst [vmem:[%s3972_s29 + $0x8] sm:$0xff] %v2974_v62  ;;  %v2975_v10 = vmax.f32 %v2719_v63, 0.0  ;;  %v1952_v13 = vmax.f32 %v1696_v0, 0.0  ;;  %v413_v14 = vmul.f32 %v3911_v1, %v156_v60  ;;  %v1440_v16 = vmul.f32 %v3919_v6, %v156_v60 }
  0x5b   : > { %v2976_v18 = vmax.f32 %v2720_v4, 0.0  ;;  %v2464_v19 = vadd.f32 %v2208_v8, %v1181_v7  ;;  %v1182_v20 = vmul.f32 %v3917_v5, %v925_v9  ;;  %v414_v21 = vmul.f32 %v3911_v1, %v157_v3  ;;  %v162_v9 = vld [vmem:[%s3904_s14 + $0x60] sm:$0xff] }
  0x5c   : > { %3231 = vst [vmem:[%s3972_s29 + $0x10] sm:$0xff] %v2975_v10  ;;  %v2209_v22 = vmul.f32 %v3927_v12, %v1952_v13  ;;  %v670_v23 = vadd.f32 %v3913_v2, %v413_v14  ;;  %v1697_v24 = vadd.f32 %v3925_v11, %v1440_v16  ;;  %v1441_v25 = vmul.f32 %v3919_v6, %v157_v3 }
  0x5d   : > { %3232 = vst [vmem:[%s3972_s29 + $0x18] sm:$0xff] %v2976_v18  ;;  %v2721_v26 = vadd.f32 %v3931_v15, %v2464_v19  ;;  %v671_v27 = vadd.f32 %v3913_v2, %v414_v21  ;;  %v415_v28 = vmul.f32 %v3911_v1, %v158_v17  ;;  %v1442_v29 = vmul.f32 %v3919_v6, %v158_v17  ;;  %v163_v21 = vld [vmem:[%s3904_s14 + $0x68] sm:$0xff] }
  0x5e   : > { %v2465_v30 = vadd.f32 %v2209_v22, %v1182_v20  ;;  %v926_v31 = vmax.f32 %v670_v23, 0.0  ;;  %v1953_v32 = vmax.f32 %v1697_v24, 0.0  ;;  %v1698_v33 = vadd.f32 %v3925_v11, %v1441_v25 }
  0x5f   : > { %v2977_v35 = vmax.f32 %v2721_v26, 0.0  ;;  %v927_v36 = vmax.f32 %v671_v27, 0.0  ;;  %v672_v37 = vadd.f32 %v3913_v2, %v415_v28  ;;  %v1699_v38 = vadd.f32 %v3925_v11, %v1442_v29 }
  0x60   : > { %v2722_v39 = vadd.f32 %v3931_v15, %v2465_v30  ;;  %v1183_v40 = vmul.f32 %v3917_v5, %v926_v31  ;;  %v2210_v41 = vmul.f32 %v3927_v12, %v1953_v32  ;;  %v1954_v42 = vmax.f32 %v1698_v33, 0.0  ;;  %v164_v30 = vld [vmem:[%s3904_s14 + $0x70] sm:$0xff] }
  0x61   : > { %3233 = vst [vmem:[%s3972_s29 + $0x20] sm:$0xff] %v2977_v35  ;;  %v1184_v44 = vmul.f32 %v3917_v5, %v927_v36  ;;  %v928_v45 = vmax.f32 %v672_v37, 0.0  ;;  %v1955_v46 = vmax.f32 %v1699_v38, 0.0  ;;  %v416_v47 = vmul.f32 %v3911_v1, %v159_v34 }
  0x62   : > { %v2978_v48 = vmax.f32 %v2722_v39, 0.0  ;;  %v2466_v49 = vadd.f32 %v2210_v41, %v1183_v40  ;;  %v2211_v50 = vmul.f32 %v3927_v12, %v1954_v42  ;;  %v1443_v51 = vmul.f32 %v3919_v6, %v159_v34 }
  0x63   : > { %v1185_v53 = vmul.f32 %v3917_v5, %v928_v45  ;;  %v2212_v54 = vmul.f32 %v3927_v12, %v1955_v46  ;;  %v673_v55 = vadd.f32 %v3913_v2, %v416_v47  ;;  %v417_v56 = vmul.f32 %v3911_v1, %v160_v43  ;;  %v165_v47 = vld [vmem:[%s3904_s14 + $0x78] sm:$0xff] }
  0x64   : > { %3234 = vst [vmem:[%s3972_s29 + $0x28] sm:$0xff] %v2978_v48  ;;  %v2723_v57 = vadd.f32 %v3931_v15, %v2466_v49  ;;  %v2467_v58 = vadd.f32 %v2211_v50, %v1184_v44  ;;  %v1700_v59 = vadd.f32 %v3925_v11, %v1443_v51  ;;  %v1444_v60 = vmul.f32 %v3919_v6, %v160_v43 }
  0x65   : > { %v2468_v61 = vadd.f32 %v2212_v54, %v1185_v53  ;;  %v929_v62 = vmax.f32 %v673_v55, 0.0  ;;  %v674_v63 = vadd.f32 %v3913_v2, %v417_v56  ;;  %v418_v0 = vmul.f32 %v3911_v1, %v161_v52  ;;  %v166_v56 = vld [vmem:[%s3904_s14 + $0x80] sm:$0xff] }
  0x66   : > { %v2979_v3 = vmax.f32 %v2723_v57, 0.0  ;;  %v2724_v4 = vadd.f32 %v3931_v15, %v2467_v58  ;;  %v1956_v7 = vmax.f32 %v1700_v59, 0.0  ;;  %v1701_v8 = vadd.f32 %v3925_v11, %v1444_v60 }
  0x67   : > { %v2725_v10 = vadd.f32 %v3931_v15, %v2468_v61  ;;  %v1186_v13 = vmul.f32 %v3917_v5, %v929_v62  ;;  %v930_v14 = vmax.f32 %v674_v63, 0.0  ;;  %v675_v16 = vadd.f32 %v3913_v2, %v418_v0 }
  0x68   : > { %3235 = vst [vmem:[%s3972_s29 + $0x30] sm:$0xff] %v2979_v3  ;;  %v2980_v17 = vmax.f32 %v2724_v4, 0.0  ;;  %v2213_v18 = vmul.f32 %v3927_v12, %v1956_v7  ;;  %v1957_v19 = vmax.f32 %v1701_v8, 0.0  ;;  %v1445_v20 = vmul.f32 %v3919_v6, %v161_v52 }
  0x69   : > { %v2981_v22 = vmax.f32 %v2725_v10, 0.0  ;;  %v1187_v23 = vmul.f32 %v3917_v5, %v930_v14  ;;  %v931_v24 = vmax.f32 %v675_v16, 0.0  ;;  %v419_v25 = vmul.f32 %v3911_v1, %v162_v9 }
  0x6a   : > { %3236 = vst [vmem:[%s3972_s29 + $0x38] sm:$0xff] %v2980_v17  ;;  %v2469_v26 = vadd.f32 %v2213_v18, %v1186_v13  ;;  %v2214_v27 = vmul.f32 %v3927_v12, %v1957_v19  ;;  %v1702_v28 = vadd.f32 %v3925_v11, %v1445_v20  ;;  %v1446_v29 = vmul.f32 %v3919_v6, %v162_v9  ;;  %v167_v9 = vld [vmem:[%s3904_s14 + $0x88] sm:$0xff] }
  0x6b   : > { %3237 = vst [vmem:[%s3972_s29 + $0x40] sm:$0xff] %v2981_v22  ;;  %v1188_v31 = vmul.f32 %v3917_v5, %v931_v24  ;;  %v676_v32 = vadd.f32 %v3913_v2, %v419_v25  ;;  %v420_v33 = vmul.f32 %v3911_v1, %v163_v21  ;;  %v1447_v34 = vmul.f32 %v3919_v6, %v163_v21  ;;  %v168_v25 = vld [vmem:[%s3904_s14 + $0x90] sm:$0xff] }
  0x6c   : > { %v2726_v35 = vadd.f32 %v3931_v15, %v2469_v26  ;;  %v2470_v36 = vadd.f32 %v2214_v27, %v1187_v23  ;;  %v1958_v37 = vmax.f32 %v1702_v28, 0.0  ;;  %v1703_v38 = vadd.f32 %v3925_v11, %v1446_v29 }
  0x6d   : > { %v932_v39 = vmax.f32 %v676_v32, 0.0  ;;  %v677_v40 = vadd.f32 %v3913_v2, %v420_v33  ;;  %v1704_v41 = vadd.f32 %v3925_v11, %v1447_v34  ;;  %v421_v42 = vmul.f32 %v3911_v1, %v164_v30  ;;  %v169_v34 = vld [vmem:[%s3904_s14 + $0x98] sm:$0xff] }
  0x6e   : > { %v2982_v43 = vmax.f32 %v2726_v35, 0.0  ;;  %v2727_v44 = vadd.f32 %v3931_v15, %v2470_v36  ;;  %v2215_v45 = vmul.f32 %v3927_v12, %v1958_v37  ;;  %v1959_v46 = vmax.f32 %v1703_v38, 0.0 }
  0x6f   : > { %v1189_v48 = vmul.f32 %v3917_v5, %v932_v39  ;;  %v933_v49 = vmax.f32 %v677_v40, 0.0  ;;  %v1960_v50 = vmax.f32 %v1704_v41, 0.0  ;;  %v678_v51 = vadd.f32 %v3913_v2, %v421_v42 }
  0x70   : > { %3238 = vst [vmem:[%s3972_s29 + $0x48] sm:$0xff] %v2982_v43  ;;  %v2983_v52 = vmax.f32 %v2727_v44, 0.0  ;;  %v2471_v53 = vadd.f32 %v2215_v45, %v1188_v31  ;;  %v2216_v54 = vmul.f32 %v3927_v12, %v1959_v46  ;;  %v1448_v55 = vmul.f32 %v3919_v6, %v164_v30 }
  0x71   : > { %v1190_v57 = vmul.f32 %v3917_v5, %v933_v49  ;;  %v2217_v58 = vmul.f32 %v3927_v12, %v1960_v50  ;;  %v934_v59 = vmax.f32 %v678_v51, 0.0  ;;  %v422_v60 = vmul.f32 %v3911_v1, %v165_v47 }
  0x72   : > { %3239 = vst [vmem:[%s3972_s29 + $0x50] sm:$0xff] %v2983_v52  ;;  %v2728_v61 = vadd.f32 %v3931_v15, %v2471_v53  ;;  %v2472_v62 = vadd.f32 %v2216_v54, %v1189_v48  ;;  %v1705_v63 = vadd.f32 %v3925_v11, %v1448_v55  ;;  %v1449_v0 = vmul.f32 %v3919_v6, %v165_v47  ;;  %v170_v47 = vld [vmem:[%s3904_s14 + $0xa0] sm:$0xff] }
  0x73   : > { %v2473_v3 = vadd.f32 %v2217_v58, %v1190_v57  ;;  %v1191_v4 = vmul.f32 %v3917_v5, %v934_v59  ;;  %v679_v7 = vadd.f32 %v3913_v2, %v422_v60  ;;  %v423_v8 = vmul.f32 %v3911_v1, %v166_v56  ;;  %v171_v60 = vld [vmem:[%s3904_s14 + $0xa8] sm:$0xff] }
  0x74   : > { %v2984_v10 = vmax.f32 %v2728_v61, 0.0  ;;  %v2729_v13 = vadd.f32 %v3931_v15, %v2472_v62  ;;  %v1961_v14 = vmax.f32 %v1705_v63, 0.0  ;;  %v1706_v16 = vadd.f32 %v3925_v11, %v1449_v0 }
  0x75   : > { %v2730_v17 = vadd.f32 %v3931_v15, %v2473_v3  ;;  %v935_v18 = vmax.f32 %v679_v7, 0.0  ;;  %v680_v19 = vadd.f32 %v3913_v2, %v423_v8  ;;  %v1450_v20 = vmul.f32 %v3919_v6, %v166_v56 }
  0x76   : > { %3240 = vst [vmem:[%s3972_s29 + $0x58] sm:$0xff] %v2984_v10  ;;  %v2985_v21 = vmax.f32 %v2729_v13, 0.0  ;;  %v2218_v22 = vmul.f32 %v3927_v12, %v1961_v14  ;;  %v1962_v23 = vmax.f32 %v1706_v16, 0.0  ;;  %v424_v24 = vmul.f32 %v3911_v1, %v167_v9 }
  0x77   : > { %v2986_v26 = vmax.f32 %v2730_v17, 0.0  ;;  %v1192_v27 = vmul.f32 %v3917_v5, %v935_v18  ;;  %v936_v28 = vmax.f32 %v680_v19, 0.0  ;;  %v1707_v29 = vadd.f32 %v3925_v11, %v1450_v20 }
  0x78   : > { %3241 = vst [vmem:[%s3972_s29 + $0x60] sm:$0xff] %v2985_v21  ;;  %v2474_v30 = vadd.f32 %v2218_v22, %v1191_v4  ;;  %v2219_v31 = vmul.f32 %v3927_v12, %v1962_v23  ;;  %v681_v32 = vadd.f32 %v3913_v2, %v424_v24  ;;  %v1451_v33 = vmul.f32 %v3919_v6, %v167_v9  ;;  %v172_v9 = vld [vmem:[%s3904_s14 + $0xb0] sm:$0xff] }
  0x79   : > { %3242 = vst [vmem:[%s3972_s29 + $0x68] sm:$0xff] %v2986_v26  ;;  %v1193_v35 = vmul.f32 %v3917_v5, %v936_v28  ;;  %v1963_v36 = vmax.f32 %v1707_v29, 0.0  ;;  %v425_v37 = vmul.f32 %v3911_v1, %v168_v25  ;;  %v1452_v38 = vmul.f32 %v3919_v6, %v168_v25  ;;  %v173_v25 = vld [vmem:[%s3904_s14 + $0xb8] sm:$0xff] }
  0x7a   : > { %v2731_v39 = vadd.f32 %v3931_v15, %v2474_v30  ;;  %v2475_v40 = vadd.f32 %v2219_v31, %v1192_v27  ;;  %v937_v41 = vmax.f32 %v681_v32, 0.0  ;;  %v1708_v42 = vadd.f32 %v3925_v11, %v1451_v33 }
  0x7b   : > { %v2220_v43 = vmul.f32 %v3927_v12, %v1963_v36  ;;  %v682_v44 = vadd.f32 %v3913_v2, %v425_v37  ;;  %v1709_v45 = vadd.f32 %v3925_v11, %v1452_v38  ;;  %v426_v46 = vmul.f32 %v3911_v1, %v169_v34  ;;  %v174_v38 = vld [vmem:[%s3904_s14 + $0xc0] sm:$0xff] }
  0x7c   : > { %v2987_v48 = vmax.f32 %v2731_v39, 0.0  ;;  %v2732_v49 = vadd.f32 %v3931_v15, %v2475_v40  ;;  %v1194_v50 = vmul.f32 %v3917_v5, %v937_v41  ;;  %v1964_v51 = vmax.f32 %v1708_v42, 0.0 }
  0x7d   : > { %v2476_v52 = vadd.f32 %v2220_v43, %v1193_v35  ;;  %v938_v53 = vmax.f32 %v682_v44, 0.0  ;;  %v1965_v54 = vmax.f32 %v1709_v45, 0.0  ;;  %v683_v55 = vadd.f32 %v3913_v2, %v426_v46 }
  0x7e   : > { %3243 = vst [vmem:[%s3972_s29 + $0x70] sm:$0xff] %v2987_v48  ;;  %v2988_v56 = vmax.f32 %v2732_v49, 0.0  ;;  %v2221_v57 = vmul.f32 %v3927_v12, %v1964_v51  ;;  %v1453_v58 = vmul.f32 %v3919_v6, %v169_v34  ;;  %v427_v59 = vmul.f32 %v3911_v1, %v170_v47  ;;  %v175_v51 = vld [vmem:[%s3904_s14 + $0xc8] sm:$0xff] }
  0x7f   : > { %v2733_v61 = vadd.f32 %v3931_v15, %v2476_v52  ;;  %v1195_v62 = vmul.f32 %v3917_v5, %v938_v53  ;;  %v2222_v63 = vmul.f32 %v3927_v12, %v1965_v54  ;;  %v939_v0 = vmax.f32 %v683_v55, 0.0 }
  0x80   : > { %3244 = vst [vmem:[%s3972_s29 + $0x78] sm:$0xff] %v2988_v56  ;;  %v2477_v3 = vadd.f32 %v2221_v57, %v1194_v50  ;;  %v1710_v4 = vadd.f32 %v3925_v11, %v1453_v58  ;;  %v684_v7 = vadd.f32 %v3913_v2, %v427_v59  ;;  %v1454_v8 = vmul.f32 %v3919_v6, %v170_v47 }
  0x81   : > { %v2989_v10 = vmax.f32 %v2733_v61, 0.0  ;;  %v2478_v13 = vadd.f32 %v2222_v63, %v1195_v62  ;;  %v1196_v14 = vmul.f32 %v3917_v5, %v939_v0  ;;  %v428_v16 = vmul.f32 %v3911_v1, %v171_v60 }
  0x82   : > { %v2734_v17 = vadd.f32 %v3931_v15, %v2477_v3  ;;  %v1966_v18 = vmax.f32 %v1710_v4, 0.0  ;;  %v940_v19 = vmax.f32 %v684_v7, 0.0  ;;  %v1711_v20 = vadd.f32 %v3925_v11, %v1454_v8 }
  0x83   : > { %3245 = vst [vmem:[%s3972_s29 + $0x80] sm:$0xff] %v2989_v10  ;;  %v2735_v21 = vadd.f32 %v3931_v15, %v2478_v13  ;;  %v685_v22 = vadd.f32 %v3913_v2, %v428_v16  ;;  %v1455_v23 = vmul.f32 %v3919_v6, %v171_v60  ;;  %v429_v24 = vmul.f32 %v3911_v1, %v172_v9  ;;  %v176_v60 = vld [vmem:[%s3904_s14 + $0xd0] sm:$0xff]  ;;  %v177_v16 = vld [vmem:[%s3904_s14 + $0xd8] sm:$0xff] }
  0x84   : > { %v2990_v26 = vmax.f32 %v2734_v17, 0.0  ;;  %v2223_v27 = vmul.f32 %v3927_v12, %v1966_v18  ;;  %v1197_v28 = vmul.f32 %v3917_v5, %v940_v19  ;;  %v1967_v29 = vmax.f32 %v1711_v20, 0.0 }
  0x85   : > { %v2991_v30 = vmax.f32 %v2735_v21, 0.0  ;;  %v941_v31 = vmax.f32 %v685_v22, 0.0  ;;  %v1712_v32 = vadd.f32 %v3925_v11, %v1455_v23  ;;  %v686_v33 = vadd.f32 %v3913_v2, %v429_v24 }
  0x86   : > { %3246 = vst [vmem:[%s3972_s29 + $0x88] sm:$0xff] %v2990_v26  ;;  %v2479_v34 = vadd.f32 %v2223_v27, %v1196_v14  ;;  %v2224_v35 = vmul.f32 %v3927_v12, %v1967_v29  ;;  %v1456_v36 = vmul.f32 %v3919_v6, %v172_v9  ;;  %v430_v37 = vmul.f32 %v3911_v1, %v173_v25  ;;  %v178_v29 = vld [vmem:[%s3904_s14 + $0xe0] sm:$0xff] }
  0x87   : > { %3247 = vst [vmem:[%s3972_s29 + $0x90] sm:$0xff] %v2991_v30  ;;  %v1198_v39 = vmul.f32 %v3917_v5, %v941_v31  ;;  %v1968_v40 = vmax.f32 %v1712_v32, 0.0  ;;  %v942_v41 = vmax.f32 %v686_v33, 0.0  ;;  %v1457_v42 = vmul.f32 %v3919_v6, %v173_v25 }
  0x88   : > { %v2736_v43 = vadd.f32 %v3931_v15, %v2479_v34  ;;  %v2480_v44 = vadd.f32 %v2224_v35, %v1197_v28  ;;  %v1713_v45 = vadd.f32 %v3925_v11, %v1456_v36  ;;  %v687_v46 = vadd.f32 %v3913_v2, %v430_v37 }
  0x89   : > { %v2225_v47 = vmul.f32 %v3927_v12, %v1968_v40  ;;  %v1199_v48 = vmul.f32 %v3917_v5, %v942_v41  ;;  %v1714_v49 = vadd.f32 %v3925_v11, %v1457_v42  ;;  %v431_v50 = vmul.f32 %v3911_v1, %v174_v38 }
  0x8a   : > { %v2992_v52 = vmax.f32 %v2736_v43, 0.0  ;;  %v2737_v53 = vadd.f32 %v3931_v15, %v2480_v44  ;;  %v1969_v54 = vmax.f32 %v1713_v45, 0.0  ;;  %v943_v55 = vmax.f32 %v687_v46, 0.0 }
  0x8b   : > { %v2481_v56 = vadd.f32 %v2225_v47, %v1198_v39  ;;  %v1970_v57 = vmax.f32 %v1714_v49, 0.0  ;;  %v688_v58 = vadd.f32 %v3913_v2, %v431_v50  ;;  %v1458_v59 = vmul.f32 %v3919_v6, %v174_v38  ;;  %v179_v38 = vld [vmem:[%s3904_s14 + $0xe8] sm:$0xff] }
  0x8c   : > { %3248 = vst [vmem:[%s3972_s29 + $0x98] sm:$0xff] %v2992_v52  ;;  %v2993_v61 = vmax.f32 %v2737_v53, 0.0  ;;  %v2226_v62 = vmul.f32 %v3927_v12, %v1969_v54  ;;  %v1200_v63 = vmul.f32 %v3917_v5, %v943_v55  ;;  %v432_v0 = vmul.f32 %v3911_v1, %v175_v51 }
  0x8d   : > { %v2738_v3 = vadd.f32 %v3931_v15, %v2481_v56  ;;  %v2227_v4 = vmul.f32 %v3927_v12, %v1970_v57  ;;  %v944_v7 = vmax.f32 %v688_v58, 0.0  ;;  %v1715_v8 = vadd.f32 %v3925_v11, %v1458_v59 }
  0x8e   : > { %3249 = vst [vmem:[%s3972_s29 + $0xa0] sm:$0xff] %v2993_v61  ;;  %v2482_v9 = vadd.f32 %v2226_v62, %v1199_v48  ;;  %v689_v10 = vadd.f32 %v3913_v2, %v432_v0  ;;  %v1459_v13 = vmul.f32 %v3919_v6, %v175_v51  ;;  %v433_v14 = vmul.f32 %v3911_v1, %v176_v60  ;;  %v180_v51 = vld [vmem:[%s3904_s14 + $0xf0] sm:$0xff]  ;;  %v181_v0 = vld [vmem:[%s3904_s14 + $0xf8] sm:$0xff] }
  0x8f   : > { %v2994_v17 = vmax.f32 %v2738_v3, 0.0  ;;  %v2483_v18 = vadd.f32 %v2227_v4, %v1200_v63  ;;  %v1201_v19 = vmul.f32 %v3917_v5, %v944_v7  ;;  %v1971_v20 = vmax.f32 %v1715_v8, 0.0 }
  0x90   : > { %v2739_v21 = vadd.f32 %v3931_v15, %v2482_v9  ;;  %v945_v22 = vmax.f32 %v689_v10, 0.0  ;;  %v1716_v23 = vadd.f32 %v3925_v11, %v1459_v13  ;;  %v690_v24 = vadd.f32 %v3913_v2, %v433_v14 }
  0x91   : > { %3250 = vst [vmem:[%s3972_s29 + $0xa8] sm:$0xff] %v2994_v17  ;;  %v2740_v25 = vadd.f32 %v3931_v15, %v2483_v18  ;;  %v2228_v26 = vmul.f32 %v3927_v12, %v1971_v20  ;;  %v1460_v27 = vmul.f32 %v3919_v6, %v176_v60  ;;  %v434_v28 = vmul.f32 %v3911_v1, %v177_v16  ;;  %v182_v20 = vld [vmem:[%s3904_s14 + $0x100] sm:$0xff] }
  0x92   : > { %v2995_v30 = vmax.f32 %v2739_v21, 0.0  ;;  %v1202_v31 = vmul.f32 %v3917_v5, %v945_v22  ;;  %v1972_v32 = vmax.f32 %v1716_v23, 0.0  ;;  %v946_v33 = vmax.f32 %v690_v24, 0.0 }
  0x93   : > { %v2996_v34 = vmax.f32 %v2740_v25, 0.0  ;;  %v2484_v35 = vadd.f32 %v2228_v26, %v1201_v19  ;;  %v1717_v36 = vadd.f32 %v3925_v11, %v1460_v27  ;;  %v691_v37 = vadd.f32 %v3913_v2, %v434_v28 }
  0x94   : > { %3251 = vst [vmem:[%s3972_s29 + $0xb0] sm:$0xff] %v2995_v30  ;;  %v2229_v39 = vmul.f32 %v3927_v12, %v1972_v32  ;;  %v1203_v40 = vmul.f32 %v3917_v5, %v946_v33  ;;  %v1461_v41 = vmul.f32 %v3919_v6, %v177_v16  ;;  %v435_v42 = vmul.f32 %v3911_v1, %v178_v29  ;;  %v183_v33 = vld [vmem:[%s3904_s14 + $0x108] sm:$0xff] }
  0x95   : > { %3252 = vst [vmem:[%s3972_s29 + $0xb8] sm:$0xff] %v2996_v34  ;;  %v2741_v43 = vadd.f32 %v3931_v15, %v2484_v35  ;;  %v1973_v44 = vmax.f32 %v1717_v36, 0.0  ;;  %v947_v45 = vmax.f32 %v691_v37, 0.0  ;;  %v1462_v46 = vmul.f32 %v3919_v6, %v178_v29 }
  0x96   : > { %v2485_v47 = vadd.f32 %v2229_v39, %v1202_v31  ;;  %v1718_v48 = vadd.f32 %v3925_v11, %v1461_v41  ;;  %v692_v49 = vadd.f32 %v3913_v2, %v435_v42  ;;  %v436_v50 = vmul.f32 %v3911_v1, %v179_v38  ;;  %v184_v42 = vld [vmem:[%s3904_s14 + $0x110] sm:$0xff] }
  0x97   : > { %v2997_v52 = vmax.f32 %v2741_v43, 0.0  ;;  %v2230_v53 = vmul.f32 %v3927_v12, %v1973_v44  ;;  %v1204_v54 = vmul.f32 %v3917_v5, %v947_v45  ;;  %v1719_v55 = vadd.f32 %v3925_v11, %v1462_v46 }
  0x98   : > { %v2742_v56 = vadd.f32 %v3931_v15, %v2485_v47  ;;  %v1974_v57 = vmax.f32 %v1718_v48, 0.0  ;;  %v948_v58 = vmax.f32 %v692_v49, 0.0  ;;  %v693_v59 = vadd.f32 %v3913_v2, %v436_v50 }
  0x99   : > { %3253 = vst [vmem:[%s3972_s29 + $0xc0] sm:$0xff] %v2997_v52  ;;  %v2486_v60 = vadd.f32 %v2230_v53, %v1203_v40  ;;  %v1975_v61 = vmax.f32 %v1719_v55, 0.0  ;;  %v1463_v62 = vmul.f32 %v3919_v6, %v179_v38  ;;  %v437_v63 = vmul.f32 %v3911_v1, %v180_v51  ;;  %v185_v55 = vld [vmem:[%s3904_s14 + $0x118] sm:$0xff] }
  0x9a   : > { %v2998_v3 = vmax.f32 %v2742_v56, 0.0  ;;  %v2231_v4 = vmul.f32 %v3927_v12, %v1974_v57  ;;  %v1205_v7 = vmul.f32 %v3917_v5, %v948_v58  ;;  %v949_v8 = vmax.f32 %v693_v59, 0.0 }
  0x9b   : > { %v2743_v9 = vadd.f32 %v3931_v15, %v2486_v60  ;;  %v2232_v10 = vmul.f32 %v3927_v12, %v1975_v61  ;;  %v1720_v13 = vadd.f32 %v3925_v11, %v1463_v62  ;;  %v694_v14 = vadd.f32 %v3913_v2, %v437_v63 }
  0x9c   : > { %3254 = vst [vmem:[%s3972_s29 + $0xc8] sm:$0xff] %v2998_v3  ;;  %v2487_v16 = vadd.f32 %v2231_v4, %v1204_v54  ;;  %v1206_v17 = vmul.f32 %v3917_v5, %v949_v8  ;;  %v1464_v18 = vmul.f32 %v3919_v6, %v180_v51  ;;  %v438_v19 = vmul.f32 %v3911_v1, %v181_v0  ;;  %v186_v8 = vld [vmem:[%s3904_s14 + $0x120] sm:$0xff] }
  0x9d   : > { %v2999_v21 = vmax.f32 %v2743_v9, 0.0  ;;  %v2488_v22 = vadd.f32 %v2232_v10, %v1205_v7  ;;  %v1976_v23 = vmax.f32 %v1720_v13, 0.0  ;;  %v950_v24 = vmax.f32 %v694_v14, 0.0 }
  0x9e   : > { %v2744_v25 = vadd.f32 %v3931_v15, %v2487_v16  ;;  %v1721_v26 = vadd.f32 %v3925_v11, %v1464_v18  ;;  %v695_v27 = vadd.f32 %v3913_v2, %v438_v19  ;;  %v1465_v28 = vmul.f32 %v3919_v6, %v181_v0 }
  0x9f   : > { %3255 = vst [vmem:[%s3972_s29 + $0xd0] sm:$0xff] %v2999_v21  ;;  %v2745_v29 = vadd.f32 %v3931_v15, %v2488_v22  ;;  %v2233_v30 = vmul.f32 %v3927_v12, %v1976_v23  ;;  %v1207_v31 = vmul.f32 %v3917_v5, %v950_v24  ;;  %v439_v32 = vmul.f32 %v3911_v1, %v182_v20 }
  0xa0   : > { %v3000_v34 = vmax.f32 %v2744_v25, 0.0  ;;  %v1977_v35 = vmax.f32 %v1721_v26, 0.0  ;;  %v951_v36 = vmax.f32 %v695_v27, 0.0  ;;  %v1722_v37 = vadd.f32 %v3925_v11, %v1465_v28 }
  0xa1   : > { %v3001_v38 = vmax.f32 %v2745_v29, 0.0  ;;  %v2489_v39 = vadd.f32 %v2233_v30, %v1206_v17  ;;  %v696_v40 = vadd.f32 %v3913_v2, %v439_v32  ;;  %v1466_v41 = vmul.f32 %v3919_v6, %v182_v20  ;;  %v187_v20 = vld [vmem:[%s3904_s14 + $0x128] sm:$0xff] }
  0xa2   : > { %3256 = vst [vmem:[%s3972_s29 + $0xd8] sm:$0xff] %v3000_v34  ;;  %v2234_v43 = vmul.f32 %v3927_v12, %v1977_v35  ;;  %v1208_v44 = vmul.f32 %v3917_v5, %v951_v36  ;;  %v1978_v45 = vmax.f32 %v1722_v37, 0.0  ;;  %v440_v46 = vmul.f32 %v3911_v1, %v183_v33 }
  0xa3   : > { %3257 = vst [vmem:[%s3972_s29 + $0xe0] sm:$0xff] %v3001_v38  ;;  %v2746_v47 = vadd.f32 %v3931_v15, %v2489_v39  ;;  %v952_v48 = vmax.f32 %v696_v40, 0.0  ;;  %v1723_v49 = vadd.f32 %v3925_v11, %v1466_v41  ;;  %v1467_v50 = vmul.f32 %v3919_v6, %v183_v33  ;;  %v188_v33 = vld [vmem:[%s3904_s14 + $0x130] sm:$0xff] }
  0xa4   : > { %v2490_v51 = vadd.f32 %v2234_v43, %v1207_v31  ;;  %v2235_v52 = vmul.f32 %v3927_v12, %v1978_v45  ;;  %v697_v53 = vadd.f32 %v3913_v2, %v440_v46  ;;  %v441_v54 = vmul.f32 %v3911_v1, %v184_v42  ;;  %v189_v46 = vld [vmem:[%s3904_s14 + $0x138] sm:$0xff] }
  0xa5   : > { %v3002_v56 = vmax.f32 %v2746_v47, 0.0  ;;  %v1209_v57 = vmul.f32 %v3917_v5, %v952_v48  ;;  %v1979_v58 = vmax.f32 %v1723_v49, 0.0  ;;  %v1724_v59 = vadd.f32 %v3925_v11, %v1467_v50 }
  0xa6   : > { %v2747_v60 = vadd.f32 %v3931_v15, %v2490_v51  ;;  %v2491_v61 = vadd.f32 %v2235_v52, %v1208_v44  ;;  %v953_v62 = vmax.f32 %v697_v53, 0.0  ;;  %v698_v63 = vadd.f32 %v3913_v2, %v441_v54 }
  0xa7   : > { %3258 = vst [vmem:[%s3972_s29 + $0xe8] sm:$0xff] %v3002_v56  ;;  %v2236_v0 = vmul.f32 %v3927_v12, %v1979_v58  ;;  %v1980_v3 = vmax.f32 %v1724_v59, 0.0  ;;  %v1468_v4 = vmul.f32 %v3919_v6, %v184_v42  ;;  %v442_v7 = vmul.f32 %v3911_v1, %v185_v55  ;;  %v190_v59 = vld [vmem:[%s3904_s14 + $0x140] sm:$0xff] }
  0xa8   : > { %v3003_v9 = vmax.f32 %v2747_v60, 0.0  ;;  %v2748_v10 = vadd.f32 %v3931_v15, %v2491_v61  ;;  %v1210_v13 = vmul.f32 %v3917_v5, %v953_v62  ;;  %v954_v14 = vmax.f32 %v698_v63, 0.0 }
  0xa9   : > { %v2492_v16 = vadd.f32 %v2236_v0, %v1209_v57  ;;  %v2237_v17 = vmul.f32 %v3927_v12, %v1980_v3  ;;  %v1725_v18 = vadd.f32 %v3925_v11, %v1468_v4  ;;  %v699_v19 = vadd.f32 %v3913_v2, %v442_v7 }
  0xaa   : > { %3259 = vst [vmem:[%s3972_s29 + $0xf0] sm:$0xff] %v3003_v9  ;;  %v3004_v21 = vmax.f32 %v2748_v10, 0.0  ;;  %v1211_v22 = vmul.f32 %v3917_v5, %v954_v14  ;;  %v1469_v23 = vmul.f32 %v3919_v6, %v185_v55  ;;  %v443_v24 = vmul.f32 %v3911_v1, %v186_v8  ;;  %v191_v14 = vld [vmem:[%s3904_s14 + $0x148] sm:$0xff] }
  0xab   : > { %v2749_v25 = vadd.f32 %v3931_v15, %v2492_v16  ;;  %v2493_v26 = vadd.f32 %v2237_v17, %v1210_v13  ;;  %v1981_v27 = vmax.f32 %v1725_v18, 0.0  ;;  %v955_v28 = vmax.f32 %v699_v19, 0.0 }
  0xac   : > { %3260 = vst [vmem:[%s3972_s29 + $0xf8] sm:$0xff] %v3004_v21  ;;  %v1726_v29 = vadd.f32 %v3925_v11, %v1469_v23  ;;  %v700_v30 = vadd.f32 %v3913_v2, %v443_v24  ;;  %v1470_v31 = vmul.f32 %v3919_v6, %v186_v8  ;;  %v444_v32 = vmul.f32 %v3911_v1, %v187_v20  ;;  %v192_v24 = vld [vmem:[%s3904_s14 + $0x150] sm:$0xff] }
  0xad   : > { %v3005_v34 = vmax.f32 %v2749_v25, 0.0  ;;  %v2750_v35 = vadd.f32 %v3931_v15, %v2493_v26  ;;  %v2238_v36 = vmul.f32 %v3927_v12, %v1981_v27  ;;  %v1212_v37 = vmul.f32 %v3917_v5, %v955_v28 }
  0xae   : > { %v1982_v38 = vmax.f32 %v1726_v29, 0.0  ;;  %v956_v39 = vmax.f32 %v700_v30, 0.0  ;;  %v1727_v40 = vadd.f32 %v3925_v11, %v1470_v31  ;;  %v701_v41 = vadd.f32 %v3913_v2, %v444_v32 }
  0xaf   : > { %3261 = vst [vmem:[%s3972_s29 + $0x100] sm:$0xff] %v3005_v34  ;;  %v3006_v42 = vmax.f32 %v2750_v35, 0.0  ;;  %v2494_v43 = vadd.f32 %v2238_v36, %v1211_v22  ;;  %v1471_v44 = vmul.f32 %v3919_v6, %v187_v20  ;;  %v445_v45 = vmul.f32 %v3911_v1, %v188_v33 }
  0xb0   : > { %v2239_v47 = vmul.f32 %v3927_v12, %v1982_v38  ;;  %v1213_v48 = vmul.f32 %v3917_v5, %v956_v39  ;;  %v1983_v49 = vmax.f32 %v1727_v40, 0.0  ;;  %v957_v50 = vmax.f32 %v701_v41, 0.0 }
  0xb1   : > { %3262 = vst [vmem:[%s3972_s29 + $0x108] sm:$0xff] %v3006_v42  ;;  %v2751_v51 = vadd.f32 %v3931_v15, %v2494_v43  ;;  %v1728_v52 = vadd.f32 %v3925_v11, %v1471_v44  ;;  %v702_v53 = vadd.f32 %v3913_v2, %v445_v45  ;;  %v1472_v54 = vmul.f32 %v3919_v6, %v188_v33 }
  0xb2   : > { %v2495_v55 = vadd.f32 %v2239_v47, %v1212_v37  ;;  %v2240_v56 = vmul.f32 %v3927_v12, %v1983_v49  ;;  %v1214_v57 = vmul.f32 %v3917_v5, %v957_v50  ;;  %v446_v58 = vmul.f32 %v3911_v1, %v189_v46  ;;  %v193_v37 = vld [vmem:[%s3904_s14 + $0x158] sm:$0xff]  ;;  %v194_v50 = vld [vmem:[%s3904_s14 + $0x160] sm:$0xff] }
  0xb3   : > { %v3007_v60 = vmax.f32 %v2751_v51, 0.0  ;;  %v1984_v61 = vmax.f32 %v1728_v52, 0.0  ;;  %v958_v62 = vmax.f32 %v702_v53, 0.0  ;;  %v1729_v63 = vadd.f32 %v3925_v11, %v1472_v54 }
  0xb4   : > { %v2752_v0 = vadd.f32 %v3931_v15, %v2495_v55  ;;  %v2496_v3 = vadd.f32 %v2240_v56, %v1213_v48  ;;  %v703_v4 = vadd.f32 %v3913_v2, %v446_v58  ;;  %v1473_v7 = vmul.f32 %v3919_v6, %v189_v46 }
  0xb5   : > { %3263 = vst [vmem:[%s3972_s29 + $0x110] sm:$0xff] %v3007_v60  ;;  %v2241_v8 = vmul.f32 %v3927_v12, %v1984_v61  ;;  %v1215_v9 = vmul.f32 %v3917_v5, %v958_v62  ;;  %v1985_v10 = vmax.f32 %v1729_v63, 0.0  ;;  %v447_v13 = vmul.f32 %v3911_v1, %v190_v59 }
  0xb6   : > { %v3008_v16 = vmax.f32 %v2752_v0, 0.0  ;;  %v2753_v17 = vadd.f32 %v3931_v15, %v2496_v3  ;;  %v959_v18 = vmax.f32 %v703_v4, 0.0  ;;  %v1730_v19 = vadd.f32 %v3925_v11, %v1473_v7 }
  0xb7   : > { %v2497_v20 = vadd.f32 %v2241_v8, %v1214_v57  ;;  %v2242_v21 = vmul.f32 %v3927_v12, %v1985_v10  ;;  %v704_v22 = vadd.f32 %v3913_v2, %v447_v13  ;;  %v1474_v23 = vmul.f32 %v3919_v6, %v190_v59  ;;  %v195_v59 = vld [vmem:[%s3904_s14 + $0x168] sm:$0xff] }
  0xb8   : > { %3264 = vst [vmem:[%s3972_s29 + $0x118] sm:$0xff] %v3008_v16  ;;  %v3009_v25 = vmax.f32 %v2753_v17, 0.0  ;;  %v1216_v26 = vmul.f32 %v3917_v5, %v959_v18  ;;  %v1986_v27 = vmax.f32 %v1730_v19, 0.0  ;;  %v448_v28 = vmul.f32 %v3911_v1, %v191_v14 }
  0xb9   : > { %v2754_v29 = vadd.f32 %v3931_v15, %v2497_v20  ;;  %v2498_v30 = vadd.f32 %v2242_v21, %v1215_v9  ;;  %v960_v31 = vmax.f32 %v704_v22, 0.0  ;;  %v1731_v32 = vadd.f32 %v3925_v11, %v1474_v23 }
  0xba   : > { %3265 = vst [vmem:[%s3972_s29 + $0x120] sm:$0xff] %v3009_v25  ;;  %v2243_v33 = vmul.f32 %v3927_v12, %v1986_v27  ;;  %v705_v34 = vadd.f32 %v3913_v2, %v448_v28  ;;  %v1475_v35 = vmul.f32 %v3919_v6, %v191_v14  ;;  %v449_v36 = vmul.f32 %v3911_v1, %v192_v24  ;;  %v196_v14 = vld [vmem:[%s3904_s14 + $0x170] sm:$0xff]  ;;  %v197_v28 = vld [vmem:[%s3904_s14 + $0x178] sm:$0xff] }
  0xbb   : > { %v3010_v38 = vmax.f32 %v2754_v29, 0.0  ;;  %v2755_v39 = vadd.f32 %v3931_v15, %v2498_v30  ;;  %v1217_v40 = vmul.f32 %v3917_v5, %v960_v31  ;;  %v1987_v41 = vmax.f32 %v1731_v32, 0.0 }
  0xbc   : > { %v2499_v42 = vadd.f32 %v2243_v33, %v1216_v26  ;;  %v961_v43 = vmax.f32 %v705_v34, 0.0  ;;  %v1732_v44 = vadd.f32 %v3925_v11, %v1475_v35  ;;  %v706_v45 = vadd.f32 %v3913_v2, %v449_v36 }
  0xbd   : > { %3266 = vst [vmem:[%s3972_s29 + $0x128] sm:$0xff] %v3010_v38  ;;  %v3011_v46 = vmax.f32 %v2755_v39, 0.0  ;;  %v2244_v47 = vmul.f32 %v3927_v12, %v1987_v41  ;;  %v1476_v48 = vmul.f32 %v3919_v6, %v192_v24  ;;  %v450_v49 = vmul.f32 %v3911_v1, %v193_v37  ;;  %v198_v41 = vld [vmem:[%s3904_s14 + $0x180] sm:$0xff] }
  0xbe   : > { %v2756_v51 = vadd.f32 %v3931_v15, %v2499_v42  ;;  %v1218_v52 = vmul.f32 %v3917_v5, %v961_v43  ;;  %v1988_v53 = vmax.f32 %v1732_v44, 0.0  ;;  %v962_v54 = vmax.f32 %v706_v45, 0.0 }
  0xbf   : > { %3267 = vst [vmem:[%s3972_s29 + $0x130] sm:$0xff] %v3011_v46  ;;  %v2500_v55 = vadd.f32 %v2244_v47, %v1217_v40  ;;  %v1733_v56 = vadd.f32 %v3925_v11, %v1476_v48  ;;  %v707_v57 = vadd.f32 %v3913_v2, %v450_v49  ;;  %v1477_v58 = vmul.f32 %v3919_v6, %v193_v37 }
  0xc0   : > { %v3012_v60 = vmax.f32 %v2756_v51, 0.0  ;;  %v2245_v61 = vmul.f32 %v3927_v12, %v1988_v53  ;;  %v1219_v62 = vmul.f32 %v3917_v5, %v962_v54  ;;  %v451_v63 = vmul.f32 %v3911_v1, %v194_v50 }
  0xc1   : > { %v2757_v0 = vadd.f32 %v3931_v15, %v2500_v55  ;;  %v1989_v3 = vmax.f32 %v1733_v56, 0.0  ;;  %v963_v4 = vmax.f32 %v707_v57, 0.0  ;;  %v1734_v7 = vadd.f32 %v3925_v11, %v1477_v58 }
  0xc2   : > { %3268 = vst [vmem:[%s3972_s29 + $0x138] sm:$0xff] %v3012_v60  ;;  %v2501_v8 = vadd.f32 %v2245_v61, %v1218_v52  ;;  %v708_v9 = vadd.f32 %v3913_v2, %v451_v63  ;;  %v1478_v10 = vmul.f32 %v3919_v6, %v194_v50  ;;  %v452_v13 = vmul.f32 %v3911_v1, %v195_v59  ;;  %v199_v50 = vld [vmem:[%s3904_s14 + $0x188] sm:$0xff]  ;;  %v200_v63 = vld [vmem:[%s3904_s14 + $0x190] sm:$0xff] }
  0xc3   : > { %v3013_v16 = vmax.f32 %v2757_v0, 0.0  ;;  %v2246_v17 = vmul.f32 %v3927_v12, %v1989_v3  ;;  %v1220_v18 = vmul.f32 %v3917_v5, %v963_v4  ;;  %v1990_v19 = vmax.f32 %v1734_v7, 0.0 }
  0xc4   : > { %v2758_v20 = vadd.f32 %v3931_v15, %v2501_v8  ;;  %v964_v21 = vmax.f32 %v708_v9, 0.0  ;;  %v1735_v22 = vadd.f32 %v3925_v11, %v1478_v10  ;;  %v709_v23 = vadd.f32 %v3913_v2, %v452_v13 }
  0xc5   : > { %3269 = vst [vmem:[%s3972_s29 + $0x140] sm:$0xff] %v3013_v16  ;;  %v2502_v24 = vadd.f32 %v2246_v17, %v1219_v62  ;;  %v2247_v25 = vmul.f32 %v3927_v12, %v1990_v19  ;;  %v1479_v26 = vmul.f32 %v3919_v6, %v195_v59  ;;  %v453_v27 = vmul.f32 %v3911_v1, %v196_v14  ;;  %v201_v19 = vld [vmem:[%s3904_s14 + $0x198] sm:$0xff] }
  0xc6   : > { %v3014_v29 = vmax.f32 %v2758_v20, 0.0  ;;  %v1221_v30 = vmul.f32 %v3917_v5, %v964_v21  ;;  %v1991_v31 = vmax.f32 %v1735_v22, 0.0  ;;  %v965_v32 = vmax.f32 %v709_v23, 0.0 }
  0xc7   : > { %v2759_v33 = vadd.f32 %v3931_v15, %v2502_v24  ;;  %v2503_v34 = vadd.f32 %v2247_v25, %v1220_v18  ;;  %v1736_v35 = vadd.f32 %v3925_v11, %v1479_v26  ;;  %v710_v36 = vadd.f32 %v3913_v2, %v453_v27 }
  0xc8   : > { %3270 = vst [vmem:[%s3972_s29 + $0x148] sm:$0xff] %v3014_v29  ;;  %v2248_v37 = vmul.f32 %v3927_v12, %v1991_v31  ;;  %v1222_v38 = vmul.f32 %v3917_v5, %v965_v32  ;;  %v1480_v39 = vmul.f32 %v3919_v6, %v196_v14  ;;  %v454_v40 = vmul.f32 %v3911_v1, %v197_v28  ;;  %v202_v32 = vld [vmem:[%s3904_s14 + $0x1a0] sm:$0xff] }
  0xc9   : > { %v3015_v42 = vmax.f32 %v2759_v33, 0.0  ;;  %v2760_v43 = vadd.f32 %v3931_v15, %v2503_v34  ;;  %v1992_v44 = vmax.f32 %v1736_v35, 0.0  ;;  %v966_v45 = vmax.f32 %v710_v36, 0.0 }
  0xca   : > { %v2504_v46 = vadd.f32 %v2248_v37, %v1221_v30  ;;  %v1737_v47 = vadd.f32 %v3925_v11, %v1480_v39  ;;  %v711_v48 = vadd.f32 %v3913_v2, %v454_v40  ;;  %v1481_v49 = vmul.f32 %v3919_v6, %v197_v28 }
  0xcb   : > { %3271 = vst [vmem:[%s3972_s29 + $0x150] sm:$0xff] %v3015_v42  ;;  %v3016_v51 = vmax.f32 %v2760_v43, 0.0  ;;  %v2249_v52 = vmul.f32 %v3927_v12, %v1992_v44  ;;  %v1223_v53 = vmul.f32 %v3917_v5, %v966_v45  ;;  %v455_v54 = vmul.f32 %v3911_v1, %v198_v41 }
  0xcc   : > { %v2761_v55 = vadd.f32 %v3931_v15, %v2504_v46  ;;  %v1993_v56 = vmax.f32 %v1737_v47, 0.0  ;;  %v967_v57 = vmax.f32 %v711_v48, 0.0  ;;  %v1738_v58 = vadd.f32 %v3925_v11, %v1481_v49 }
  0xcd   : > { %3272 = vst [vmem:[%s3972_s29 + $0x158] sm:$0xff] %v3016_v51  ;;  %v2505_v59 = vadd.f32 %v2249_v52, %v1222_v38  ;;  %v712_v60 = vadd.f32 %v3913_v2, %v455_v54  ;;  %v1482_v61 = vmul.f32 %v3919_v6, %v198_v41  ;;  %v456_v62 = vmul.f32 %v3911_v1, %v199_v50  ;;  %v203_v41 = vld [vmem:[%s3904_s14 + $0x1a8] sm:$0xff]  ;;  %v204_v54 = vld [vmem:[%s3904_s14 + $0x1b0] sm:$0xff] }
  0xce   : > { %v3017_v0 = vmax.f32 %v2761_v55, 0.0  ;;  %v2250_v3 = vmul.f32 %v3927_v12, %v1993_v56  ;;  %v1224_v4 = vmul.f32 %v3917_v5, %v967_v57  ;;  %v1994_v7 = vmax.f32 %v1738_v58, 0.0 }
  0xcf   : > { %v2762_v8 = vadd.f32 %v3931_v15, %v2505_v59  ;;  %v968_v9 = vmax.f32 %v712_v60, 0.0  ;;  %v1739_v10 = vadd.f32 %v3925_v11, %v1482_v61  ;;  %v713_v13 = vadd.f32 %v3913_v2, %v456_v62 }
  0xd0   : > { %3273 = vst [vmem:[%s3972_s29 + $0x160] sm:$0xff] %v3017_v0  ;;  %v2506_v14 = vadd.f32 %v2250_v3, %v1223_v53  ;;  %v2251_v16 = vmul.f32 %v3927_v12, %v1994_v7  ;;  %v1483_v17 = vmul.f32 %v3919_v6, %v199_v50  ;;  %v457_v18 = vmul.f32 %v3911_v1, %v200_v63  ;;  %v205_v7 = vld [vmem:[%s3904_s14 + $0x1b8] sm:$0xff] }
  0xd1   : > { %v3018_v20 = vmax.f32 %v2762_v8, 0.0  ;;  %v1225_v21 = vmul.f32 %v3917_v5, %v968_v9  ;;  %v1995_v22 = vmax.f32 %v1739_v10, 0.0  ;;  %v969_v23 = vmax.f32 %v713_v13, 0.0 }
  0xd2   : > { %v2763_v24 = vadd.f32 %v3931_v15, %v2506_v14  ;;  %v2507_v25 = vadd.f32 %v2251_v16, %v1224_v4  ;;  %v1740_v26 = vadd.f32 %v3925_v11, %v1483_v17  ;;  %v714_v27 = vadd.f32 %v3913_v2, %v457_v18 }
  0xd3   : > { %3274 = vst [vmem:[%s3972_s29 + $0x168] sm:$0xff] %v3018_v20  ;;  %v2252_v28 = vmul.f32 %v3927_v12, %v1995_v22  ;;  %v1226_v29 = vmul.f32 %v3917_v5, %v969_v23  ;;  %v1484_v30 = vmul.f32 %v3919_v6, %v200_v63  ;;  %v458_v31 = vmul.f32 %v3911_v1, %v201_v19  ;;  %v206_v23 = vld [vmem:[%s3904_s14 + $0x1c0] sm:$0xff] }
  0xd4   : > { %v3019_v33 = vmax.f32 %v2763_v24, 0.0  ;;  %v2764_v34 = vadd.f32 %v3931_v15, %v2507_v25  ;;  %v1996_v35 = vmax.f32 %v1740_v26, 0.0  ;;  %v970_v36 = vmax.f32 %v714_v27, 0.0 }
  0xd5   : > { %v2508_v37 = vadd.f32 %v2252_v28, %v1225_v21  ;;  %v1741_v38 = vadd.f32 %v3925_v11, %v1484_v30  ;;  %v715_v39 = vadd.f32 %v3913_v2, %v458_v31  ;;  %v1485_v40 = vmul.f32 %v3919_v6, %v201_v19 }
  0xd6   : > { %3275 = vst [vmem:[%s3972_s29 + $0x170] sm:$0xff] %v3019_v33  ;;  %v3020_v42 = vmax.f32 %v2764_v34, 0.0  ;;  %v2253_v43 = vmul.f32 %v3927_v12, %v1996_v35  ;;  %v1227_v44 = vmul.f32 %v3917_v5, %v970_v36  ;;  %v459_v45 = vmul.f32 %v3911_v1, %v202_v32 }
  0xd7   : > { %v2765_v46 = vadd.f32 %v3931_v15, %v2508_v37  ;;  %v1997_v47 = vmax.f32 %v1741_v38, 0.0  ;;  %v971_v48 = vmax.f32 %v715_v39, 0.0  ;;  %v1742_v49 = vadd.f32 %v3925_v11, %v1485_v40 }
  0xd8   : > { %3276 = vst [vmem:[%s3972_s29 + $0x178] sm:$0xff] %v3020_v42  ;;  %v2509_v50 = vadd.f32 %v2253_v43, %v1226_v29  ;;  %v716_v51 = vadd.f32 %v3913_v2, %v459_v45  ;;  %v1486_v52 = vmul.f32 %v3919_v6, %v202_v32  ;;  %v460_v53 = vmul.f32 %v3911_v1, %v203_v41  ;;  %v207_v32 = vld [vmem:[%s3904_s14 + $0x1c8] sm:$0xff]  ;;  %v208_v45 = vld [vmem:[%s3904_s14 + $0x1d0] sm:$0xff] }
  0xd9   : > { %v3021_v55 = vmax.f32 %v2765_v46, 0.0  ;;  %v2254_v56 = vmul.f32 %v3927_v12, %v1997_v47  ;;  %v1228_v57 = vmul.f32 %v3917_v5, %v971_v48  ;;  %v1998_v58 = vmax.f32 %v1742_v49, 0.0 }
  0xda   : > { %v2766_v59 = vadd.f32 %v3931_v15, %v2509_v50  ;;  %v972_v60 = vmax.f32 %v716_v51, 0.0  ;;  %v1743_v61 = vadd.f32 %v3925_v11, %v1486_v52  ;;  %v717_v62 = vadd.f32 %v3913_v2, %v460_v53 }
  0xdb   : > { %3277 = vst [vmem:[%s3972_s29 + $0x180] sm:$0xff] %v3021_v55  ;;  %v2510_v63 = vadd.f32 %v2254_v56, %v1227_v44  ;;  %v2255_v0 = vmul.f32 %v3927_v12, %v1998_v58  ;;  %v1487_v3 = vmul.f32 %v3919_v6, %v203_v41  ;;  %v461_v4 = vmul.f32 %v3911_v1, %v204_v54  ;;  %v209_v58 = vld [vmem:[%s3904_s14 + $0x1d8] sm:$0xff] }
  0xdc   : > { %v3022_v8 = vmax.f32 %v2766_v59, 0.0  ;;  %v1229_v9 = vmul.f32 %v3917_v5, %v972_v60  ;;  %v1999_v10 = vmax.f32 %v1743_v61, 0.0  ;;  %v973_v13 = vmax.f32 %v717_v62, 0.0 }
  0xdd   : > { %v2767_v14 = vadd.f32 %v3931_v15, %v2510_v63  ;;  %v2511_v16 = vadd.f32 %v2255_v0, %v1228_v57  ;;  %v1744_v17 = vadd.f32 %v3925_v11, %v1487_v3  ;;  %v718_v18 = vadd.f32 %v3913_v2, %v461_v4 }
  0xde   : > { %3278 = vst [vmem:[%s3972_s29 + $0x188] sm:$0xff] %v3022_v8  ;;  %v2256_v19 = vmul.f32 %v3927_v12, %v1999_v10  ;;  %v1230_v20 = vmul.f32 %v3917_v5, %v973_v13  ;;  %v1488_v21 = vmul.f32 %v3919_v6, %v204_v54  ;;  %v462_v22 = vmul.f32 %v3911_v1, %v205_v7  ;;  %v210_v13 = vld [vmem:[%s3904_s14 + $0x1e0] sm:$0xff] }
  0xdf   : > { %v3023_v24 = vmax.f32 %v2767_v14, 0.0  ;;  %v2768_v25 = vadd.f32 %v3931_v15, %v2511_v16  ;;  %v2000_v26 = vmax.f32 %v1744_v17, 0.0  ;;  %v974_v27 = vmax.f32 %v718_v18, 0.0 }
  0xe0   : > { %v2512_v28 = vadd.f32 %v2256_v19, %v1229_v9  ;;  %v1745_v29 = vadd.f32 %v3925_v11, %v1488_v21  ;;  %v719_v30 = vadd.f32 %v3913_v2, %v462_v22  ;;  %v1489_v31 = vmul.f32 %v3919_v6, %v205_v7 }
  0xe1   : > { %3279 = vst [vmem:[%s3972_s29 + $0x190] sm:$0xff] %v3023_v24  ;;  %v3024_v33 = vmax.f32 %v2768_v25, 0.0  ;;  %v2257_v34 = vmul.f32 %v3927_v12, %v2000_v26  ;;  %v1231_v35 = vmul.f32 %v3917_v5, %v974_v27  ;;  %v463_v36 = vmul.f32 %v3911_v1, %v206_v23 }
  0xe2   : > { %v2769_v37 = vadd.f32 %v3931_v15, %v2512_v28  ;;  %v2001_v38 = vmax.f32 %v1745_v29, 0.0  ;;  %v975_v39 = vmax.f32 %v719_v30, 0.0  ;;  %v1746_v40 = vadd.f32 %v3925_v11, %v1489_v31 }
  0xe3   : > { %3280 = vst [vmem:[%s3972_s29 + $0x198] sm:$0xff] %v3024_v33  ;;  %v2513_v41 = vadd.f32 %v2257_v34, %v1230_v20  ;;  %v720_v42 = vadd.f32 %v3913_v2, %v463_v36  ;;  %v1490_v43 = vmul.f32 %v3919_v6, %v206_v23  ;;  %v464_v44 = vmul.f32 %v3911_v1, %v207_v32  ;;  %v211_v23 = vld [vmem:[%s3904_s14 + $0x1e8] sm:$0xff]  ;;  %v212_v36 = vld [vmem:[%s3904_s14 + $0x1f0] sm:$0xff] }
  0xe4   : > { %v3025_v46 = vmax.f32 %v2769_v37, 0.0  ;;  %v2258_v47 = vmul.f32 %v3927_v12, %v2001_v38  ;;  %v1232_v48 = vmul.f32 %v3917_v5, %v975_v39  ;;  %v2002_v49 = vmax.f32 %v1746_v40, 0.0 }
  0xe5   : > { %v2770_v50 = vadd.f32 %v3931_v15, %v2513_v41  ;;  %v976_v51 = vmax.f32 %v720_v42, 0.0  ;;  %v1747_v52 = vadd.f32 %v3925_v11, %v1490_v43  ;;  %v721_v53 = vadd.f32 %v3913_v2, %v464_v44 }
  0xe6   : > { %3281 = vst [vmem:[%s3972_s29 + $0x1a0] sm:$0xff] %v3025_v46  ;;  %v2514_v54 = vadd.f32 %v2258_v47, %v1231_v35  ;;  %v2259_v55 = vmul.f32 %v3927_v12, %v2002_v49  ;;  %v1491_v56 = vmul.f32 %v3919_v6, %v207_v32  ;;  %v465_v57 = vmul.f32 %v3911_v1, %v208_v45  ;;  %v213_v49 = vld [vmem:[%s3904_s14 + $0x1f8] sm:$0xff] }
  0xe7   : > { %v3026_v59 = vmax.f32 %v2770_v50, 0.0  ;;  %v1233_v60 = vmul.f32 %v3917_v5, %v976_v51  ;;  %v2003_v61 = vmax.f32 %v1747_v52, 0.0  ;;  %v977_v62 = vmax.f32 %v721_v53, 0.0 }
  0xe8   : > { %v2771_v63 = vadd.f32 %v3931_v15, %v2514_v54  ;;  %v2515_v0 = vadd.f32 %v2259_v55, %v1232_v48  ;;  %v1748_v3 = vadd.f32 %v3925_v11, %v1491_v56  ;;  %v722_v4 = vadd.f32 %v3913_v2, %v465_v57 }
  0xe9   : > { %3282 = vst [vmem:[%s3972_s29 + $0x1a8] sm:$0xff] %v3026_v59  ;;  %v2260_v7 = vmul.f32 %v3927_v12, %v2003_v61  ;;  %v1234_v8 = vmul.f32 %v3917_v5, %v977_v62  ;;  %v1492_v9 = vmul.f32 %v3919_v6, %v208_v45  ;;  %v466_v10 = vmul.f32 %v3911_v1, %v209_v58  ;;  %v214_v62 = vld [vmem:[%s3904_s14 + $0x200] sm:$0xff] }
  0xea   : > { %v3027_v14 = vmax.f32 %v2771_v63, 0.0  ;;  %v2772_v16 = vadd.f32 %v3931_v15, %v2515_v0  ;;  %v2004_v17 = vmax.f32 %v1748_v3, 0.0  ;;  %v978_v18 = vmax.f32 %v722_v4, 0.0 }
  0xeb   : > { %v2516_v19 = vadd.f32 %v2260_v7, %v1233_v60  ;;  %v1749_v20 = vadd.f32 %v3925_v11, %v1492_v9  ;;  %v723_v21 = vadd.f32 %v3913_v2, %v466_v10  ;;  %v1493_v22 = vmul.f32 %v3919_v6, %v209_v58 }
  0xec   : > { %3283 = vst [vmem:[%s3972_s29 + $0x1b0] sm:$0xff] %v3027_v14  ;;  %v3028_v24 = vmax.f32 %v2772_v16, 0.0  ;;  %v2261_v25 = vmul.f32 %v3927_v12, %v2004_v17  ;;  %v1235_v26 = vmul.f32 %v3917_v5, %v978_v18  ;;  %v467_v27 = vmul.f32 %v3911_v1, %v210_v13 }
  0xed   : > { %v2773_v28 = vadd.f32 %v3931_v15, %v2516_v19  ;;  %v2005_v29 = vmax.f32 %v1749_v20, 0.0  ;;  %v979_v30 = vmax.f32 %v723_v21, 0.0  ;;  %v1750_v31 = vadd.f32 %v3925_v11, %v1493_v22 }
  0xee   : > { %3284 = vst [vmem:[%s3972_s29 + $0x1b8] sm:$0xff] %v3028_v24  ;;  %v2517_v32 = vadd.f32 %v2261_v25, %v1234_v8  ;;  %v724_v33 = vadd.f32 %v3913_v2, %v467_v27  ;;  %v1494_v34 = vmul.f32 %v3919_v6, %v210_v13  ;;  %v468_v35 = vmul.f32 %v3911_v1, %v211_v23  ;;  %v215_v13 = vld [vmem:[%s3904_s14 + $0x208] sm:$0xff]  ;;  %v216_v27 = vld [vmem:[%s3904_s14 + $0x210] sm:$0xff] }
  0xef   : > { %v3029_v37 = vmax.f32 %v2773_v28, 0.0  ;;  %v2262_v38 = vmul.f32 %v3927_v12, %v2005_v29  ;;  %v1236_v39 = vmul.f32 %v3917_v5, %v979_v30  ;;  %v2006_v40 = vmax.f32 %v1750_v31, 0.0 }
  0xf0   : > { %v2774_v41 = vadd.f32 %v3931_v15, %v2517_v32  ;;  %v980_v42 = vmax.f32 %v724_v33, 0.0  ;;  %v1751_v43 = vadd.f32 %v3925_v11, %v1494_v34  ;;  %v725_v44 = vadd.f32 %v3913_v2, %v468_v35 }
  0xf1   : > { %3285 = vst [vmem:[%s3972_s29 + $0x1c0] sm:$0xff] %v3029_v37  ;;  %v2518_v45 = vadd.f32 %v2262_v38, %v1235_v26  ;;  %v2263_v46 = vmul.f32 %v3927_v12, %v2006_v40  ;;  %v1495_v47 = vmul.f32 %v3919_v6, %v211_v23  ;;  %v469_v48 = vmul.f32 %v3911_v1, %v212_v36  ;;  %v217_v40 = vld [vmem:[%s3904_s14 + $0x218] sm:$0xff] }
  0xf2   : > { %v3030_v50 = vmax.f32 %v2774_v41, 0.0  ;;  %v1237_v51 = vmul.f32 %v3917_v5, %v980_v42  ;;  %v2007_v52 = vmax.f32 %v1751_v43, 0.0  ;;  %v981_v53 = vmax.f32 %v725_v44, 0.0 }
  0xf3   : > { %v2775_v54 = vadd.f32 %v3931_v15, %v2518_v45  ;;  %v2519_v55 = vadd.f32 %v2263_v46, %v1236_v39  ;;  %v1752_v56 = vadd.f32 %v3925_v11, %v1495_v47  ;;  %v726_v57 = vadd.f32 %v3913_v2, %v469_v48 }
  0xf4   : > { %3286 = vst [vmem:[%s3972_s29 + $0x1c8] sm:$0xff] %v3030_v50  ;;  %v2264_v58 = vmul.f32 %v3927_v12, %v2007_v52  ;;  %v1238_v59 = vmul.f32 %v3917_v5, %v981_v53  ;;  %v1496_v60 = vmul.f32 %v3919_v6, %v212_v36  ;;  %v470_v61 = vmul.f32 %v3911_v1, %v213_v49  ;;  %v218_v53 = vld [vmem:[%s3904_s14 + $0x220] sm:$0xff] }
  0xf5   : > { %v3031_v63 = vmax.f32 %v2775_v54, 0.0  ;;  %v2776_v0 = vadd.f32 %v3931_v15, %v2519_v55  ;;  %v2008_v3 = vmax.f32 %v1752_v56, 0.0  ;;  %v982_v4 = vmax.f32 %v726_v57, 0.0 }
  0xf6   : > { %v2520_v7 = vadd.f32 %v2264_v58, %v1237_v51  ;;  %v1753_v8 = vadd.f32 %v3925_v11, %v1496_v60  ;;  %v727_v9 = vadd.f32 %v3913_v2, %v470_v61  ;;  %v1497_v10 = vmul.f32 %v3919_v6, %v213_v49 }
  0xf7   : > { %3287 = vst [vmem:[%s3972_s29 + $0x1d0] sm:$0xff] %v3031_v63  ;;  %v3032_v14 = vmax.f32 %v2776_v0, 0.0  ;;  %v2265_v16 = vmul.f32 %v3927_v12, %v2008_v3  ;;  %v1239_v17 = vmul.f32 %v3917_v5, %v982_v4  ;;  %v471_v18 = vmul.f32 %v3911_v1, %v214_v62 }
  0xf8   : > { %v2777_v19 = vadd.f32 %v3931_v15, %v2520_v7  ;;  %v2009_v20 = vmax.f32 %v1753_v8, 0.0  ;;  %v983_v21 = vmax.f32 %v727_v9, 0.0  ;;  %v1754_v22 = vadd.f32 %v3925_v11, %v1497_v10 }
  0xf9   : > { %3288 = vst [vmem:[%s3972_s29 + $0x1d8] sm:$0xff] %v3032_v14  ;;  %v2521_v23 = vadd.f32 %v2265_v16, %v1238_v59  ;;  %v728_v24 = vadd.f32 %v3913_v2, %v471_v18  ;;  %v1498_v25 = vmul.f32 %v3919_v6, %v214_v62  ;;  %v472_v26 = vmul.f32 %v3911_v1, %v215_v13  ;;  %v219_v62 = vld [vmem:[%s3904_s14 + $0x228] sm:$0xff]  ;;  %v220_v18 = vld [vmem:[%s3904_s14 + $0x230] sm:$0xff] }
  0xfa   : > { %v3033_v28 = vmax.f32 %v2777_v19, 0.0  ;;  %v2266_v29 = vmul.f32 %v3927_v12, %v2009_v20  ;;  %v1240_v30 = vmul.f32 %v3917_v5, %v983_v21  ;;  %v2010_v31 = vmax.f32 %v1754_v22, 0.0 }
  0xfb   : > { %v2778_v32 = vadd.f32 %v3931_v15, %v2521_v23  ;;  %v984_v33 = vmax.f32 %v728_v24, 0.0  ;;  %v1755_v34 = vadd.f32 %v3925_v11, %v1498_v25  ;;  %v729_v35 = vadd.f32 %v3913_v2, %v472_v26 }
  0xfc   : > { %3289 = vst [vmem:[%s3972_s29 + $0x1e0] sm:$0xff] %v3033_v28  ;;  %v2522_v36 = vadd.f32 %v2266_v29, %v1239_v17  ;;  %v2267_v37 = vmul.f32 %v3927_v12, %v2010_v31  ;;  %v1499_v38 = vmul.f32 %v3919_v6, %v215_v13  ;;  %v473_v39 = vmul.f32 %v3911_v1, %v216_v27  ;;  %v221_v31 = vld [vmem:[%s3904_s14 + $0x238] sm:$0xff] }
  0xfd   : > { %v3034_v41 = vmax.f32 %v2778_v32, 0.0  ;;  %v1241_v42 = vmul.f32 %v3917_v5, %v984_v33  ;;  %v2011_v43 = vmax.f32 %v1755_v34, 0.0  ;;  %v985_v44 = vmax.f32 %v729_v35, 0.0 }
  0xfe   : > { %v2779_v45 = vadd.f32 %v3931_v15, %v2522_v36  ;;  %v2523_v46 = vadd.f32 %v2267_v37, %v1240_v30  ;;  %v1756_v47 = vadd.f32 %v3925_v11, %v1499_v38  ;;  %v730_v48 = vadd.f32 %v3913_v2, %v473_v39 }
  0xff   : > { %3290 = vst [vmem:[%s3972_s29 + $0x1e8] sm:$0xff] %v3034_v41  ;;  %v2268_v49 = vmul.f32 %v3927_v12, %v2011_v43  ;;  %v1242_v50 = vmul.f32 %v3917_v5, %v985_v44  ;;  %v1500_v51 = vmul.f32 %v3919_v6, %v216_v27  ;;  %v474_v52 = vmul.f32 %v3911_v1, %v217_v40  ;;  %v222_v44 = vld [vmem:[%s3904_s14 + $0x240] sm:$0xff] }
 0x100   : > { %v3035_v54 = vmax.f32 %v2779_v45, 0.0  ;;  %v2780_v55 = vadd.f32 %v3931_v15, %v2523_v46  ;;  %v2012_v56 = vmax.f32 %v1756_v47, 0.0  ;;  %v986_v57 = vmax.f32 %v730_v48, 0.0 }
 0x101   : > { %v2524_v58 = vadd.f32 %v2268_v49, %v1241_v42  ;;  %v1757_v59 = vadd.f32 %v3925_v11, %v1500_v51  ;;  %v731_v60 = vadd.f32 %v3913_v2, %v474_v52  ;;  %v1501_v61 = vmul.f32 %v3919_v6, %v217_v40 }
 0x102   : > { %3291 = vst [vmem:[%s3972_s29 + $0x1f0] sm:$0xff] %v3035_v54  ;;  %v3036_v63 = vmax.f32 %v2780_v55, 0.0  ;;  %v2269_v0 = vmul.f32 %v3927_v12, %v2012_v56  ;;  %v1243_v3 = vmul.f32 %v3917_v5, %v986_v57  ;;  %v475_v4 = vmul.f32 %v3911_v1, %v218_v53 }
 0x103   : > { %v2781_v7 = vadd.f32 %v3931_v15, %v2524_v58  ;;  %v2013_v8 = vmax.f32 %v1757_v59, 0.0  ;;  %v987_v9 = vmax.f32 %v731_v60, 0.0  ;;  %v1758_v10 = vadd.f32 %v3925_v11, %v1501_v61 }
 0x104   : > { %3292 = vst [vmem:[%s3972_s29 + $0x1f8] sm:$0xff] %v3036_v63  ;;  %v2525_v13 = vadd.f32 %v2269_v0, %v1242_v50  ;;  %v732_v14 = vadd.f32 %v3913_v2, %v475_v4  ;;  %v1502_v16 = vmul.f32 %v3919_v6, %v218_v53  ;;  %v476_v17 = vmul.f32 %v3911_v1, %v219_v62  ;;  %v223_v53 = vld [vmem:[%s3904_s14 + $0x248] sm:$0xff]  ;;  %v224_v4 = vld [vmem:[%s3904_s14 + $0x250] sm:$0xff] }
 0x105   : > { %v3037_v19 = vmax.f32 %v2781_v7, 0.0  ;;  %v2270_v20 = vmul.f32 %v3927_v12, %v2013_v8  ;;  %v1244_v21 = vmul.f32 %v3917_v5, %v987_v9  ;;  %v2014_v22 = vmax.f32 %v1758_v10, 0.0 }
 0x106   : > { %v2782_v23 = vadd.f32 %v3931_v15, %v2525_v13  ;;  %v988_v24 = vmax.f32 %v732_v14, 0.0  ;;  %v1759_v25 = vadd.f32 %v3925_v11, %v1502_v16  ;;  %v733_v26 = vadd.f32 %v3913_v2, %v476_v17 }
 0x107   : > { %3293 = vst [vmem:[%s3972_s29 + $0x200] sm:$0xff] %v3037_v19  ;;  %v2526_v27 = vadd.f32 %v2270_v20, %v1243_v3  ;;  %v2271_v28 = vmul.f32 %v3927_v12, %v2014_v22  ;;  %v1503_v29 = vmul.f32 %v3919_v6, %v219_v62  ;;  %v477_v30 = vmul.f32 %v3911_v1, %v220_v18  ;;  %v225_v22 = vld [vmem:[%s3904_s14 + $0x258] sm:$0xff] }
 0x108   : > { %v3038_v32 = vmax.f32 %v2782_v23, 0.0  ;;  %v1245_v33 = vmul.f32 %v3917_v5, %v988_v24  ;;  %v2015_v34 = vmax.f32 %v1759_v25, 0.0  ;;  %v989_v35 = vmax.f32 %v733_v26, 0.0 }
 0x109   : > { %v2783_v36 = vadd.f32 %v3931_v15, %v2526_v27  ;;  %v2527_v37 = vadd.f32 %v2271_v28, %v1244_v21  ;;  %v1760_v38 = vadd.f32 %v3925_v11, %v1503_v29  ;;  %v734_v39 = vadd.f32 %v3913_v2, %v477_v30 }
 0x10a   : > { %3294 = vst [vmem:[%s3972_s29 + $0x208] sm:$0xff] %v3038_v32  ;;  %v2272_v40 = vmul.f32 %v3927_v12, %v2015_v34  ;;  %v1246_v41 = vmul.f32 %v3917_v5, %v989_v35  ;;  %v1504_v42 = vmul.f32 %v3919_v6, %v220_v18  ;;  %v478_v43 = vmul.f32 %v3911_v1, %v221_v31  ;;  %v226_v35 = vld [vmem:[%s3904_s14 + $0x260] sm:$0xff] }
 0x10b   : > { %v3039_v45 = vmax.f32 %v2783_v36, 0.0  ;;  %v2784_v46 = vadd.f32 %v3931_v15, %v2527_v37  ;;  %v2016_v47 = vmax.f32 %v1760_v38, 0.0  ;;  %v990_v48 = vmax.f32 %v734_v39, 0.0 }
 0x10c   : > { %v2528_v49 = vadd.f32 %v2272_v40, %v1245_v33  ;;  %v1761_v50 = vadd.f32 %v3925_v11, %v1504_v42  ;;  %v735_v51 = vadd.f32 %v3913_v2, %v478_v43  ;;  %v1505_v52 = vmul.f32 %v3919_v6, %v221_v31 }
 0x10d   : > { %3295 = vst [vmem:[%s3972_s29 + $0x210] sm:$0xff] %v3039_v45  ;;  %v3040_v54 = vmax.f32 %v2784_v46, 0.0  ;;  %v2273_v55 = vmul.f32 %v3927_v12, %v2016_v47  ;;  %v1247_v56 = vmul.f32 %v3917_v5, %v990_v48  ;;  %v479_v57 = vmul.f32 %v3911_v1, %v222_v44 }
 0x10e   : > { %v2785_v58 = vadd.f32 %v3931_v15, %v2528_v49  ;;  %v2017_v59 = vmax.f32 %v1761_v50, 0.0  ;;  %v991_v60 = vmax.f32 %v735_v51, 0.0  ;;  %v1762_v61 = vadd.f32 %v3925_v11, %v1505_v52 }
 0x10f   : > { %3296 = vst [vmem:[%s3972_s29 + $0x218] sm:$0xff] %v3040_v54  ;;  %v2529_v62 = vadd.f32 %v2273_v55, %v1246_v41  ;;  %v736_v63 = vadd.f32 %v3913_v2, %v479_v57  ;;  %v1506_v0 = vmul.f32 %v3919_v6, %v222_v44  ;;  %v480_v3 = vmul.f32 %v3911_v1, %v223_v53  ;;  %v227_v44 = vld [vmem:[%s3904_s14 + $0x268] sm:$0xff]  ;;  %v228_v57 = vld [vmem:[%s3904_s14 + $0x270] sm:$0xff] }
 0x110   : > { %v3041_v7 = vmax.f32 %v2785_v58, 0.0  ;;  %v2274_v8 = vmul.f32 %v3927_v12, %v2017_v59  ;;  %v1248_v9 = vmul.f32 %v3917_v5, %v991_v60  ;;  %v2018_v10 = vmax.f32 %v1762_v61, 0.0 }
 0x111   : > { %v2786_v13 = vadd.f32 %v3931_v15, %v2529_v62  ;;  %v992_v14 = vmax.f32 %v736_v63, 0.0  ;;  %v1763_v16 = vadd.f32 %v3925_v11, %v1506_v0  ;;  %v737_v17 = vadd.f32 %v3913_v2, %v480_v3 }
 0x112   : > { %3297 = vst [vmem:[%s3972_s29 + $0x220] sm:$0xff] %v3041_v7  ;;  %v2530_v18 = vadd.f32 %v2274_v8, %v1247_v56  ;;  %v2275_v19 = vmul.f32 %v3927_v12, %v2018_v10  ;;  %v1507_v20 = vmul.f32 %v3919_v6, %v223_v53  ;;  %v481_v21 = vmul.f32 %v3911_v1, %v224_v4  ;;  %v229_v10 = vld [vmem:[%s3904_s14 + $0x278] sm:$0xff] }
 0x113   : > { %v3042_v23 = vmax.f32 %v2786_v13, 0.0  ;;  %v1249_v24 = vmul.f32 %v3917_v5, %v992_v14  ;;  %v2019_v25 = vmax.f32 %v1763_v16, 0.0  ;;  %v993_v26 = vmax.f32 %v737_v17, 0.0 }
 0x114   : > { %v2787_v27 = vadd.f32 %v3931_v15, %v2530_v18  ;;  %v2531_v28 = vadd.f32 %v2275_v19, %v1248_v9  ;;  %v1764_v29 = vadd.f32 %v3925_v11, %v1507_v20  ;;  %v738_v30 = vadd.f32 %v3913_v2, %v481_v21 }
 0x115   : > { %3298 = vst [vmem:[%s3972_s29 + $0x228] sm:$0xff] %v3042_v23  ;;  %v2276_v31 = vmul.f32 %v3927_v12, %v2019_v25  ;;  %v1250_v32 = vmul.f32 %v3917_v5, %v993_v26  ;;  %v1508_v33 = vmul.f32 %v3919_v6, %v224_v4  ;;  %v482_v34 = vmul.f32 %v3911_v1, %v225_v22  ;;  %v230_v26 = vld [vmem:[%s3904_s14 + $0x280] sm:$0xff] }
 0x116   : > { %v3043_v36 = vmax.f32 %v2787_v27, 0.0  ;;  %v2788_v37 = vadd.f32 %v3931_v15, %v2531_v28  ;;  %v2020_v38 = vmax.f32 %v1764_v29, 0.0  ;;  %v994_v39 = vmax.f32 %v738_v30, 0.0 }
 0x117   : > { %v2532_v40 = vadd.f32 %v2276_v31, %v1249_v24  ;;  %v1765_v41 = vadd.f32 %v3925_v11, %v1508_v33  ;;  %v739_v42 = vadd.f32 %v3913_v2, %v482_v34  ;;  %v1509_v43 = vmul.f32 %v3919_v6, %v225_v22 }
 0x118   : > { %3299 = vst [vmem:[%s3972_s29 + $0x230] sm:$0xff] %v3043_v36  ;;  %v3044_v45 = vmax.f32 %v2788_v37, 0.0  ;;  %v2277_v46 = vmul.f32 %v3927_v12, %v2020_v38  ;;  %v1251_v47 = vmul.f32 %v3917_v5, %v994_v39  ;;  %v483_v48 = vmul.f32 %v3911_v1, %v226_v35 }
 0x119   : > { %v2789_v49 = vadd.f32 %v3931_v15, %v2532_v40  ;;  %v2021_v50 = vmax.f32 %v1765_v41, 0.0  ;;  %v995_v51 = vmax.f32 %v739_v42, 0.0  ;;  %v1766_v52 = vadd.f32 %v3925_v11, %v1509_v43 }
 0x11a   : > { %3300 = vst [vmem:[%s3972_s29 + $0x238] sm:$0xff] %v3044_v45  ;;  %v2533_v53 = vadd.f32 %v2277_v46, %v1250_v32  ;;  %v740_v54 = vadd.f32 %v3913_v2, %v483_v48  ;;  %v1510_v55 = vmul.f32 %v3919_v6, %v226_v35  ;;  %v484_v56 = vmul.f32 %v3911_v1, %v227_v44  ;;  %v231_v35 = vld [vmem:[%s3904_s14 + $0x288] sm:$0xff]  ;;  %v232_v48 = vld [vmem:[%s3904_s14 + $0x290] sm:$0xff] }
 0x11b   : > { %v3045_v58 = vmax.f32 %v2789_v49, 0.0  ;;  %v2278_v59 = vmul.f32 %v3927_v12, %v2021_v50  ;;  %v1252_v60 = vmul.f32 %v3917_v5, %v995_v51  ;;  %v2022_v61 = vmax.f32 %v1766_v52, 0.0 }
 0x11c   : > { %v2790_v62 = vadd.f32 %v3931_v15, %v2533_v53  ;;  %v996_v63 = vmax.f32 %v740_v54, 0.0  ;;  %v1767_v0 = vadd.f32 %v3925_v11, %v1510_v55  ;;  %v741_v3 = vadd.f32 %v3913_v2, %v484_v56 }
 0x11d   : > { %3301 = vst [vmem:[%s3972_s29 + $0x240] sm:$0xff] %v3045_v58  ;;  %v2534_v4 = vadd.f32 %v2278_v59, %v1251_v47  ;;  %v2279_v7 = vmul.f32 %v3927_v12, %v2022_v61  ;;  %v1511_v8 = vmul.f32 %v3919_v6, %v227_v44  ;;  %v485_v9 = vmul.f32 %v3911_v1, %v228_v57  ;;  %v233_v61 = vld [vmem:[%s3904_s14 + $0x298] sm:$0xff] }
 0x11e   : > { %v3046_v13 = vmax.f32 %v2790_v62, 0.0  ;;  %v1253_v14 = vmul.f32 %v3917_v5, %v996_v63  ;;  %v2023_v16 = vmax.f32 %v1767_v0, 0.0  ;;  %v997_v17 = vmax.f32 %v741_v3, 0.0 }
 0x11f   : > { %v2791_v18 = vadd.f32 %v3931_v15, %v2534_v4  ;;  %v2535_v19 = vadd.f32 %v2279_v7, %v1252_v60  ;;  %v1768_v20 = vadd.f32 %v3925_v11, %v1511_v8  ;;  %v742_v21 = vadd.f32 %v3913_v2, %v485_v9 }
 0x120   : > { %3302 = vst [vmem:[%s3972_s29 + $0x248] sm:$0xff] %v3046_v13  ;;  %v2280_v22 = vmul.f32 %v3927_v12, %v2023_v16  ;;  %v1254_v23 = vmul.f32 %v3917_v5, %v997_v17  ;;  %v1512_v24 = vmul.f32 %v3919_v6, %v228_v57  ;;  %v486_v25 = vmul.f32 %v3911_v1, %v229_v10  ;;  %v234_v17 = vld [vmem:[%s3904_s14 + $0x2a0] sm:$0xff] }
 0x121   : > { %v3047_v27 = vmax.f32 %v2791_v18, 0.0  ;;  %v2792_v28 = vadd.f32 %v3931_v15, %v2535_v19  ;;  %v2024_v29 = vmax.f32 %v1768_v20, 0.0  ;;  %v998_v30 = vmax.f32 %v742_v21, 0.0 }
 0x122   : > { %v2536_v31 = vadd.f32 %v2280_v22, %v1253_v14  ;;  %v1769_v32 = vadd.f32 %v3925_v11, %v1512_v24  ;;  %v743_v33 = vadd.f32 %v3913_v2, %v486_v25  ;;  %v1513_v34 = vmul.f32 %v3919_v6, %v229_v10 }
 0x123   : > { %3303 = vst [vmem:[%s3972_s29 + $0x250] sm:$0xff] %v3047_v27  ;;  %v3048_v36 = vmax.f32 %v2792_v28, 0.0  ;;  %v2281_v37 = vmul.f32 %v3927_v12, %v2024_v29  ;;  %v1255_v38 = vmul.f32 %v3917_v5, %v998_v30  ;;  %v487_v39 = vmul.f32 %v3911_v1, %v230_v26 }
 0x124   : > { %v2793_v40 = vadd.f32 %v3931_v15, %v2536_v31  ;;  %v2025_v41 = vmax.f32 %v1769_v32, 0.0  ;;  %v999_v42 = vmax.f32 %v743_v33, 0.0  ;;  %v1770_v43 = vadd.f32 %v3925_v11, %v1513_v34 }
 0x125   : > { %3304 = vst [vmem:[%s3972_s29 + $0x258] sm:$0xff] %v3048_v36  ;;  %v2537_v44 = vadd.f32 %v2281_v37, %v1254_v23  ;;  %v744_v45 = vadd.f32 %v3913_v2, %v487_v39  ;;  %v1514_v46 = vmul.f32 %v3919_v6, %v230_v26  ;;  %v488_v47 = vmul.f32 %v3911_v1, %v231_v35  ;;  %v235_v26 = vld [vmem:[%s3904_s14 + $0x2a8] sm:$0xff]  ;;  %v236_v39 = vld [vmem:[%s3904_s14 + $0x2b0] sm:$0xff] }
 0x126   : > { %v3049_v49 = vmax.f32 %v2793_v40, 0.0  ;;  %v2282_v50 = vmul.f32 %v3927_v12, %v2025_v41  ;;  %v1256_v51 = vmul.f32 %v3917_v5, %v999_v42  ;;  %v2026_v52 = vmax.f32 %v1770_v43, 0.0 }
 0x127   : > { %v2794_v53 = vadd.f32 %v3931_v15, %v2537_v44  ;;  %v1000_v54 = vmax.f32 %v744_v45, 0.0  ;;  %v1771_v55 = vadd.f32 %v3925_v11, %v1514_v46  ;;  %v745_v56 = vadd.f32 %v3913_v2, %v488_v47 }
 0x128   : > { %3305 = vst [vmem:[%s3972_s29 + $0x260] sm:$0xff] %v3049_v49  ;;  %v2538_v57 = vadd.f32 %v2282_v50, %v1255_v38  ;;  %v2283_v58 = vmul.f32 %v3927_v12, %v2026_v52  ;;  %v1515_v59 = vmul.f32 %v3919_v6, %v231_v35  ;;  %v489_v60 = vmul.f32 %v3911_v1, %v232_v48  ;;  %v237_v52 = vld [vmem:[%s3904_s14 + $0x2b8] sm:$0xff] }
 0x129   : > { %v3050_v62 = vmax.f32 %v2794_v53, 0.0  ;;  %v1257_v63 = vmul.f32 %v3917_v5, %v1000_v54  ;;  %v2027_v0 = vmax.f32 %v1771_v55, 0.0  ;;  %v1001_v3 = vmax.f32 %v745_v56, 0.0 }
 0x12a   : > { %v2795_v4 = vadd.f32 %v3931_v15, %v2538_v57  ;;  %v2539_v7 = vadd.f32 %v2283_v58, %v1256_v51  ;;  %v1772_v8 = vadd.f32 %v3925_v11, %v1515_v59  ;;  %v746_v9 = vadd.f32 %v3913_v2, %v489_v60 }
 0x12b   : > { %3306 = vst [vmem:[%s3972_s29 + $0x268] sm:$0xff] %v3050_v62  ;;  %v2284_v10 = vmul.f32 %v3927_v12, %v2027_v0  ;;  %v1258_v13 = vmul.f32 %v3917_v5, %v1001_v3  ;;  %v1516_v14 = vmul.f32 %v3919_v6, %v232_v48  ;;  %v490_v16 = vmul.f32 %v3911_v1, %v233_v61  ;;  %v238_v3 = vld [vmem:[%s3904_s14 + $0x2c0] sm:$0xff] }
 0x12c   : > { %v3051_v18 = vmax.f32 %v2795_v4, 0.0  ;;  %v2796_v19 = vadd.f32 %v3931_v15, %v2539_v7  ;;  %v2028_v20 = vmax.f32 %v1772_v8, 0.0  ;;  %v1002_v21 = vmax.f32 %v746_v9, 0.0 }
 0x12d   : > { %v2540_v22 = vadd.f32 %v2284_v10, %v1257_v63  ;;  %v1773_v23 = vadd.f32 %v3925_v11, %v1516_v14  ;;  %v747_v24 = vadd.f32 %v3913_v2, %v490_v16  ;;  %v1517_v25 = vmul.f32 %v3919_v6, %v233_v61 }
 0x12e   : > { %3307 = vst [vmem:[%s3972_s29 + $0x270] sm:$0xff] %v3051_v18  ;;  %v3052_v27 = vmax.f32 %v2796_v19, 0.0  ;;  %v2285_v28 = vmul.f32 %v3927_v12, %v2028_v20  ;;  %v1259_v29 = vmul.f32 %v3917_v5, %v1002_v21  ;;  %v491_v30 = vmul.f32 %v3911_v1, %v234_v17 }
 0x12f   : > { %v2797_v31 = vadd.f32 %v3931_v15, %v2540_v22  ;;  %v2029_v32 = vmax.f32 %v1773_v23, 0.0  ;;  %v1003_v33 = vmax.f32 %v747_v24, 0.0  ;;  %v1774_v34 = vadd.f32 %v3925_v11, %v1517_v25 }
 0x130   : > { %3308 = vst [vmem:[%s3972_s29 + $0x278] sm:$0xff] %v3052_v27  ;;  %v2541_v35 = vadd.f32 %v2285_v28, %v1258_v13  ;;  %v748_v36 = vadd.f32 %v3913_v2, %v491_v30  ;;  %v1518_v37 = vmul.f32 %v3919_v6, %v234_v17  ;;  %v492_v38 = vmul.f32 %v3911_v1, %v235_v26  ;;  %v239_v17 = vld [vmem:[%s3904_s14 + $0x2c8] sm:$0xff]  ;;  %v240_v30 = vld [vmem:[%s3904_s14 + $0x2d0] sm:$0xff] }
 0x131   : > { %v3053_v40 = vmax.f32 %v2797_v31, 0.0  ;;  %v2286_v41 = vmul.f32 %v3927_v12, %v2029_v32  ;;  %v1260_v42 = vmul.f32 %v3917_v5, %v1003_v33  ;;  %v2030_v43 = vmax.f32 %v1774_v34, 0.0 }
 0x132   : > { %v2798_v44 = vadd.f32 %v3931_v15, %v2541_v35  ;;  %v1004_v45 = vmax.f32 %v748_v36, 0.0  ;;  %v1775_v46 = vadd.f32 %v3925_v11, %v1518_v37  ;;  %v749_v47 = vadd.f32 %v3913_v2, %v492_v38 }
 0x133   : > { %3309 = vst [vmem:[%s3972_s29 + $0x280] sm:$0xff] %v3053_v40  ;;  %v2542_v48 = vadd.f32 %v2286_v41, %v1259_v29  ;;  %v2287_v49 = vmul.f32 %v3927_v12, %v2030_v43  ;;  %v1519_v50 = vmul.f32 %v3919_v6, %v235_v26  ;;  %v493_v51 = vmul.f32 %v3911_v1, %v236_v39  ;;  %v241_v43 = vld [vmem:[%s3904_s14 + $0x2d8] sm:$0xff] }
 0x134   : > { %v3054_v53 = vmax.f32 %v2798_v44, 0.0  ;;  %v1261_v54 = vmul.f32 %v3917_v5, %v1004_v45  ;;  %v2031_v55 = vmax.f32 %v1775_v46, 0.0  ;;  %v1005_v56 = vmax.f32 %v749_v47, 0.0 }
 0x135   : > { %v2799_v57 = vadd.f32 %v3931_v15, %v2542_v48  ;;  %v2543_v58 = vadd.f32 %v2287_v49, %v1260_v42  ;;  %v1776_v59 = vadd.f32 %v3925_v11, %v1519_v50  ;;  %v750_v60 = vadd.f32 %v3913_v2, %v493_v51 }
 0x136   : > { %3310 = vst [vmem:[%s3972_s29 + $0x288] sm:$0xff] %v3054_v53  ;;  %v2288_v61 = vmul.f32 %v3927_v12, %v2031_v55  ;;  %v1262_v62 = vmul.f32 %v3917_v5, %v1005_v56  ;;  %v1520_v63 = vmul.f32 %v3919_v6, %v236_v39  ;;  %v494_v0 = vmul.f32 %v3911_v1, %v237_v52  ;;  %v242_v56 = vld [vmem:[%s3904_s14 + $0x2e0] sm:$0xff] }
 0x137   : > { %v3055_v4 = vmax.f32 %v2799_v57, 0.0  ;;  %v2800_v7 = vadd.f32 %v3931_v15, %v2543_v58  ;;  %v2032_v8 = vmax.f32 %v1776_v59, 0.0  ;;  %v1006_v9 = vmax.f32 %v750_v60, 0.0 }
 0x138   : > { %v2544_v10 = vadd.f32 %v2288_v61, %v1261_v54  ;;  %v1777_v13 = vadd.f32 %v3925_v11, %v1520_v63  ;;  %v751_v14 = vadd.f32 %v3913_v2, %v494_v0  ;;  %v1521_v16 = vmul.f32 %v3919_v6, %v237_v52 }
 0x139   : > { %3311 = vst [vmem:[%s3972_s29 + $0x290] sm:$0xff] %v3055_v4  ;;  %v3056_v18 = vmax.f32 %v2800_v7, 0.0  ;;  %v2289_v19 = vmul.f32 %v3927_v12, %v2032_v8  ;;  %v1263_v20 = vmul.f32 %v3917_v5, %v1006_v9  ;;  %v495_v21 = vmul.f32 %v3911_v1, %v238_v3 }
 0x13a   : > { %v2801_v22 = vadd.f32 %v3931_v15, %v2544_v10  ;;  %v2033_v23 = vmax.f32 %v1777_v13, 0.0  ;;  %v1007_v24 = vmax.f32 %v751_v14, 0.0  ;;  %v1778_v25 = vadd.f32 %v3925_v11, %v1521_v16 }
 0x13b   : > { %3312 = vst [vmem:[%s3972_s29 + $0x298] sm:$0xff] %v3056_v18  ;;  %v2545_v26 = vadd.f32 %v2289_v19, %v1262_v62  ;;  %v752_v27 = vadd.f32 %v3913_v2, %v495_v21  ;;  %v1522_v28 = vmul.f32 %v3919_v6, %v238_v3  ;;  %v496_v29 = vmul.f32 %v3911_v1, %v239_v17  ;;  %v243_v3 = vld [vmem:[%s3904_s14 + $0x2e8] sm:$0xff]  ;;  %v244_v21 = vld [vmem:[%s3904_s14 + $0x2f0] sm:$0xff] }
 0x13c   : > { %v3057_v31 = vmax.f32 %v2801_v22, 0.0  ;;  %v2290_v32 = vmul.f32 %v3927_v12, %v2033_v23  ;;  %v1264_v33 = vmul.f32 %v3917_v5, %v1007_v24  ;;  %v2034_v34 = vmax.f32 %v1778_v25, 0.0 }
 0x13d   : > { %v2802_v35 = vadd.f32 %v3931_v15, %v2545_v26  ;;  %v1008_v36 = vmax.f32 %v752_v27, 0.0  ;;  %v1779_v37 = vadd.f32 %v3925_v11, %v1522_v28  ;;  %v753_v38 = vadd.f32 %v3913_v2, %v496_v29 }
 0x13e   : > { %3313 = vst [vmem:[%s3972_s29 + $0x2a0] sm:$0xff] %v3057_v31  ;;  %v2546_v39 = vadd.f32 %v2290_v32, %v1263_v20  ;;  %v2291_v40 = vmul.f32 %v3927_v12, %v2034_v34  ;;  %v1523_v41 = vmul.f32 %v3919_v6, %v239_v17  ;;  %v497_v42 = vmul.f32 %v3911_v1, %v240_v30  ;;  %v245_v34 = vld [vmem:[%s3904_s14 + $0x2f8] sm:$0xff] }
 0x13f   : > { %v3058_v44 = vmax.f32 %v2802_v35, 0.0  ;;  %v1265_v45 = vmul.f32 %v3917_v5, %v1008_v36  ;;  %v2035_v46 = vmax.f32 %v1779_v37, 0.0  ;;  %v1009_v47 = vmax.f32 %v753_v38, 0.0 }
 0x140   : > { %v2803_v48 = vadd.f32 %v3931_v15, %v2546_v39  ;;  %v2547_v49 = vadd.f32 %v2291_v40, %v1264_v33  ;;  %v1780_v50 = vadd.f32 %v3925_v11, %v1523_v41  ;;  %v754_v51 = vadd.f32 %v3913_v2, %v497_v42 }
 0x141   : > { %3314 = vst [vmem:[%s3972_s29 + $0x2a8] sm:$0xff] %v3058_v44  ;;  %v2292_v52 = vmul.f32 %v3927_v12, %v2035_v46  ;;  %v1266_v53 = vmul.f32 %v3917_v5, %v1009_v47  ;;  %v1524_v54 = vmul.f32 %v3919_v6, %v240_v30  ;;  %v498_v55 = vmul.f32 %v3911_v1, %v241_v43  ;;  %v246_v47 = vld [vmem:[%s3904_s14 + $0x300] sm:$0xff] }
 0x142   : > { %v3059_v57 = vmax.f32 %v2803_v48, 0.0  ;;  %v2804_v58 = vadd.f32 %v3931_v15, %v2547_v49  ;;  %v2036_v59 = vmax.f32 %v1780_v50, 0.0  ;;  %v1010_v60 = vmax.f32 %v754_v51, 0.0 }
 0x143   : > { %v2548_v61 = vadd.f32 %v2292_v52, %v1265_v45  ;;  %v1781_v62 = vadd.f32 %v3925_v11, %v1524_v54  ;;  %v755_v63 = vadd.f32 %v3913_v2, %v498_v55  ;;  %v1525_v0 = vmul.f32 %v3919_v6, %v241_v43 }
 0x144   : > { %3315 = vst [vmem:[%s3972_s29 + $0x2b0] sm:$0xff] %v3059_v57  ;;  %v3060_v4 = vmax.f32 %v2804_v58, 0.0  ;;  %v2293_v7 = vmul.f32 %v3927_v12, %v2036_v59  ;;  %v1267_v8 = vmul.f32 %v3917_v5, %v1010_v60  ;;  %v499_v9 = vmul.f32 %v3911_v1, %v242_v56 }
 0x145   : > { %v2805_v10 = vadd.f32 %v3931_v15, %v2548_v61  ;;  %v2037_v13 = vmax.f32 %v1781_v62, 0.0  ;;  %v1011_v14 = vmax.f32 %v755_v63, 0.0  ;;  %v1782_v16 = vadd.f32 %v3925_v11, %v1525_v0 }
 0x146   : > { %3316 = vst [vmem:[%s3972_s29 + $0x2b8] sm:$0xff] %v3060_v4  ;;  %v2549_v17 = vadd.f32 %v2293_v7, %v1266_v53  ;;  %v756_v18 = vadd.f32 %v3913_v2, %v499_v9  ;;  %v1526_v19 = vmul.f32 %v3919_v6, %v242_v56  ;;  %v500_v20 = vmul.f32 %v3911_v1, %v243_v3  ;;  %v247_v56 = vld [vmem:[%s3904_s14 + $0x308] sm:$0xff]  ;;  %v248_v9 = vld [vmem:[%s3904_s14 + $0x310] sm:$0xff] }
 0x147   : > { %v3061_v22 = vmax.f32 %v2805_v10, 0.0  ;;  %v2294_v23 = vmul.f32 %v3927_v12, %v2037_v13  ;;  %v1268_v24 = vmul.f32 %v3917_v5, %v1011_v14  ;;  %v2038_v25 = vmax.f32 %v1782_v16, 0.0 }
 0x148   : > { %v2806_v26 = vadd.f32 %v3931_v15, %v2549_v17  ;;  %v1012_v27 = vmax.f32 %v756_v18, 0.0  ;;  %v1783_v28 = vadd.f32 %v3925_v11, %v1526_v19  ;;  %v757_v29 = vadd.f32 %v3913_v2, %v500_v20 }
 0x149   : > { %3317 = vst [vmem:[%s3972_s29 + $0x2c0] sm:$0xff] %v3061_v22  ;;  %v2550_v30 = vadd.f32 %v2294_v23, %v1267_v8  ;;  %v2295_v31 = vmul.f32 %v3927_v12, %v2038_v25  ;;  %v1527_v32 = vmul.f32 %v3919_v6, %v243_v3  ;;  %v501_v33 = vmul.f32 %v3911_v1, %v244_v21  ;;  %v249_v25 = vld [vmem:[%s3904_s14 + $0x318] sm:$0xff] }
 0x14a   : > { %v3062_v35 = vmax.f32 %v2806_v26, 0.0  ;;  %v1269_v36 = vmul.f32 %v3917_v5, %v1012_v27  ;;  %v2039_v37 = vmax.f32 %v1783_v28, 0.0  ;;  %v1013_v38 = vmax.f32 %v757_v29, 0.0 }
 0x14b   : > { %v2807_v39 = vadd.f32 %v3931_v15, %v2550_v30  ;;  %v2551_v40 = vadd.f32 %v2295_v31, %v1268_v24  ;;  %v1784_v41 = vadd.f32 %v3925_v11, %v1527_v32  ;;  %v758_v42 = vadd.f32 %v3913_v2, %v501_v33 }
 0x14c   : > { %3318 = vst [vmem:[%s3972_s29 + $0x2c8] sm:$0xff] %v3062_v35  ;;  %v2296_v43 = vmul.f32 %v3927_v12, %v2039_v37  ;;  %v1270_v44 = vmul.f32 %v3917_v5, %v1013_v38  ;;  %v1528_v45 = vmul.f32 %v3919_v6, %v244_v21  ;;  %v502_v46 = vmul.f32 %v3911_v1, %v245_v34  ;;  %v250_v38 = vld [vmem:[%s3904_s14 + $0x320] sm:$0xff] }
 0x14d   : > { %v3063_v48 = vmax.f32 %v2807_v39, 0.0  ;;  %v2808_v49 = vadd.f32 %v3931_v15, %v2551_v40  ;;  %v2040_v50 = vmax.f32 %v1784_v41, 0.0  ;;  %v1014_v51 = vmax.f32 %v758_v42, 0.0 }
 0x14e   : > { %v2552_v52 = vadd.f32 %v2296_v43, %v1269_v36  ;;  %v1785_v53 = vadd.f32 %v3925_v11, %v1528_v45  ;;  %v759_v54 = vadd.f32 %v3913_v2, %v502_v46  ;;  %v1529_v55 = vmul.f32 %v3919_v6, %v245_v34 }
 0x14f   : > { %3319 = vst [vmem:[%s3972_s29 + $0x2d0] sm:$0xff] %v3063_v48  ;;  %v3064_v57 = vmax.f32 %v2808_v49, 0.0  ;;  %v2297_v58 = vmul.f32 %v3927_v12, %v2040_v50  ;;  %v1271_v59 = vmul.f32 %v3917_v5, %v1014_v51  ;;  %v503_v60 = vmul.f32 %v3911_v1, %v246_v47 }
 0x150   : > { %v2809_v61 = vadd.f32 %v3931_v15, %v2552_v52  ;;  %v2041_v62 = vmax.f32 %v1785_v53, 0.0  ;;  %v1015_v63 = vmax.f32 %v759_v54, 0.0  ;;  %v1786_v0 = vadd.f32 %v3925_v11, %v1529_v55 }
 0x151   : > { %3320 = vst [vmem:[%s3972_s29 + $0x2d8] sm:$0xff] %v3064_v57  ;;  %v2553_v3 = vadd.f32 %v2297_v58, %v1270_v44  ;;  %v760_v4 = vadd.f32 %v3913_v2, %v503_v60  ;;  %v1530_v7 = vmul.f32 %v3919_v6, %v246_v47  ;;  %v504_v8 = vmul.f32 %v3911_v1, %v247_v56  ;;  %v251_v47 = vld [vmem:[%s3904_s14 + $0x328] sm:$0xff]  ;;  %v252_v60 = vld [vmem:[%s3904_s14 + $0x330] sm:$0xff] }
 0x152   : > { %v3065_v10 = vmax.f32 %v2809_v61, 0.0  ;;  %v2298_v13 = vmul.f32 %v3927_v12, %v2041_v62  ;;  %v1272_v14 = vmul.f32 %v3917_v5, %v1015_v63  ;;  %v2042_v16 = vmax.f32 %v1786_v0, 0.0 }
 0x153   : > { %v2810_v17 = vadd.f32 %v3931_v15, %v2553_v3  ;;  %v1016_v18 = vmax.f32 %v760_v4, 0.0  ;;  %v1787_v19 = vadd.f32 %v3925_v11, %v1530_v7  ;;  %v761_v20 = vadd.f32 %v3913_v2, %v504_v8 }
 0x154   : > { %3321 = vst [vmem:[%s3972_s29 + $0x2e0] sm:$0xff] %v3065_v10  ;;  %v2554_v21 = vadd.f32 %v2298_v13, %v1271_v59  ;;  %v2299_v22 = vmul.f32 %v3927_v12, %v2042_v16  ;;  %v1531_v23 = vmul.f32 %v3919_v6, %v247_v56  ;;  %v505_v24 = vmul.f32 %v3911_v1, %v248_v9  ;;  %v253_v16 = vld [vmem:[%s3904_s14 + $0x338] sm:$0xff] }
 0x155   : > { %v3066_v26 = vmax.f32 %v2810_v17, 0.0  ;;  %v1273_v27 = vmul.f32 %v3917_v5, %v1016_v18  ;;  %v2043_v28 = vmax.f32 %v1787_v19, 0.0  ;;  %v1017_v29 = vmax.f32 %v761_v20, 0.0 }
 0x156   : > { %v2811_v30 = vadd.f32 %v3931_v15, %v2554_v21  ;;  %v2555_v31 = vadd.f32 %v2299_v22, %v1272_v14  ;;  %v1788_v32 = vadd.f32 %v3925_v11, %v1531_v23  ;;  %v762_v33 = vadd.f32 %v3913_v2, %v505_v24 }
 0x157   : > { %3322 = vst [vmem:[%s3972_s29 + $0x2e8] sm:$0xff] %v3066_v26  ;;  %v2300_v34 = vmul.f32 %v3927_v12, %v2043_v28  ;;  %v1274_v35 = vmul.f32 %v3917_v5, %v1017_v29  ;;  %v1532_v36 = vmul.f32 %v3919_v6, %v248_v9  ;;  %v506_v37 = vmul.f32 %v3911_v1, %v249_v25  ;;  %v254_v29 = vld [vmem:[%s3904_s14 + $0x340] sm:$0xff] }
 0x158   : > { %v3067_v39 = vmax.f32 %v2811_v30, 0.0  ;;  %v2812_v40 = vadd.f32 %v3931_v15, %v2555_v31  ;;  %v2044_v41 = vmax.f32 %v1788_v32, 0.0  ;;  %v1018_v42 = vmax.f32 %v762_v33, 0.0 }
 0x159   : > { %v2556_v43 = vadd.f32 %v2300_v34, %v1273_v27  ;;  %v1789_v44 = vadd.f32 %v3925_v11, %v1532_v36  ;;  %v763_v45 = vadd.f32 %v3913_v2, %v506_v37  ;;  %v1533_v46 = vmul.f32 %v3919_v6, %v249_v25 }
 0x15a   : > { %3323 = vst [vmem:[%s3972_s29 + $0x2f0] sm:$0xff] %v3067_v39  ;;  %v3068_v48 = vmax.f32 %v2812_v40, 0.0  ;;  %v2301_v49 = vmul.f32 %v3927_v12, %v2044_v41  ;;  %v1275_v50 = vmul.f32 %v3917_v5, %v1018_v42  ;;  %v507_v51 = vmul.f32 %v3911_v1, %v250_v38 }
 0x15b   : > { %v2813_v52 = vadd.f32 %v3931_v15, %v2556_v43  ;;  %v2045_v53 = vmax.f32 %v1789_v44, 0.0  ;;  %v1019_v54 = vmax.f32 %v763_v45, 0.0  ;;  %v1790_v55 = vadd.f32 %v3925_v11, %v1533_v46 }
 0x15c   : > { %3324 = vst [vmem:[%s3972_s29 + $0x2f8] sm:$0xff] %v3068_v48  ;;  %v2557_v56 = vadd.f32 %v2301_v49, %v1274_v35  ;;  %v764_v57 = vadd.f32 %v3913_v2, %v507_v51  ;;  %v1534_v58 = vmul.f32 %v3919_v6, %v250_v38  ;;  %v508_v59 = vmul.f32 %v3911_v1, %v251_v47  ;;  %v255_v38 = vld [vmem:[%s3904_s14 + $0x348] sm:$0xff]  ;;  %v256_v51 = vld [vmem:[%s3904_s14 + $0x350] sm:$0xff] }
 0x15d   : > { %v3069_v61 = vmax.f32 %v2813_v52, 0.0  ;;  %v2302_v62 = vmul.f32 %v3927_v12, %v2045_v53  ;;  %v1276_v63 = vmul.f32 %v3917_v5, %v1019_v54  ;;  %v2046_v0 = vmax.f32 %v1790_v55, 0.0 }
 0x15e   : > { %v2814_v3 = vadd.f32 %v3931_v15, %v2557_v56  ;;  %v1020_v4 = vmax.f32 %v764_v57, 0.0  ;;  %v1791_v7 = vadd.f32 %v3925_v11, %v1534_v58  ;;  %v765_v8 = vadd.f32 %v3913_v2, %v508_v59 }
 0x15f   : > { %3325 = vst [vmem:[%s3972_s29 + $0x300] sm:$0xff] %v3069_v61  ;;  %v2558_v9 = vadd.f32 %v2302_v62, %v1275_v50  ;;  %v2303_v10 = vmul.f32 %v3927_v12, %v2046_v0  ;;  %v1535_v13 = vmul.f32 %v3919_v6, %v251_v47  ;;  %v509_v14 = vmul.f32 %v3911_v1, %v252_v60  ;;  %v257_v0 = vld [vmem:[%s3904_s14 + $0x358] sm:$0xff] }
 0x160   : > { %v3070_v17 = vmax.f32 %v2814_v3, 0.0  ;;  %v1277_v18 = vmul.f32 %v3917_v5, %v1020_v4  ;;  %v2047_v19 = vmax.f32 %v1791_v7, 0.0  ;;  %v1021_v20 = vmax.f32 %v765_v8, 0.0 }
 0x161   : > { %v2815_v21 = vadd.f32 %v3931_v15, %v2558_v9  ;;  %v2559_v22 = vadd.f32 %v2303_v10, %v1276_v63  ;;  %v1792_v23 = vadd.f32 %v3925_v11, %v1535_v13  ;;  %v766_v24 = vadd.f32 %v3913_v2, %v509_v14 }
 0x162   : > { %3326 = vst [vmem:[%s3972_s29 + $0x308] sm:$0xff] %v3070_v17  ;;  %v2304_v25 = vmul.f32 %v3927_v12, %v2047_v19  ;;  %v1278_v26 = vmul.f32 %v3917_v5, %v1021_v20  ;;  %v1536_v27 = vmul.f32 %v3919_v6, %v252_v60  ;;  %v510_v28 = vmul.f32 %v3911_v1, %v253_v16  ;;  %v258_v20 = vld [vmem:[%s3904_s14 + $0x360] sm:$0xff] }
 0x163   : > { %v3071_v30 = vmax.f32 %v2815_v21, 0.0  ;;  %v2816_v31 = vadd.f32 %v3931_v15, %v2559_v22  ;;  %v2048_v32 = vmax.f32 %v1792_v23, 0.0  ;;  %v1022_v33 = vmax.f32 %v766_v24, 0.0 }
 0x164   : > { %v2560_v34 = vadd.f32 %v2304_v25, %v1277_v18  ;;  %v1793_v35 = vadd.f32 %v3925_v11, %v1536_v27  ;;  %v767_v36 = vadd.f32 %v3913_v2, %v510_v28  ;;  %v1537_v37 = vmul.f32 %v3919_v6, %v253_v16 }
 0x165   : > { %3327 = vst [vmem:[%s3972_s29 + $0x310] sm:$0xff] %v3071_v30  ;;  %v3072_v39 = vmax.f32 %v2816_v31, 0.0  ;;  %v2305_v40 = vmul.f32 %v3927_v12, %v2048_v32  ;;  %v1279_v41 = vmul.f32 %v3917_v5, %v1022_v33  ;;  %v511_v42 = vmul.f32 %v3911_v1, %v254_v29 }
 0x166   : > { %v2817_v43 = vadd.f32 %v3931_v15, %v2560_v34  ;;  %v2049_v44 = vmax.f32 %v1793_v35, 0.0  ;;  %v1023_v45 = vmax.f32 %v767_v36, 0.0  ;;  %v1794_v46 = vadd.f32 %v3925_v11, %v1537_v37 }
 0x167   : > { %3328 = vst [vmem:[%s3972_s29 + $0x318] sm:$0xff] %v3072_v39  ;;  %v2561_v47 = vadd.f32 %v2305_v40, %v1278_v26  ;;  %v768_v48 = vadd.f32 %v3913_v2, %v511_v42  ;;  %v1538_v49 = vmul.f32 %v3919_v6, %v254_v29  ;;  %v512_v50 = vmul.f32 %v3911_v1, %v255_v38  ;;  %v259_v29 = vld [vmem:[%s3904_s14 + $0x368] sm:$0xff]  ;;  %v260_v42 = vld [vmem:[%s3904_s14 + $0x370] sm:$0xff] }
 0x168   : > { %v3073_v52 = vmax.f32 %v2817_v43, 0.0  ;;  %v2306_v53 = vmul.f32 %v3927_v12, %v2049_v44  ;;  %v1280_v54 = vmul.f32 %v3917_v5, %v1023_v45  ;;  %v2050_v55 = vmax.f32 %v1794_v46, 0.0 }
 0x169   : > { %v2818_v56 = vadd.f32 %v3931_v15, %v2561_v47  ;;  %v1024_v57 = vmax.f32 %v768_v48, 0.0  ;;  %v1795_v58 = vadd.f32 %v3925_v11, %v1538_v49  ;;  %v769_v59 = vadd.f32 %v3913_v2, %v512_v50 }
 0x16a   : > { %3329 = vst [vmem:[%s3972_s29 + $0x320] sm:$0xff] %v3073_v52  ;;  %v2562_v60 = vadd.f32 %v2306_v53, %v1279_v41  ;;  %v2307_v61 = vmul.f32 %v3927_v12, %v2050_v55  ;;  %v1539_v62 = vmul.f32 %v3919_v6, %v255_v38  ;;  %v513_v63 = vmul.f32 %v3911_v1, %v256_v51  ;;  %v261_v55 = vld [vmem:[%s3904_s14 + $0x378] sm:$0xff] }
 0x16b   : > { %v3074_v3 = vmax.f32 %v2818_v56, 0.0  ;;  %v1281_v4 = vmul.f32 %v3917_v5, %v1024_v57  ;;  %v2051_v7 = vmax.f32 %v1795_v58, 0.0  ;;  %v1025_v8 = vmax.f32 %v769_v59, 0.0 }
 0x16c   : > { %v2819_v9 = vadd.f32 %v3931_v15, %v2562_v60  ;;  %v2563_v10 = vadd.f32 %v2307_v61, %v1280_v54  ;;  %v1796_v13 = vadd.f32 %v3925_v11, %v1539_v62  ;;  %v770_v14 = vadd.f32 %v3913_v2, %v513_v63 }
 0x16d   : > { %3330 = vst [vmem:[%s3972_s29 + $0x328] sm:$0xff] %v3074_v3  ;;  %v2308_v16 = vmul.f32 %v3927_v12, %v2051_v7  ;;  %v1282_v17 = vmul.f32 %v3917_v5, %v1025_v8  ;;  %v1540_v18 = vmul.f32 %v3919_v6, %v256_v51  ;;  %v514_v19 = vmul.f32 %v3911_v1, %v257_v0  ;;  %v262_v8 = vld [vmem:[%s3904_s14 + $0x380] sm:$0xff] }
 0x16e   : > { %v3075_v21 = vmax.f32 %v2819_v9, 0.0  ;;  %v2820_v22 = vadd.f32 %v3931_v15, %v2563_v10  ;;  %v2052_v23 = vmax.f32 %v1796_v13, 0.0  ;;  %v1026_v24 = vmax.f32 %v770_v14, 0.0 }
 0x16f   : > { %v2564_v25 = vadd.f32 %v2308_v16, %v1281_v4  ;;  %v1797_v26 = vadd.f32 %v3925_v11, %v1540_v18  ;;  %v771_v27 = vadd.f32 %v3913_v2, %v514_v19  ;;  %v1541_v28 = vmul.f32 %v3919_v6, %v257_v0 }
 0x170   : > { %3331 = vst [vmem:[%s3972_s29 + $0x330] sm:$0xff] %v3075_v21  ;;  %v3076_v30 = vmax.f32 %v2820_v22, 0.0  ;;  %v2309_v31 = vmul.f32 %v3927_v12, %v2052_v23  ;;  %v1283_v32 = vmul.f32 %v3917_v5, %v1026_v24  ;;  %v515_v33 = vmul.f32 %v3911_v1, %v258_v20 }
 0x171   : > { %v2821_v34 = vadd.f32 %v3931_v15, %v2564_v25  ;;  %v2053_v35 = vmax.f32 %v1797_v26, 0.0  ;;  %v1027_v36 = vmax.f32 %v771_v27, 0.0  ;;  %v1798_v37 = vadd.f32 %v3925_v11, %v1541_v28 }
 0x172   : > { %3332 = vst [vmem:[%s3972_s29 + $0x338] sm:$0xff] %v3076_v30  ;;  %v2565_v38 = vadd.f32 %v2309_v31, %v1282_v17  ;;  %v772_v39 = vadd.f32 %v3913_v2, %v515_v33  ;;  %v1542_v40 = vmul.f32 %v3919_v6, %v258_v20  ;;  %v516_v41 = vmul.f32 %v3911_v1, %v259_v29  ;;  %v263_v20 = vld [vmem:[%s3904_s14 + $0x388] sm:$0xff]  ;;  %v264_v33 = vld [vmem:[%s3904_s14 + $0x390] sm:$0xff] }
 0x173   : > { %v3077_v43 = vmax.f32 %v2821_v34, 0.0  ;;  %v2310_v44 = vmul.f32 %v3927_v12, %v2053_v35  ;;  %v1284_v45 = vmul.f32 %v3917_v5, %v1027_v36  ;;  %v2054_v46 = vmax.f32 %v1798_v37, 0.0 }
 0x174   : > { %v2822_v47 = vadd.f32 %v3931_v15, %v2565_v38  ;;  %v1028_v48 = vmax.f32 %v772_v39, 0.0  ;;  %v1799_v49 = vadd.f32 %v3925_v11, %v1542_v40  ;;  %v773_v50 = vadd.f32 %v3913_v2, %v516_v41 }
 0x175   : > { %3333 = vst [vmem:[%s3972_s29 + $0x340] sm:$0xff] %v3077_v43  ;;  %v2566_v51 = vadd.f32 %v2310_v44, %v1283_v32  ;;  %v2311_v52 = vmul.f32 %v3927_v12, %v2054_v46  ;;  %v1543_v53 = vmul.f32 %v3919_v6, %v259_v29  ;;  %v517_v54 = vmul.f32 %v3911_v1, %v260_v42  ;;  %v265_v46 = vld [vmem:[%s3904_s14 + $0x398] sm:$0xff] }
 0x176   : > { %v3078_v56 = vmax.f32 %v2822_v47, 0.0  ;;  %v1285_v57 = vmul.f32 %v3917_v5, %v1028_v48  ;;  %v2055_v58 = vmax.f32 %v1799_v49, 0.0  ;;  %v1029_v59 = vmax.f32 %v773_v50, 0.0 }
 0x177   : > { %v2823_v60 = vadd.f32 %v3931_v15, %v2566_v51  ;;  %v2567_v61 = vadd.f32 %v2311_v52, %v1284_v45  ;;  %v1800_v62 = vadd.f32 %v3925_v11, %v1543_v53  ;;  %v774_v63 = vadd.f32 %v3913_v2, %v517_v54 }
 0x178   : > { %3334 = vst [vmem:[%s3972_s29 + $0x348] sm:$0xff] %v3078_v56  ;;  %v2312_v0 = vmul.f32 %v3927_v12, %v2055_v58  ;;  %v1286_v3 = vmul.f32 %v3917_v5, %v1029_v59  ;;  %v1544_v4 = vmul.f32 %v3919_v6, %v260_v42  ;;  %v518_v7 = vmul.f32 %v3911_v1, %v261_v55  ;;  %v266_v59 = vld [vmem:[%s3904_s14 + $0x3a0] sm:$0xff] }
 0x179   : > { %v3079_v9 = vmax.f32 %v2823_v60, 0.0  ;;  %v2824_v10 = vadd.f32 %v3931_v15, %v2567_v61  ;;  %v2056_v13 = vmax.f32 %v1800_v62, 0.0  ;;  %v1030_v14 = vmax.f32 %v774_v63, 0.0 }
 0x17a   : > { %v2568_v16 = vadd.f32 %v2312_v0, %v1285_v57  ;;  %v1801_v17 = vadd.f32 %v3925_v11, %v1544_v4  ;;  %v775_v18 = vadd.f32 %v3913_v2, %v518_v7  ;;  %v1545_v19 = vmul.f32 %v3919_v6, %v261_v55 }
 0x17b   : > { %3335 = vst [vmem:[%s3972_s29 + $0x350] sm:$0xff] %v3079_v9  ;;  %v3080_v21 = vmax.f32 %v2824_v10, 0.0  ;;  %v2313_v22 = vmul.f32 %v3927_v12, %v2056_v13  ;;  %v1287_v23 = vmul.f32 %v3917_v5, %v1030_v14  ;;  %v519_v24 = vmul.f32 %v3911_v1, %v262_v8 }
 0x17c   : > { %v2825_v25 = vadd.f32 %v3931_v15, %v2568_v16  ;;  %v2057_v26 = vmax.f32 %v1801_v17, 0.0  ;;  %v1031_v27 = vmax.f32 %v775_v18, 0.0  ;;  %v1802_v28 = vadd.f32 %v3925_v11, %v1545_v19 }
 0x17d   : > { %3336 = vst [vmem:[%s3972_s29 + $0x358] sm:$0xff] %v3080_v21  ;;  %v2569_v29 = vadd.f32 %v2313_v22, %v1286_v3  ;;  %v776_v30 = vadd.f32 %v3913_v2, %v519_v24  ;;  %v1546_v31 = vmul.f32 %v3919_v6, %v262_v8  ;;  %v520_v32 = vmul.f32 %v3911_v1, %v263_v20  ;;  %v267_v8 = vld [vmem:[%s3904_s14 + $0x3a8] sm:$0xff]  ;;  %v268_v24 = vld [vmem:[%s3904_s14 + $0x3b0] sm:$0xff] }
 0x17e   : > { %v3081_v34 = vmax.f32 %v2825_v25, 0.0  ;;  %v2314_v35 = vmul.f32 %v3927_v12, %v2057_v26  ;;  %v1288_v36 = vmul.f32 %v3917_v5, %v1031_v27  ;;  %v2058_v37 = vmax.f32 %v1802_v28, 0.0 }
 0x17f   : > { %v2826_v38 = vadd.f32 %v3931_v15, %v2569_v29  ;;  %v1032_v39 = vmax.f32 %v776_v30, 0.0  ;;  %v1803_v40 = vadd.f32 %v3925_v11, %v1546_v31  ;;  %v777_v41 = vadd.f32 %v3913_v2, %v520_v32 }
 0x180   : > { %3337 = vst [vmem:[%s3972_s29 + $0x360] sm:$0xff] %v3081_v34  ;;  %v2570_v42 = vadd.f32 %v2314_v35, %v1287_v23  ;;  %v2315_v43 = vmul.f32 %v3927_v12, %v2058_v37  ;;  %v1547_v44 = vmul.f32 %v3919_v6, %v263_v20  ;;  %v521_v45 = vmul.f32 %v3911_v1, %v264_v33  ;;  %v269_v37 = vld [vmem:[%s3904_s14 + $0x3b8] sm:$0xff] }
 0x181   : > { %v3082_v47 = vmax.f32 %v2826_v38, 0.0  ;;  %v1289_v48 = vmul.f32 %v3917_v5, %v1032_v39  ;;  %v2059_v49 = vmax.f32 %v1803_v40, 0.0  ;;  %v1033_v50 = vmax.f32 %v777_v41, 0.0 }
 0x182   : > { %v2827_v51 = vadd.f32 %v3931_v15, %v2570_v42  ;;  %v2571_v52 = vadd.f32 %v2315_v43, %v1288_v36  ;;  %v1804_v53 = vadd.f32 %v3925_v11, %v1547_v44  ;;  %v778_v54 = vadd.f32 %v3913_v2, %v521_v45 }
 0x183   : > { %3338 = vst [vmem:[%s3972_s29 + $0x368] sm:$0xff] %v3082_v47  ;;  %v2316_v55 = vmul.f32 %v3927_v12, %v2059_v49  ;;  %v1290_v56 = vmul.f32 %v3917_v5, %v1033_v50  ;;  %v1548_v57 = vmul.f32 %v3919_v6, %v264_v33  ;;  %v522_v58 = vmul.f32 %v3911_v1, %v265_v46  ;;  %v270_v50 = vld [vmem:[%s3904_s14 + $0x3c0] sm:$0xff] }
 0x184   : > { %v3083_v60 = vmax.f32 %v2827_v51, 0.0  ;;  %v2828_v61 = vadd.f32 %v3931_v15, %v2571_v52  ;;  %v2060_v62 = vmax.f32 %v1804_v53, 0.0  ;;  %v1034_v63 = vmax.f32 %v778_v54, 0.0 }
 0x185   : > { %v2572_v0 = vadd.f32 %v2316_v55, %v1289_v48  ;;  %v1805_v3 = vadd.f32 %v3925_v11, %v1548_v57  ;;  %v779_v4 = vadd.f32 %v3913_v2, %v522_v58  ;;  %v1549_v7 = vmul.f32 %v3919_v6, %v265_v46 }
 0x186   : > { %3339 = vst [vmem:[%s3972_s29 + $0x370] sm:$0xff] %v3083_v60  ;;  %v3084_v9 = vmax.f32 %v2828_v61, 0.0  ;;  %v2317_v10 = vmul.f32 %v3927_v12, %v2060_v62  ;;  %v1291_v13 = vmul.f32 %v3917_v5, %v1034_v63  ;;  %v523_v14 = vmul.f32 %v3911_v1, %v266_v59 }
 0x187   : > { %v2829_v16 = vadd.f32 %v3931_v15, %v2572_v0  ;;  %v2061_v17 = vmax.f32 %v1805_v3, 0.0  ;;  %v1035_v18 = vmax.f32 %v779_v4, 0.0  ;;  %v1806_v19 = vadd.f32 %v3925_v11, %v1549_v7 }
 0x188   : > { %3340 = vst [vmem:[%s3972_s29 + $0x378] sm:$0xff] %v3084_v9  ;;  %v2573_v20 = vadd.f32 %v2317_v10, %v1290_v56  ;;  %v780_v21 = vadd.f32 %v3913_v2, %v523_v14  ;;  %v1550_v22 = vmul.f32 %v3919_v6, %v266_v59  ;;  %v524_v23 = vmul.f32 %v3911_v1, %v267_v8  ;;  %v271_v59 = vld [vmem:[%s3904_s14 + $0x3c8] sm:$0xff]  ;;  %v272_v14 = vld [vmem:[%s3904_s14 + $0x3d0] sm:$0xff] }
 0x189   : > { %v3085_v25 = vmax.f32 %v2829_v16, 0.0  ;;  %v2318_v26 = vmul.f32 %v3927_v12, %v2061_v17  ;;  %v1292_v27 = vmul.f32 %v3917_v5, %v1035_v18  ;;  %v2062_v28 = vmax.f32 %v1806_v19, 0.0 }
 0x18a   : > { %v2830_v29 = vadd.f32 %v3931_v15, %v2573_v20  ;;  %v1036_v30 = vmax.f32 %v780_v21, 0.0  ;;  %v1807_v31 = vadd.f32 %v3925_v11, %v1550_v22  ;;  %v781_v32 = vadd.f32 %v3913_v2, %v524_v23 }
 0x18b   : > { %3341 = vst [vmem:[%s3972_s29 + $0x380] sm:$0xff] %v3085_v25  ;;  %v2574_v33 = vadd.f32 %v2318_v26, %v1291_v13  ;;  %v2319_v34 = vmul.f32 %v3927_v12, %v2062_v28  ;;  %v1551_v35 = vmul.f32 %v3919_v6, %v267_v8  ;;  %v525_v36 = vmul.f32 %v3911_v1, %v268_v24  ;;  %v273_v28 = vld [vmem:[%s3904_s14 + $0x3d8] sm:$0xff] }
 0x18c   : > { %v3086_v38 = vmax.f32 %v2830_v29, 0.0  ;;  %v1293_v39 = vmul.f32 %v3917_v5, %v1036_v30  ;;  %v2063_v40 = vmax.f32 %v1807_v31, 0.0  ;;  %v1037_v41 = vmax.f32 %v781_v32, 0.0 }
 0x18d   : > { %v2831_v42 = vadd.f32 %v3931_v15, %v2574_v33  ;;  %v2575_v43 = vadd.f32 %v2319_v34, %v1292_v27  ;;  %v1808_v44 = vadd.f32 %v3925_v11, %v1551_v35  ;;  %v782_v45 = vadd.f32 %v3913_v2, %v525_v36 }
 0x18e   : > { %3342 = vst [vmem:[%s3972_s29 + $0x388] sm:$0xff] %v3086_v38  ;;  %v2320_v46 = vmul.f32 %v3927_v12, %v2063_v40  ;;  %v1294_v47 = vmul.f32 %v3917_v5, %v1037_v41  ;;  %v1552_v48 = vmul.f32 %v3919_v6, %v268_v24  ;;  %v526_v49 = vmul.f32 %v3911_v1, %v269_v37  ;;  %v274_v41 = vld [vmem:[%s3904_s14 + $0x3e0] sm:$0xff] }
 0x18f   : > { %v3087_v51 = vmax.f32 %v2831_v42, 0.0  ;;  %v2832_v52 = vadd.f32 %v3931_v15, %v2575_v43  ;;  %v2064_v53 = vmax.f32 %v1808_v44, 0.0  ;;  %v1038_v54 = vmax.f32 %v782_v45, 0.0 }
 0x190   : > { %v2576_v55 = vadd.f32 %v2320_v46, %v1293_v39  ;;  %v1809_v56 = vadd.f32 %v3925_v11, %v1552_v48  ;;  %v783_v57 = vadd.f32 %v3913_v2, %v526_v49  ;;  %v1553_v58 = vmul.f32 %v3919_v6, %v269_v37 }
 0x191   : > { %3343 = vst [vmem:[%s3972_s29 + $0x390] sm:$0xff] %v3087_v51  ;;  %v3088_v60 = vmax.f32 %v2832_v52, 0.0  ;;  %v2321_v61 = vmul.f32 %v3927_v12, %v2064_v53  ;;  %v1295_v62 = vmul.f32 %v3917_v5, %v1038_v54  ;;  %v527_v63 = vmul.f32 %v3911_v1, %v270_v50 }
 0x192   : > { %v2833_v0 = vadd.f32 %v3931_v15, %v2576_v55  ;;  %v2065_v3 = vmax.f32 %v1809_v56, 0.0  ;;  %v1039_v4 = vmax.f32 %v783_v57, 0.0  ;;  %v1810_v7 = vadd.f32 %v3925_v11, %v1553_v58 }
 0x193   : > { %3344 = vst [vmem:[%s3972_s29 + $0x398] sm:$0xff] %v3088_v60  ;;  %v2577_v8 = vadd.f32 %v2321_v61, %v1294_v47  ;;  %v784_v9 = vadd.f32 %v3913_v2, %v527_v63  ;;  %v1554_v10 = vmul.f32 %v3919_v6, %v270_v50  ;;  %v528_v13 = vmul.f32 %v3911_v1, %v271_v59  ;;  %v275_v50 = vld [vmem:[%s3904_s14 + $0x3e8] sm:$0xff]  ;;  %v276_v63 = vld [vmem:[%s3904_s14 + $0x3f0] sm:$0xff] }
 0x194   : > { %v3089_v16 = vmax.f32 %v2833_v0, 0.0  ;;  %v2322_v17 = vmul.f32 %v3927_v12, %v2065_v3  ;;  %v1296_v18 = vmul.f32 %v3917_v5, %v1039_v4  ;;  %v2066_v19 = vmax.f32 %v1810_v7, 0.0 }
 0x195   : > { %v2834_v20 = vadd.f32 %v3931_v15, %v2577_v8  ;;  %v1040_v21 = vmax.f32 %v784_v9, 0.0  ;;  %v1811_v22 = vadd.f32 %v3925_v11, %v1554_v10  ;;  %v785_v23 = vadd.f32 %v3913_v2, %v528_v13 }
 0x196   : > { %3345 = vst [vmem:[%s3972_s29 + $0x3a0] sm:$0xff] %v3089_v16  ;;  %v2578_v24 = vadd.f32 %v2322_v17, %v1295_v62  ;;  %v2323_v25 = vmul.f32 %v3927_v12, %v2066_v19  ;;  %v1555_v26 = vmul.f32 %v3919_v6, %v271_v59  ;;  %v529_v27 = vmul.f32 %v3911_v1, %v272_v14  ;;  %v277_v19 = vld [vmem:[%s3904_s14 + $0x3f8] sm:$0xff] }
 0x197   : > { %v3090_v29 = vmax.f32 %v2834_v20, 0.0  ;;  %v1297_v30 = vmul.f32 %v3917_v5, %v1040_v21  ;;  %v2067_v31 = vmax.f32 %v1811_v22, 0.0  ;;  %v1041_v32 = vmax.f32 %v785_v23, 0.0 }
 0x198   : > { %v2835_v33 = vadd.f32 %v3931_v15, %v2578_v24  ;;  %v2579_v34 = vadd.f32 %v2323_v25, %v1296_v18  ;;  %v1812_v35 = vadd.f32 %v3925_v11, %v1555_v26  ;;  %v786_v36 = vadd.f32 %v3913_v2, %v529_v27 }
 0x199   : > { %3346 = vst [vmem:[%s3972_s29 + $0x3a8] sm:$0xff] %v3090_v29  ;;  %v2324_v37 = vmul.f32 %v3927_v12, %v2067_v31  ;;  %v1298_v38 = vmul.f32 %v3917_v5, %v1041_v32  ;;  %v1556_v39 = vmul.f32 %v3919_v6, %v272_v14  ;;  %v530_v40 = vmul.f32 %v3911_v1, %v273_v28  ;;  %v278_v32 = vld [vmem:[%s3904_s14 + $0x400] sm:$0xff] }
 0x19a   : > { %v3091_v42 = vmax.f32 %v2835_v33, 0.0  ;;  %v2836_v43 = vadd.f32 %v3931_v15, %v2579_v34  ;;  %v2068_v44 = vmax.f32 %v1812_v35, 0.0  ;;  %v1042_v45 = vmax.f32 %v786_v36, 0.0 }
 0x19b   : > { %v2580_v46 = vadd.f32 %v2324_v37, %v1297_v30  ;;  %v1813_v47 = vadd.f32 %v3925_v11, %v1556_v39  ;;  %v787_v48 = vadd.f32 %v3913_v2, %v530_v40  ;;  %v1557_v49 = vmul.f32 %v3919_v6, %v273_v28 }
 0x19c   : > { %3347 = vst [vmem:[%s3972_s29 + $0x3b0] sm:$0xff] %v3091_v42  ;;  %v3092_v51 = vmax.f32 %v2836_v43, 0.0  ;;  %v2325_v52 = vmul.f32 %v3927_v12, %v2068_v44  ;;  %v1299_v53 = vmul.f32 %v3917_v5, %v1042_v45  ;;  %v531_v54 = vmul.f32 %v3911_v1, %v274_v41 }
 0x19d   : > { %v2837_v55 = vadd.f32 %v3931_v15, %v2580_v46  ;;  %v2069_v56 = vmax.f32 %v1813_v47, 0.0  ;;  %v1043_v57 = vmax.f32 %v787_v48, 0.0  ;;  %v1814_v58 = vadd.f32 %v3925_v11, %v1557_v49 }
 0x19e   : > { %3348 = vst [vmem:[%s3972_s29 + $0x3b8] sm:$0xff] %v3092_v51  ;;  %v2581_v59 = vadd.f32 %v2325_v52, %v1298_v38  ;;  %v788_v60 = vadd.f32 %v3913_v2, %v531_v54  ;;  %v1558_v61 = vmul.f32 %v3919_v6, %v274_v41  ;;  %v532_v62 = vmul.f32 %v3911_v1, %v275_v50  ;;  %v279_v41 = vld [vmem:[%s3904_s14 + $0x408] sm:$0xff]  ;;  %v280_v54 = vld [vmem:[%s3904_s14 + $0x410] sm:$0xff] }
 0x19f   : > { %v3093_v0 = vmax.f32 %v2837_v55, 0.0  ;;  %v2326_v3 = vmul.f32 %v3927_v12, %v2069_v56  ;;  %v1300_v4 = vmul.f32 %v3917_v5, %v1043_v57  ;;  %v2070_v7 = vmax.f32 %v1814_v58, 0.0 }
 0x1a0   : > { %v2838_v8 = vadd.f32 %v3931_v15, %v2581_v59  ;;  %v1044_v9 = vmax.f32 %v788_v60, 0.0  ;;  %v1815_v10 = vadd.f32 %v3925_v11, %v1558_v61  ;;  %v789_v13 = vadd.f32 %v3913_v2, %v532_v62 }
 0x1a1   : > { %3349 = vst [vmem:[%s3972_s29 + $0x3c0] sm:$0xff] %v3093_v0  ;;  %v2582_v14 = vadd.f32 %v2326_v3, %v1299_v53  ;;  %v2327_v16 = vmul.f32 %v3927_v12, %v2070_v7  ;;  %v1559_v17 = vmul.f32 %v3919_v6, %v275_v50  ;;  %v533_v18 = vmul.f32 %v3911_v1, %v276_v63  ;;  %v281_v7 = vld [vmem:[%s3904_s14 + $0x418] sm:$0xff] }
 0x1a2   : > { %v3094_v20 = vmax.f32 %v2838_v8, 0.0  ;;  %v1301_v21 = vmul.f32 %v3917_v5, %v1044_v9  ;;  %v2071_v22 = vmax.f32 %v1815_v10, 0.0  ;;  %v1045_v23 = vmax.f32 %v789_v13, 0.0 }
 0x1a3   : > { %v2839_v24 = vadd.f32 %v3931_v15, %v2582_v14  ;;  %v2583_v25 = vadd.f32 %v2327_v16, %v1300_v4  ;;  %v1816_v26 = vadd.f32 %v3925_v11, %v1559_v17  ;;  %v790_v27 = vadd.f32 %v3913_v2, %v533_v18 }
 0x1a4   : > { %3350 = vst [vmem:[%s3972_s29 + $0x3c8] sm:$0xff] %v3094_v20  ;;  %v2328_v28 = vmul.f32 %v3927_v12, %v2071_v22  ;;  %v1302_v29 = vmul.f32 %v3917_v5, %v1045_v23  ;;  %v1560_v30 = vmul.f32 %v3919_v6, %v276_v63  ;;  %v534_v31 = vmul.f32 %v3911_v1, %v277_v19  ;;  %v282_v23 = vld [vmem:[%s3904_s14 + $0x420] sm:$0xff] }
 0x1a5   : > { %v3095_v33 = vmax.f32 %v2839_v24, 0.0  ;;  %v2840_v34 = vadd.f32 %v3931_v15, %v2583_v25  ;;  %v2072_v35 = vmax.f32 %v1816_v26, 0.0  ;;  %v1046_v36 = vmax.f32 %v790_v27, 0.0 }
 0x1a6   : > { %v2584_v37 = vadd.f32 %v2328_v28, %v1301_v21  ;;  %v1817_v38 = vadd.f32 %v3925_v11, %v1560_v30  ;;  %v791_v39 = vadd.f32 %v3913_v2, %v534_v31  ;;  %v1561_v40 = vmul.f32 %v3919_v6, %v277_v19 }
 0x1a7   : > { %3351 = vst [vmem:[%s3972_s29 + $0x3d0] sm:$0xff] %v3095_v33  ;;  %v3096_v42 = vmax.f32 %v2840_v34, 0.0  ;;  %v2329_v43 = vmul.f32 %v3927_v12, %v2072_v35  ;;  %v1303_v44 = vmul.f32 %v3917_v5, %v1046_v36  ;;  %v535_v45 = vmul.f32 %v3911_v1, %v278_v32 }
 0x1a8   : > { %v2841_v46 = vadd.f32 %v3931_v15, %v2584_v37  ;;  %v2073_v47 = vmax.f32 %v1817_v38, 0.0  ;;  %v1047_v48 = vmax.f32 %v791_v39, 0.0  ;;  %v1818_v49 = vadd.f32 %v3925_v11, %v1561_v40 }
 0x1a9   : > { %3352 = vst [vmem:[%s3972_s29 + $0x3d8] sm:$0xff] %v3096_v42  ;;  %v2585_v50 = vadd.f32 %v2329_v43, %v1302_v29  ;;  %v792_v51 = vadd.f32 %v3913_v2, %v535_v45  ;;  %v1562_v52 = vmul.f32 %v3919_v6, %v278_v32  ;;  %v536_v53 = vmul.f32 %v3911_v1, %v279_v41  ;;  %v283_v32 = vld [vmem:[%s3904_s14 + $0x428] sm:$0xff]  ;;  %v284_v45 = vld [vmem:[%s3904_s14 + $0x430] sm:$0xff] }
 0x1aa   : > { %v3097_v55 = vmax.f32 %v2841_v46, 0.0  ;;  %v2330_v56 = vmul.f32 %v3927_v12, %v2073_v47  ;;  %v1304_v57 = vmul.f32 %v3917_v5, %v1047_v48  ;;  %v2074_v58 = vmax.f32 %v1818_v49, 0.0 }
 0x1ab   : > { %v2842_v59 = vadd.f32 %v3931_v15, %v2585_v50  ;;  %v1048_v60 = vmax.f32 %v792_v51, 0.0  ;;  %v1819_v61 = vadd.f32 %v3925_v11, %v1562_v52  ;;  %v793_v62 = vadd.f32 %v3913_v2, %v536_v53 }
 0x1ac   : > { %3353 = vst [vmem:[%s3972_s29 + $0x3e0] sm:$0xff] %v3097_v55  ;;  %v2586_v63 = vadd.f32 %v2330_v56, %v1303_v44  ;;  %v2331_v0 = vmul.f32 %v3927_v12, %v2074_v58  ;;  %v1563_v3 = vmul.f32 %v3919_v6, %v279_v41  ;;  %v537_v4 = vmul.f32 %v3911_v1, %v280_v54  ;;  %v285_v58 = vld [vmem:[%s3904_s14 + $0x438] sm:$0xff] }
 0x1ad   : > { %v3098_v8 = vmax.f32 %v2842_v59, 0.0  ;;  %v1305_v9 = vmul.f32 %v3917_v5, %v1048_v60  ;;  %v2075_v10 = vmax.f32 %v1819_v61, 0.0  ;;  %v1049_v13 = vmax.f32 %v793_v62, 0.0 }
 0x1ae   : > { %v2843_v14 = vadd.f32 %v3931_v15, %v2586_v63  ;;  %v2587_v16 = vadd.f32 %v2331_v0, %v1304_v57  ;;  %v1820_v17 = vadd.f32 %v3925_v11, %v1563_v3  ;;  %v794_v18 = vadd.f32 %v3913_v2, %v537_v4 }
 0x1af   : > { %3354 = vst [vmem:[%s3972_s29 + $0x3e8] sm:$0xff] %v3098_v8  ;;  %v2332_v19 = vmul.f32 %v3927_v12, %v2075_v10  ;;  %v1306_v20 = vmul.f32 %v3917_v5, %v1049_v13  ;;  %v1564_v21 = vmul.f32 %v3919_v6, %v280_v54  ;;  %v538_v22 = vmul.f32 %v3911_v1, %v281_v7  ;;  %v286_v13 = vld [vmem:[%s3904_s14 + $0x440] sm:$0xff] }
 0x1b0   : > { %v3099_v24 = vmax.f32 %v2843_v14, 0.0  ;;  %v2844_v25 = vadd.f32 %v3931_v15, %v2587_v16  ;;  %v2076_v26 = vmax.f32 %v1820_v17, 0.0  ;;  %v1050_v27 = vmax.f32 %v794_v18, 0.0 }
 0x1b1   : > { %v2588_v28 = vadd.f32 %v2332_v19, %v1305_v9  ;;  %v1821_v29 = vadd.f32 %v3925_v11, %v1564_v21  ;;  %v795_v30 = vadd.f32 %v3913_v2, %v538_v22  ;;  %v1565_v31 = vmul.f32 %v3919_v6, %v281_v7 }
 0x1b2   : > { %3355 = vst [vmem:[%s3972_s29 + $0x3f0] sm:$0xff] %v3099_v24  ;;  %v3100_v33 = vmax.f32 %v2844_v25, 0.0  ;;  %v2333_v34 = vmul.f32 %v3927_v12, %v2076_v26  ;;  %v1307_v35 = vmul.f32 %v3917_v5, %v1050_v27  ;;  %v539_v36 = vmul.f32 %v3911_v1, %v282_v23 }
 0x1b3   : > { %v2845_v37 = vadd.f32 %v3931_v15, %v2588_v28  ;;  %v2077_v38 = vmax.f32 %v1821_v29, 0.0  ;;  %v1051_v39 = vmax.f32 %v795_v30, 0.0  ;;  %v1822_v40 = vadd.f32 %v3925_v11, %v1565_v31 }
 0x1b4   : > { %3356 = vst [vmem:[%s3972_s29 + $0x3f8] sm:$0xff] %v3100_v33  ;;  %v2589_v41 = vadd.f32 %v2333_v34, %v1306_v20  ;;  %v796_v42 = vadd.f32 %v3913_v2, %v539_v36  ;;  %v1566_v43 = vmul.f32 %v3919_v6, %v282_v23  ;;  %v540_v44 = vmul.f32 %v3911_v1, %v283_v32  ;;  %v287_v23 = vld [vmem:[%s3904_s14 + $0x448] sm:$0xff]  ;;  %v288_v36 = vld [vmem:[%s3904_s14 + $0x450] sm:$0xff] }
 0x1b5   : > { %v3101_v46 = vmax.f32 %v2845_v37, 0.0  ;;  %v2334_v47 = vmul.f32 %v3927_v12, %v2077_v38  ;;  %v1308_v48 = vmul.f32 %v3917_v5, %v1051_v39  ;;  %v2078_v49 = vmax.f32 %v1822_v40, 0.0 }
 0x1b6   : > { %v2846_v50 = vadd.f32 %v3931_v15, %v2589_v41  ;;  %v1052_v51 = vmax.f32 %v796_v42, 0.0  ;;  %v1823_v52 = vadd.f32 %v3925_v11, %v1566_v43  ;;  %v797_v53 = vadd.f32 %v3913_v2, %v540_v44 }
 0x1b7   : > { %3357 = vst [vmem:[%s3972_s29 + $0x400] sm:$0xff] %v3101_v46  ;;  %v2590_v54 = vadd.f32 %v2334_v47, %v1307_v35  ;;  %v2335_v55 = vmul.f32 %v3927_v12, %v2078_v49  ;;  %v1567_v56 = vmul.f32 %v3919_v6, %v283_v32  ;;  %v541_v57 = vmul.f32 %v3911_v1, %v284_v45  ;;  %v289_v49 = vld [vmem:[%s3904_s14 + $0x458] sm:$0xff] }
 0x1b8   : > { %v3102_v59 = vmax.f32 %v2846_v50, 0.0  ;;  %v1309_v60 = vmul.f32 %v3917_v5, %v1052_v51  ;;  %v2079_v61 = vmax.f32 %v1823_v52, 0.0  ;;  %v1053_v62 = vmax.f32 %v797_v53, 0.0 }
 0x1b9   : > { %v2847_v63 = vadd.f32 %v3931_v15, %v2590_v54  ;;  %v2591_v0 = vadd.f32 %v2335_v55, %v1308_v48  ;;  %v1824_v3 = vadd.f32 %v3925_v11, %v1567_v56  ;;  %v798_v4 = vadd.f32 %v3913_v2, %v541_v57 }
 0x1ba   : > { %3358 = vst [vmem:[%s3972_s29 + $0x408] sm:$0xff] %v3102_v59  ;;  %v2336_v7 = vmul.f32 %v3927_v12, %v2079_v61  ;;  %v1310_v8 = vmul.f32 %v3917_v5, %v1053_v62  ;;  %v1568_v9 = vmul.f32 %v3919_v6, %v284_v45  ;;  %v542_v10 = vmul.f32 %v3911_v1, %v285_v58  ;;  %v290_v62 = vld [vmem:[%s3904_s14 + $0x460] sm:$0xff] }
 0x1bb   : > { %v3103_v14 = vmax.f32 %v2847_v63, 0.0  ;;  %v2848_v16 = vadd.f32 %v3931_v15, %v2591_v0  ;;  %v2080_v17 = vmax.f32 %v1824_v3, 0.0  ;;  %v1054_v18 = vmax.f32 %v798_v4, 0.0 }
 0x1bc   : > { %v2592_v19 = vadd.f32 %v2336_v7, %v1309_v60  ;;  %v1825_v20 = vadd.f32 %v3925_v11, %v1568_v9  ;;  %v799_v21 = vadd.f32 %v3913_v2, %v542_v10  ;;  %v1569_v22 = vmul.f32 %v3919_v6, %v285_v58 }
 0x1bd   : > { %3359 = vst [vmem:[%s3972_s29 + $0x410] sm:$0xff] %v3103_v14  ;;  %v3104_v24 = vmax.f32 %v2848_v16, 0.0  ;;  %v2337_v25 = vmul.f32 %v3927_v12, %v2080_v17  ;;  %v1311_v26 = vmul.f32 %v3917_v5, %v1054_v18  ;;  %v543_v27 = vmul.f32 %v3911_v1, %v286_v13 }
 0x1be   : > { %v2849_v28 = vadd.f32 %v3931_v15, %v2592_v19  ;;  %v2081_v29 = vmax.f32 %v1825_v20, 0.0  ;;  %v1055_v30 = vmax.f32 %v799_v21, 0.0  ;;  %v1826_v31 = vadd.f32 %v3925_v11, %v1569_v22 }
 0x1bf   : > { %3360 = vst [vmem:[%s3972_s29 + $0x418] sm:$0xff] %v3104_v24  ;;  %v2593_v32 = vadd.f32 %v2337_v25, %v1310_v8  ;;  %v800_v33 = vadd.f32 %v3913_v2, %v543_v27  ;;  %v1570_v34 = vmul.f32 %v3919_v6, %v286_v13  ;;  %v544_v35 = vmul.f32 %v3911_v1, %v287_v23  ;;  %v291_v13 = vld [vmem:[%s3904_s14 + $0x468] sm:$0xff]  ;;  %v292_v27 = vld [vmem:[%s3904_s14 + $0x470] sm:$0xff] }
 0x1c0   : > { %v3105_v37 = vmax.f32 %v2849_v28, 0.0  ;;  %v2338_v38 = vmul.f32 %v3927_v12, %v2081_v29  ;;  %v1312_v39 = vmul.f32 %v3917_v5, %v1055_v30  ;;  %v2082_v40 = vmax.f32 %v1826_v31, 0.0 }
 0x1c1   : > { %v2850_v41 = vadd.f32 %v3931_v15, %v2593_v32  ;;  %v1056_v42 = vmax.f32 %v800_v33, 0.0  ;;  %v1827_v43 = vadd.f32 %v3925_v11, %v1570_v34  ;;  %v801_v44 = vadd.f32 %v3913_v2, %v544_v35 }
 0x1c2   : > { %3361 = vst [vmem:[%s3972_s29 + $0x420] sm:$0xff] %v3105_v37  ;;  %v2594_v45 = vadd.f32 %v2338_v38, %v1311_v26  ;;  %v2339_v46 = vmul.f32 %v3927_v12, %v2082_v40  ;;  %v1571_v47 = vmul.f32 %v3919_v6, %v287_v23  ;;  %v545_v48 = vmul.f32 %v3911_v1, %v288_v36  ;;  %v293_v40 = vld [vmem:[%s3904_s14 + $0x478] sm:$0xff] }
 0x1c3   : > { %v3106_v50 = vmax.f32 %v2850_v41, 0.0  ;;  %v1313_v51 = vmul.f32 %v3917_v5, %v1056_v42  ;;  %v2083_v52 = vmax.f32 %v1827_v43, 0.0  ;;  %v1057_v53 = vmax.f32 %v801_v44, 0.0 }
 0x1c4   : > { %v2851_v54 = vadd.f32 %v3931_v15, %v2594_v45  ;;  %v2595_v55 = vadd.f32 %v2339_v46, %v1312_v39  ;;  %v1828_v56 = vadd.f32 %v3925_v11, %v1571_v47  ;;  %v802_v57 = vadd.f32 %v3913_v2, %v545_v48 }
 0x1c5   : > { %3362 = vst [vmem:[%s3972_s29 + $0x428] sm:$0xff] %v3106_v50  ;;  %v2340_v58 = vmul.f32 %v3927_v12, %v2083_v52  ;;  %v1314_v59 = vmul.f32 %v3917_v5, %v1057_v53  ;;  %v1572_v60 = vmul.f32 %v3919_v6, %v288_v36  ;;  %v546_v61 = vmul.f32 %v3911_v1, %v289_v49  ;;  %v294_v53 = vld [vmem:[%s3904_s14 + $0x480] sm:$0xff] }
 0x1c6   : > { %v3107_v63 = vmax.f32 %v2851_v54, 0.0  ;;  %v2852_v0 = vadd.f32 %v3931_v15, %v2595_v55  ;;  %v2084_v3 = vmax.f32 %v1828_v56, 0.0  ;;  %v1058_v4 = vmax.f32 %v802_v57, 0.0 }
 0x1c7   : > { %v2596_v7 = vadd.f32 %v2340_v58, %v1313_v51  ;;  %v1829_v8 = vadd.f32 %v3925_v11, %v1572_v60  ;;  %v803_v9 = vadd.f32 %v3913_v2, %v546_v61  ;;  %v1573_v10 = vmul.f32 %v3919_v6, %v289_v49 }
 0x1c8   : > { %3363 = vst [vmem:[%s3972_s29 + $0x430] sm:$0xff] %v3107_v63  ;;  %v3108_v14 = vmax.f32 %v2852_v0, 0.0  ;;  %v2341_v16 = vmul.f32 %v3927_v12, %v2084_v3  ;;  %v1315_v17 = vmul.f32 %v3917_v5, %v1058_v4  ;;  %v547_v18 = vmul.f32 %v3911_v1, %v290_v62 }
 0x1c9   : > { %v2853_v19 = vadd.f32 %v3931_v15, %v2596_v7  ;;  %v2085_v20 = vmax.f32 %v1829_v8, 0.0  ;;  %v1059_v21 = vmax.f32 %v803_v9, 0.0  ;;  %v1830_v22 = vadd.f32 %v3925_v11, %v1573_v10 }
 0x1ca   : > { %3364 = vst [vmem:[%s3972_s29 + $0x438] sm:$0xff] %v3108_v14  ;;  %v2597_v23 = vadd.f32 %v2341_v16, %v1314_v59  ;;  %v804_v24 = vadd.f32 %v3913_v2, %v547_v18  ;;  %v1574_v25 = vmul.f32 %v3919_v6, %v290_v62  ;;  %v548_v26 = vmul.f32 %v3911_v1, %v291_v13  ;;  %v295_v62 = vld [vmem:[%s3904_s14 + $0x488] sm:$0xff]  ;;  %v296_v18 = vld [vmem:[%s3904_s14 + $0x490] sm:$0xff] }
 0x1cb   : > { %v3109_v28 = vmax.f32 %v2853_v19, 0.0  ;;  %v2342_v29 = vmul.f32 %v3927_v12, %v2085_v20  ;;  %v1316_v30 = vmul.f32 %v3917_v5, %v1059_v21  ;;  %v2086_v31 = vmax.f32 %v1830_v22, 0.0 }
 0x1cc   : > { %v2854_v32 = vadd.f32 %v3931_v15, %v2597_v23  ;;  %v1060_v33 = vmax.f32 %v804_v24, 0.0  ;;  %v1831_v34 = vadd.f32 %v3925_v11, %v1574_v25  ;;  %v805_v35 = vadd.f32 %v3913_v2, %v548_v26 }
 0x1cd   : > { %3365 = vst [vmem:[%s3972_s29 + $0x440] sm:$0xff] %v3109_v28  ;;  %v2598_v36 = vadd.f32 %v2342_v29, %v1315_v17  ;;  %v2343_v37 = vmul.f32 %v3927_v12, %v2086_v31  ;;  %v1575_v38 = vmul.f32 %v3919_v6, %v291_v13  ;;  %v549_v39 = vmul.f32 %v3911_v1, %v292_v27  ;;  %v297_v31 = vld [vmem:[%s3904_s14 + $0x498] sm:$0xff] }
 0x1ce   : > { %v3110_v41 = vmax.f32 %v2854_v32, 0.0  ;;  %v1317_v42 = vmul.f32 %v3917_v5, %v1060_v33  ;;  %v2087_v43 = vmax.f32 %v1831_v34, 0.0  ;;  %v1061_v44 = vmax.f32 %v805_v35, 0.0 }
 0x1cf   : > { %v2855_v45 = vadd.f32 %v3931_v15, %v2598_v36  ;;  %v2599_v46 = vadd.f32 %v2343_v37, %v1316_v30  ;;  %v1832_v47 = vadd.f32 %v3925_v11, %v1575_v38  ;;  %v806_v48 = vadd.f32 %v3913_v2, %v549_v39 }
 0x1d0   : > { %3366 = vst [vmem:[%s3972_s29 + $0x448] sm:$0xff] %v3110_v41  ;;  %v2344_v49 = vmul.f32 %v3927_v12, %v2087_v43  ;;  %v1318_v50 = vmul.f32 %v3917_v5, %v1061_v44  ;;  %v1576_v51 = vmul.f32 %v3919_v6, %v292_v27  ;;  %v550_v52 = vmul.f32 %v3911_v1, %v293_v40  ;;  %v298_v44 = vld [vmem:[%s3904_s14 + $0x4a0] sm:$0xff] }
 0x1d1   : > { %v3111_v54 = vmax.f32 %v2855_v45, 0.0  ;;  %v2856_v55 = vadd.f32 %v3931_v15, %v2599_v46  ;;  %v2088_v56 = vmax.f32 %v1832_v47, 0.0  ;;  %v1062_v57 = vmax.f32 %v806_v48, 0.0 }
 0x1d2   : > { %v2600_v58 = vadd.f32 %v2344_v49, %v1317_v42  ;;  %v1833_v59 = vadd.f32 %v3925_v11, %v1576_v51  ;;  %v807_v60 = vadd.f32 %v3913_v2, %v550_v52  ;;  %v1577_v61 = vmul.f32 %v3919_v6, %v293_v40 }
 0x1d3   : > { %3367 = vst [vmem:[%s3972_s29 + $0x450] sm:$0xff] %v3111_v54  ;;  %v3112_v63 = vmax.f32 %v2856_v55, 0.0  ;;  %v2345_v0 = vmul.f32 %v3927_v12, %v2088_v56  ;;  %v1319_v3 = vmul.f32 %v3917_v5, %v1062_v57  ;;  %v551_v4 = vmul.f32 %v3911_v1, %v294_v53 }
 0x1d4   : > { %v2857_v7 = vadd.f32 %v3931_v15, %v2600_v58  ;;  %v2089_v8 = vmax.f32 %v1833_v59, 0.0  ;;  %v1063_v9 = vmax.f32 %v807_v60, 0.0  ;;  %v1834_v10 = vadd.f32 %v3925_v11, %v1577_v61 }
 0x1d5   : > { %3368 = vst [vmem:[%s3972_s29 + $0x458] sm:$0xff] %v3112_v63  ;;  %v2601_v13 = vadd.f32 %v2345_v0, %v1318_v50  ;;  %v808_v14 = vadd.f32 %v3913_v2, %v551_v4  ;;  %v1578_v16 = vmul.f32 %v3919_v6, %v294_v53  ;;  %v552_v17 = vmul.f32 %v3911_v1, %v295_v62  ;;  %v299_v53 = vld [vmem:[%s3904_s14 + $0x4a8] sm:$0xff]  ;;  %v300_v4 = vld [vmem:[%s3904_s14 + $0x4b0] sm:$0xff] }
 0x1d6   : > { %v3113_v19 = vmax.f32 %v2857_v7, 0.0  ;;  %v2346_v20 = vmul.f32 %v3927_v12, %v2089_v8  ;;  %v1320_v21 = vmul.f32 %v3917_v5, %v1063_v9  ;;  %v2090_v22 = vmax.f32 %v1834_v10, 0.0 }
 0x1d7   : > { %v2858_v23 = vadd.f32 %v3931_v15, %v2601_v13  ;;  %v1064_v24 = vmax.f32 %v808_v14, 0.0  ;;  %v1835_v25 = vadd.f32 %v3925_v11, %v1578_v16  ;;  %v809_v26 = vadd.f32 %v3913_v2, %v552_v17 }
 0x1d8   : > { %3369 = vst [vmem:[%s3972_s29 + $0x460] sm:$0xff] %v3113_v19  ;;  %v2602_v27 = vadd.f32 %v2346_v20, %v1319_v3  ;;  %v2347_v28 = vmul.f32 %v3927_v12, %v2090_v22  ;;  %v1579_v29 = vmul.f32 %v3919_v6, %v295_v62  ;;  %v553_v30 = vmul.f32 %v3911_v1, %v296_v18  ;;  %v301_v22 = vld [vmem:[%s3904_s14 + $0x4b8] sm:$0xff] }
 0x1d9   : > { %v3114_v32 = vmax.f32 %v2858_v23, 0.0  ;;  %v1321_v33 = vmul.f32 %v3917_v5, %v1064_v24  ;;  %v2091_v34 = vmax.f32 %v1835_v25, 0.0  ;;  %v1065_v35 = vmax.f32 %v809_v26, 0.0 }
 0x1da   : > { %v2859_v36 = vadd.f32 %v3931_v15, %v2602_v27  ;;  %v2603_v37 = vadd.f32 %v2347_v28, %v1320_v21  ;;  %v1836_v38 = vadd.f32 %v3925_v11, %v1579_v29  ;;  %v810_v39 = vadd.f32 %v3913_v2, %v553_v30 }
 0x1db   : > { %3370 = vst [vmem:[%s3972_s29 + $0x468] sm:$0xff] %v3114_v32  ;;  %v2348_v40 = vmul.f32 %v3927_v12, %v2091_v34  ;;  %v1322_v41 = vmul.f32 %v3917_v5, %v1065_v35  ;;  %v1580_v42 = vmul.f32 %v3919_v6, %v296_v18  ;;  %v554_v43 = vmul.f32 %v3911_v1, %v297_v31  ;;  %v302_v35 = vld [vmem:[%s3904_s14 + $0x4c0] sm:$0xff] }
 0x1dc   : > { %v3115_v45 = vmax.f32 %v2859_v36, 0.0  ;;  %v2860_v46 = vadd.f32 %v3931_v15, %v2603_v37  ;;  %v2092_v47 = vmax.f32 %v1836_v38, 0.0  ;;  %v1066_v48 = vmax.f32 %v810_v39, 0.0 }
 0x1dd   : > { %v2604_v49 = vadd.f32 %v2348_v40, %v1321_v33  ;;  %v1837_v50 = vadd.f32 %v3925_v11, %v1580_v42  ;;  %v811_v51 = vadd.f32 %v3913_v2, %v554_v43  ;;  %v1581_v52 = vmul.f32 %v3919_v6, %v297_v31 }
 0x1de   : > { %3371 = vst [vmem:[%s3972_s29 + $0x470] sm:$0xff] %v3115_v45  ;;  %v3116_v54 = vmax.f32 %v2860_v46, 0.0  ;;  %v2349_v55 = vmul.f32 %v3927_v12, %v2092_v47  ;;  %v1323_v56 = vmul.f32 %v3917_v5, %v1066_v48  ;;  %v555_v57 = vmul.f32 %v3911_v1, %v298_v44 }
 0x1df   : > { %v2861_v58 = vadd.f32 %v3931_v15, %v2604_v49  ;;  %v2093_v59 = vmax.f32 %v1837_v50, 0.0  ;;  %v1067_v60 = vmax.f32 %v811_v51, 0.0  ;;  %v1838_v61 = vadd.f32 %v3925_v11, %v1581_v52 }
 0x1e0   : > { %3372 = vst [vmem:[%s3972_s29 + $0x478] sm:$0xff] %v3116_v54  ;;  %v2605_v62 = vadd.f32 %v2349_v55, %v1322_v41  ;;  %v812_v63 = vadd.f32 %v3913_v2, %v555_v57  ;;  %v1582_v0 = vmul.f32 %v3919_v6, %v298_v44  ;;  %v556_v3 = vmul.f32 %v3911_v1, %v299_v53  ;;  %v303_v44 = vld [vmem:[%s3904_s14 + $0x4c8] sm:$0xff]  ;;  %v304_v57 = vld [vmem:[%s3904_s14 + $0x4d0] sm:$0xff] }
 0x1e1   : > { %v3117_v7 = vmax.f32 %v2861_v58, 0.0  ;;  %v2350_v8 = vmul.f32 %v3927_v12, %v2093_v59  ;;  %v1324_v9 = vmul.f32 %v3917_v5, %v1067_v60  ;;  %v2094_v10 = vmax.f32 %v1838_v61, 0.0 }
 0x1e2   : > { %v2862_v13 = vadd.f32 %v3931_v15, %v2605_v62  ;;  %v1068_v14 = vmax.f32 %v812_v63, 0.0  ;;  %v1839_v16 = vadd.f32 %v3925_v11, %v1582_v0  ;;  %v813_v17 = vadd.f32 %v3913_v2, %v556_v3 }
 0x1e3   : > { %3373 = vst [vmem:[%s3972_s29 + $0x480] sm:$0xff] %v3117_v7  ;;  %v2606_v18 = vadd.f32 %v2350_v8, %v1323_v56  ;;  %v2351_v19 = vmul.f32 %v3927_v12, %v2094_v10  ;;  %v1583_v20 = vmul.f32 %v3919_v6, %v299_v53  ;;  %v557_v21 = vmul.f32 %v3911_v1, %v300_v4  ;;  %v305_v10 = vld [vmem:[%s3904_s14 + $0x4d8] sm:$0xff] }
 0x1e4   : > { %v3118_v23 = vmax.f32 %v2862_v13, 0.0  ;;  %v1325_v24 = vmul.f32 %v3917_v5, %v1068_v14  ;;  %v2095_v25 = vmax.f32 %v1839_v16, 0.0  ;;  %v1069_v26 = vmax.f32 %v813_v17, 0.0 }
 0x1e5   : > { %v2863_v27 = vadd.f32 %v3931_v15, %v2606_v18  ;;  %v2607_v28 = vadd.f32 %v2351_v19, %v1324_v9  ;;  %v1840_v29 = vadd.f32 %v3925_v11, %v1583_v20  ;;  %v814_v30 = vadd.f32 %v3913_v2, %v557_v21 }
 0x1e6   : > { %3374 = vst [vmem:[%s3972_s29 + $0x488] sm:$0xff] %v3118_v23  ;;  %v2352_v31 = vmul.f32 %v3927_v12, %v2095_v25  ;;  %v1326_v32 = vmul.f32 %v3917_v5, %v1069_v26  ;;  %v1584_v33 = vmul.f32 %v3919_v6, %v300_v4  ;;  %v558_v34 = vmul.f32 %v3911_v1, %v301_v22  ;;  %v306_v26 = vld [vmem:[%s3904_s14 + $0x4e0] sm:$0xff] }
 0x1e7   : > { %v3119_v36 = vmax.f32 %v2863_v27, 0.0  ;;  %v2864_v37 = vadd.f32 %v3931_v15, %v2607_v28  ;;  %v2096_v38 = vmax.f32 %v1840_v29, 0.0  ;;  %v1070_v39 = vmax.f32 %v814_v30, 0.0 }
 0x1e8   : > { %v2608_v40 = vadd.f32 %v2352_v31, %v1325_v24  ;;  %v1841_v41 = vadd.f32 %v3925_v11, %v1584_v33  ;;  %v815_v42 = vadd.f32 %v3913_v2, %v558_v34  ;;  %v1585_v43 = vmul.f32 %v3919_v6, %v301_v22 }
 0x1e9   : > { %3375 = vst [vmem:[%s3972_s29 + $0x490] sm:$0xff] %v3119_v36  ;;  %v3120_v45 = vmax.f32 %v2864_v37, 0.0  ;;  %v2353_v46 = vmul.f32 %v3927_v12, %v2096_v38  ;;  %v1327_v47 = vmul.f32 %v3917_v5, %v1070_v39  ;;  %v559_v48 = vmul.f32 %v3911_v1, %v302_v35 }
 0x1ea   : > { %v2865_v49 = vadd.f32 %v3931_v15, %v2608_v40  ;;  %v2097_v50 = vmax.f32 %v1841_v41, 0.0  ;;  %v1071_v51 = vmax.f32 %v815_v42, 0.0  ;;  %v1842_v52 = vadd.f32 %v3925_v11, %v1585_v43 }
 0x1eb   : > { %3376 = vst [vmem:[%s3972_s29 + $0x498] sm:$0xff] %v3120_v45  ;;  %v2609_v53 = vadd.f32 %v2353_v46, %v1326_v32  ;;  %v816_v54 = vadd.f32 %v3913_v2, %v559_v48  ;;  %v1586_v55 = vmul.f32 %v3919_v6, %v302_v35  ;;  %v560_v56 = vmul.f32 %v3911_v1, %v303_v44  ;;  %v307_v35 = vld [vmem:[%s3904_s14 + $0x4e8] sm:$0xff]  ;;  %v308_v48 = vld [vmem:[%s3904_s14 + $0x4f0] sm:$0xff] }
 0x1ec   : > { %v3121_v58 = vmax.f32 %v2865_v49, 0.0  ;;  %v2354_v59 = vmul.f32 %v3927_v12, %v2097_v50  ;;  %v1328_v60 = vmul.f32 %v3917_v5, %v1071_v51  ;;  %v2098_v61 = vmax.f32 %v1842_v52, 0.0 }
 0x1ed   : > { %v2866_v62 = vadd.f32 %v3931_v15, %v2609_v53  ;;  %v1072_v63 = vmax.f32 %v816_v54, 0.0  ;;  %v1843_v0 = vadd.f32 %v3925_v11, %v1586_v55  ;;  %v817_v3 = vadd.f32 %v3913_v2, %v560_v56 }
 0x1ee   : > { %3377 = vst [vmem:[%s3972_s29 + $0x4a0] sm:$0xff] %v3121_v58  ;;  %v2610_v4 = vadd.f32 %v2354_v59, %v1327_v47  ;;  %v2355_v7 = vmul.f32 %v3927_v12, %v2098_v61  ;;  %v1587_v8 = vmul.f32 %v3919_v6, %v303_v44  ;;  %v561_v9 = vmul.f32 %v3911_v1, %v304_v57  ;;  %v309_v61 = vld [vmem:[%s3904_s14 + $0x4f8] sm:$0xff] }
 0x1ef   : > { %v3122_v13 = vmax.f32 %v2866_v62, 0.0  ;;  %v1329_v14 = vmul.f32 %v3917_v5, %v1072_v63  ;;  %v2099_v16 = vmax.f32 %v1843_v0, 0.0  ;;  %v1073_v17 = vmax.f32 %v817_v3, 0.0 }
 0x1f0   : > { %v2867_v18 = vadd.f32 %v3931_v15, %v2610_v4  ;;  %v2611_v19 = vadd.f32 %v2355_v7, %v1328_v60  ;;  %v1844_v20 = vadd.f32 %v3925_v11, %v1587_v8  ;;  %v818_v21 = vadd.f32 %v3913_v2, %v561_v9 }
 0x1f1   : > { %3378 = vst [vmem:[%s3972_s29 + $0x4a8] sm:$0xff] %v3122_v13  ;;  %v2356_v22 = vmul.f32 %v3927_v12, %v2099_v16  ;;  %v1330_v23 = vmul.f32 %v3917_v5, %v1073_v17  ;;  %v1588_v24 = vmul.f32 %v3919_v6, %v304_v57  ;;  %v562_v25 = vmul.f32 %v3911_v1, %v305_v10  ;;  %v310_v17 = vld [vmem:[%s3904_s14 + $0x500] sm:$0xff] }
 0x1f2   : > { %v3123_v27 = vmax.f32 %v2867_v18, 0.0  ;;  %v2868_v28 = vadd.f32 %v3931_v15, %v2611_v19  ;;  %v2100_v29 = vmax.f32 %v1844_v20, 0.0  ;;  %v1074_v30 = vmax.f32 %v818_v21, 0.0 }
 0x1f3   : > { %v2612_v31 = vadd.f32 %v2356_v22, %v1329_v14  ;;  %v1845_v32 = vadd.f32 %v3925_v11, %v1588_v24  ;;  %v819_v33 = vadd.f32 %v3913_v2, %v562_v25  ;;  %v1589_v34 = vmul.f32 %v3919_v6, %v305_v10 }
 0x1f4   : > { %3379 = vst [vmem:[%s3972_s29 + $0x4b0] sm:$0xff] %v3123_v27  ;;  %v3124_v36 = vmax.f32 %v2868_v28, 0.0  ;;  %v2357_v37 = vmul.f32 %v3927_v12, %v2100_v29  ;;  %v1331_v38 = vmul.f32 %v3917_v5, %v1074_v30  ;;  %v563_v39 = vmul.f32 %v3911_v1, %v306_v26 }
 0x1f5   : > { %v2869_v40 = vadd.f32 %v3931_v15, %v2612_v31  ;;  %v2101_v41 = vmax.f32 %v1845_v32, 0.0  ;;  %v1075_v42 = vmax.f32 %v819_v33, 0.0  ;;  %v1846_v43 = vadd.f32 %v3925_v11, %v1589_v34 }
 0x1f6   : > { %3380 = vst [vmem:[%s3972_s29 + $0x4b8] sm:$0xff] %v3124_v36  ;;  %v2613_v44 = vadd.f32 %v2357_v37, %v1330_v23  ;;  %v820_v45 = vadd.f32 %v3913_v2, %v563_v39  ;;  %v1590_v46 = vmul.f32 %v3919_v6, %v306_v26  ;;  %v564_v47 = vmul.f32 %v3911_v1, %v307_v35  ;;  %v311_v26 = vld [vmem:[%s3904_s14 + $0x508] sm:$0xff]  ;;  %v312_v39 = vld [vmem:[%s3904_s14 + $0x510] sm:$0xff] }
 0x1f7   : > { %v3125_v49 = vmax.f32 %v2869_v40, 0.0  ;;  %v2358_v50 = vmul.f32 %v3927_v12, %v2101_v41  ;;  %v1332_v51 = vmul.f32 %v3917_v5, %v1075_v42  ;;  %v2102_v52 = vmax.f32 %v1846_v43, 0.0 }
 0x1f8   : > { %v2870_v53 = vadd.f32 %v3931_v15, %v2613_v44  ;;  %v1076_v54 = vmax.f32 %v820_v45, 0.0  ;;  %v1847_v55 = vadd.f32 %v3925_v11, %v1590_v46  ;;  %v821_v56 = vadd.f32 %v3913_v2, %v564_v47 }
 0x1f9   : > { %3381 = vst [vmem:[%s3972_s29 + $0x4c0] sm:$0xff] %v3125_v49  ;;  %v2614_v57 = vadd.f32 %v2358_v50, %v1331_v38  ;;  %v2359_v58 = vmul.f32 %v3927_v12, %v2102_v52  ;;  %v1591_v59 = vmul.f32 %v3919_v6, %v307_v35  ;;  %v565_v60 = vmul.f32 %v3911_v1, %v308_v48  ;;  %v313_v52 = vld [vmem:[%s3904_s14 + $0x518] sm:$0xff] }
 0x1fa   : > { %v3126_v62 = vmax.f32 %v2870_v53, 0.0  ;;  %v1333_v63 = vmul.f32 %v3917_v5, %v1076_v54  ;;  %v2103_v0 = vmax.f32 %v1847_v55, 0.0  ;;  %v1077_v3 = vmax.f32 %v821_v56, 0.0 }
 0x1fb   : > { %v2871_v4 = vadd.f32 %v3931_v15, %v2614_v57  ;;  %v2615_v7 = vadd.f32 %v2359_v58, %v1332_v51  ;;  %v1848_v8 = vadd.f32 %v3925_v11, %v1591_v59  ;;  %v822_v9 = vadd.f32 %v3913_v2, %v565_v60 }
 0x1fc   : > { %3382 = vst [vmem:[%s3972_s29 + $0x4c8] sm:$0xff] %v3126_v62  ;;  %v2360_v10 = vmul.f32 %v3927_v12, %v2103_v0  ;;  %v1334_v13 = vmul.f32 %v3917_v5, %v1077_v3  ;;  %v1592_v14 = vmul.f32 %v3919_v6, %v308_v48  ;;  %v566_v16 = vmul.f32 %v3911_v1, %v309_v61  ;;  %v314_v3 = vld [vmem:[%s3904_s14 + $0x520] sm:$0xff] }
 0x1fd   : > { %v3127_v18 = vmax.f32 %v2871_v4, 0.0  ;;  %v2872_v19 = vadd.f32 %v3931_v15, %v2615_v7  ;;  %v2104_v20 = vmax.f32 %v1848_v8, 0.0  ;;  %v1078_v21 = vmax.f32 %v822_v9, 0.0 }
 0x1fe   : > { %v2616_v22 = vadd.f32 %v2360_v10, %v1333_v63  ;;  %v1849_v23 = vadd.f32 %v3925_v11, %v1592_v14  ;;  %v823_v24 = vadd.f32 %v3913_v2, %v566_v16  ;;  %v1593_v25 = vmul.f32 %v3919_v6, %v309_v61 }
 0x1ff   : > { %3383 = vst [vmem:[%s3972_s29 + $0x4d0] sm:$0xff] %v3127_v18  ;;  %v3128_v27 = vmax.f32 %v2872_v19, 0.0  ;;  %v2361_v28 = vmul.f32 %v3927_v12, %v2104_v20  ;;  %v1335_v29 = vmul.f32 %v3917_v5, %v1078_v21  ;;  %v567_v30 = vmul.f32 %v3911_v1, %v310_v17 }
 0x200   : > { %v2873_v31 = vadd.f32 %v3931_v15, %v2616_v22  ;;  %v2105_v32 = vmax.f32 %v1849_v23, 0.0  ;;  %v1079_v33 = vmax.f32 %v823_v24, 0.0  ;;  %v1850_v34 = vadd.f32 %v3925_v11, %v1593_v25 }
 0x201   : > { %3384 = vst [vmem:[%s3972_s29 + $0x4d8] sm:$0xff] %v3128_v27  ;;  %v2617_v35 = vadd.f32 %v2361_v28, %v1334_v13  ;;  %v824_v36 = vadd.f32 %v3913_v2, %v567_v30  ;;  %v1594_v37 = vmul.f32 %v3919_v6, %v310_v17  ;;  %v568_v38 = vmul.f32 %v3911_v1, %v311_v26  ;;  %v315_v17 = vld [vmem:[%s3904_s14 + $0x528] sm:$0xff]  ;;  %v316_v30 = vld [vmem:[%s3904_s14 + $0x530] sm:$0xff] }
 0x202   : > { %v3129_v40 = vmax.f32 %v2873_v31, 0.0  ;;  %v2362_v41 = vmul.f32 %v3927_v12, %v2105_v32  ;;  %v1336_v42 = vmul.f32 %v3917_v5, %v1079_v33  ;;  %v2106_v43 = vmax.f32 %v1850_v34, 0.0 }
 0x203   : > { %v2874_v44 = vadd.f32 %v3931_v15, %v2617_v35  ;;  %v1080_v45 = vmax.f32 %v824_v36, 0.0  ;;  %v1851_v46 = vadd.f32 %v3925_v11, %v1594_v37  ;;  %v825_v47 = vadd.f32 %v3913_v2, %v568_v38 }
 0x204   : > { %3385 = vst [vmem:[%s3972_s29 + $0x4e0] sm:$0xff] %v3129_v40  ;;  %v2618_v48 = vadd.f32 %v2362_v41, %v1335_v29  ;;  %v2363_v49 = vmul.f32 %v3927_v12, %v2106_v43  ;;  %v1595_v50 = vmul.f32 %v3919_v6, %v311_v26  ;;  %v569_v51 = vmul.f32 %v3911_v1, %v312_v39  ;;  %v317_v43 = vld [vmem:[%s3904_s14 + $0x538] sm:$0xff] }
 0x205   : > { %v3130_v53 = vmax.f32 %v2874_v44, 0.0  ;;  %v1337_v54 = vmul.f32 %v3917_v5, %v1080_v45  ;;  %v2107_v55 = vmax.f32 %v1851_v46, 0.0  ;;  %v1081_v56 = vmax.f32 %v825_v47, 0.0 }
 0x206   : > { %v2875_v57 = vadd.f32 %v3931_v15, %v2618_v48  ;;  %v2619_v58 = vadd.f32 %v2363_v49, %v1336_v42  ;;  %v1852_v59 = vadd.f32 %v3925_v11, %v1595_v50  ;;  %v826_v60 = vadd.f32 %v3913_v2, %v569_v51 }
 0x207   : > { %3386 = vst [vmem:[%s3972_s29 + $0x4e8] sm:$0xff] %v3130_v53  ;;  %v2364_v61 = vmul.f32 %v3927_v12, %v2107_v55  ;;  %v1338_v62 = vmul.f32 %v3917_v5, %v1081_v56  ;;  %v1596_v63 = vmul.f32 %v3919_v6, %v312_v39  ;;  %v570_v0 = vmul.f32 %v3911_v1, %v313_v52  ;;  %v318_v56 = vld [vmem:[%s3904_s14 + $0x540] sm:$0xff] }
 0x208   : > { %v3131_v4 = vmax.f32 %v2875_v57, 0.0  ;;  %v2876_v7 = vadd.f32 %v3931_v15, %v2619_v58  ;;  %v2108_v8 = vmax.f32 %v1852_v59, 0.0  ;;  %v1082_v9 = vmax.f32 %v826_v60, 0.0 }
 0x209   : > { %v2620_v10 = vadd.f32 %v2364_v61, %v1337_v54  ;;  %v1853_v13 = vadd.f32 %v3925_v11, %v1596_v63  ;;  %v827_v14 = vadd.f32 %v3913_v2, %v570_v0  ;;  %v1597_v16 = vmul.f32 %v3919_v6, %v313_v52 }
 0x20a   : > { %3387 = vst [vmem:[%s3972_s29 + $0x4f0] sm:$0xff] %v3131_v4  ;;  %v3132_v18 = vmax.f32 %v2876_v7, 0.0  ;;  %v2365_v19 = vmul.f32 %v3927_v12, %v2108_v8  ;;  %v1339_v20 = vmul.f32 %v3917_v5, %v1082_v9  ;;  %v571_v21 = vmul.f32 %v3911_v1, %v314_v3 }
 0x20b   : > { %v2877_v22 = vadd.f32 %v3931_v15, %v2620_v10  ;;  %v2109_v23 = vmax.f32 %v1853_v13, 0.0  ;;  %v1083_v24 = vmax.f32 %v827_v14, 0.0  ;;  %v1854_v25 = vadd.f32 %v3925_v11, %v1597_v16 }
 0x20c   : > { %3388 = vst [vmem:[%s3972_s29 + $0x4f8] sm:$0xff] %v3132_v18  ;;  %v2621_v26 = vadd.f32 %v2365_v19, %v1338_v62  ;;  %v828_v27 = vadd.f32 %v3913_v2, %v571_v21  ;;  %v1598_v28 = vmul.f32 %v3919_v6, %v314_v3  ;;  %v572_v29 = vmul.f32 %v3911_v1, %v315_v17  ;;  %v319_v3 = vld [vmem:[%s3904_s14 + $0x548] sm:$0xff]  ;;  %v320_v21 = vld [vmem:[%s3904_s14 + $0x550] sm:$0xff] }
 0x20d   : > { %v3133_v31 = vmax.f32 %v2877_v22, 0.0  ;;  %v2366_v32 = vmul.f32 %v3927_v12, %v2109_v23  ;;  %v1340_v33 = vmul.f32 %v3917_v5, %v1083_v24  ;;  %v2110_v34 = vmax.f32 %v1854_v25, 0.0 }
 0x20e   : > { %v2878_v35 = vadd.f32 %v3931_v15, %v2621_v26  ;;  %v1084_v36 = vmax.f32 %v828_v27, 0.0  ;;  %v1855_v37 = vadd.f32 %v3925_v11, %v1598_v28  ;;  %v829_v38 = vadd.f32 %v3913_v2, %v572_v29 }
 0x20f   : > { %3389 = vst [vmem:[%s3972_s29 + $0x500] sm:$0xff] %v3133_v31  ;;  %v2622_v39 = vadd.f32 %v2366_v32, %v1339_v20  ;;  %v2367_v40 = vmul.f32 %v3927_v12, %v2110_v34  ;;  %v1599_v41 = vmul.f32 %v3919_v6, %v315_v17  ;;  %v573_v42 = vmul.f32 %v3911_v1, %v316_v30  ;;  %v321_v34 = vld [vmem:[%s3904_s14 + $0x558] sm:$0xff] }
 0x210   : > { %v3134_v44 = vmax.f32 %v2878_v35, 0.0  ;;  %v1341_v45 = vmul.f32 %v3917_v5, %v1084_v36  ;;  %v2111_v46 = vmax.f32 %v1855_v37, 0.0  ;;  %v1085_v47 = vmax.f32 %v829_v38, 0.0 }
 0x211   : > { %v2879_v48 = vadd.f32 %v3931_v15, %v2622_v39  ;;  %v2623_v49 = vadd.f32 %v2367_v40, %v1340_v33  ;;  %v1856_v50 = vadd.f32 %v3925_v11, %v1599_v41  ;;  %v830_v51 = vadd.f32 %v3913_v2, %v573_v42 }
 0x212   : > { %3390 = vst [vmem:[%s3972_s29 + $0x508] sm:$0xff] %v3134_v44  ;;  %v2368_v52 = vmul.f32 %v3927_v12, %v2111_v46  ;;  %v1342_v53 = vmul.f32 %v3917_v5, %v1085_v47  ;;  %v1600_v54 = vmul.f32 %v3919_v6, %v316_v30  ;;  %v574_v55 = vmul.f32 %v3911_v1, %v317_v43  ;;  %v322_v47 = vld [vmem:[%s3904_s14 + $0x560] sm:$0xff] }
 0x213   : > { %v3135_v57 = vmax.f32 %v2879_v48, 0.0  ;;  %v2880_v58 = vadd.f32 %v3931_v15, %v2623_v49  ;;  %v2112_v59 = vmax.f32 %v1856_v50, 0.0  ;;  %v1086_v60 = vmax.f32 %v830_v51, 0.0 }
 0x214   : > { %v2624_v61 = vadd.f32 %v2368_v52, %v1341_v45  ;;  %v1857_v62 = vadd.f32 %v3925_v11, %v1600_v54  ;;  %v831_v63 = vadd.f32 %v3913_v2, %v574_v55  ;;  %v1601_v0 = vmul.f32 %v3919_v6, %v317_v43 }
 0x215   : > { %3391 = vst [vmem:[%s3972_s29 + $0x510] sm:$0xff] %v3135_v57  ;;  %v3136_v4 = vmax.f32 %v2880_v58, 0.0  ;;  %v2369_v7 = vmul.f32 %v3927_v12, %v2112_v59  ;;  %v1343_v8 = vmul.f32 %v3917_v5, %v1086_v60  ;;  %v575_v9 = vmul.f32 %v3911_v1, %v318_v56 }
 0x216   : > { %v2881_v10 = vadd.f32 %v3931_v15, %v2624_v61  ;;  %v2113_v13 = vmax.f32 %v1857_v62, 0.0  ;;  %v1087_v14 = vmax.f32 %v831_v63, 0.0  ;;  %v1858_v16 = vadd.f32 %v3925_v11, %v1601_v0 }
 0x217   : > { %3392 = vst [vmem:[%s3972_s29 + $0x518] sm:$0xff] %v3136_v4  ;;  %v2625_v17 = vadd.f32 %v2369_v7, %v1342_v53  ;;  %v832_v18 = vadd.f32 %v3913_v2, %v575_v9  ;;  %v1602_v19 = vmul.f32 %v3919_v6, %v318_v56  ;;  %v576_v20 = vmul.f32 %v3911_v1, %v319_v3  ;;  %v323_v56 = vld [vmem:[%s3904_s14 + $0x568] sm:$0xff]  ;;  %v324_v9 = vld [vmem:[%s3904_s14 + $0x570] sm:$0xff] }
 0x218   : > { %v3137_v22 = vmax.f32 %v2881_v10, 0.0  ;;  %v2370_v23 = vmul.f32 %v3927_v12, %v2113_v13  ;;  %v1344_v24 = vmul.f32 %v3917_v5, %v1087_v14  ;;  %v2114_v25 = vmax.f32 %v1858_v16, 0.0 }
 0x219   : > { %v2882_v26 = vadd.f32 %v3931_v15, %v2625_v17  ;;  %v1088_v27 = vmax.f32 %v832_v18, 0.0  ;;  %v1859_v28 = vadd.f32 %v3925_v11, %v1602_v19  ;;  %v833_v29 = vadd.f32 %v3913_v2, %v576_v20 }
 0x21a   : > { %3393 = vst [vmem:[%s3972_s29 + $0x520] sm:$0xff] %v3137_v22  ;;  %v2626_v30 = vadd.f32 %v2370_v23, %v1343_v8  ;;  %v2371_v31 = vmul.f32 %v3927_v12, %v2114_v25  ;;  %v1603_v32 = vmul.f32 %v3919_v6, %v319_v3  ;;  %v577_v33 = vmul.f32 %v3911_v1, %v320_v21  ;;  %v325_v25 = vld [vmem:[%s3904_s14 + $0x578] sm:$0xff] }
 0x21b   : > { %v3138_v35 = vmax.f32 %v2882_v26, 0.0  ;;  %v1345_v36 = vmul.f32 %v3917_v5, %v1088_v27  ;;  %v2115_v37 = vmax.f32 %v1859_v28, 0.0  ;;  %v1089_v38 = vmax.f32 %v833_v29, 0.0 }
 0x21c   : > { %v2883_v39 = vadd.f32 %v3931_v15, %v2626_v30  ;;  %v2627_v40 = vadd.f32 %v2371_v31, %v1344_v24  ;;  %v1860_v41 = vadd.f32 %v3925_v11, %v1603_v32  ;;  %v834_v42 = vadd.f32 %v3913_v2, %v577_v33 }
 0x21d   : > { %3394 = vst [vmem:[%s3972_s29 + $0x528] sm:$0xff] %v3138_v35  ;;  %v2372_v43 = vmul.f32 %v3927_v12, %v2115_v37  ;;  %v1346_v44 = vmul.f32 %v3917_v5, %v1089_v38  ;;  %v1604_v45 = vmul.f32 %v3919_v6, %v320_v21  ;;  %v578_v46 = vmul.f32 %v3911_v1, %v321_v34  ;;  %v326_v38 = vld [vmem:[%s3904_s14 + $0x580] sm:$0xff] }
 0x21e   : > { %v3139_v48 = vmax.f32 %v2883_v39, 0.0  ;;  %v2884_v49 = vadd.f32 %v3931_v15, %v2627_v40  ;;  %v2116_v50 = vmax.f32 %v1860_v41, 0.0  ;;  %v1090_v51 = vmax.f32 %v834_v42, 0.0 }
 0x21f   : > { %v2628_v52 = vadd.f32 %v2372_v43, %v1345_v36  ;;  %v1861_v53 = vadd.f32 %v3925_v11, %v1604_v45  ;;  %v835_v54 = vadd.f32 %v3913_v2, %v578_v46  ;;  %v1605_v55 = vmul.f32 %v3919_v6, %v321_v34 }
 0x220   : > { %3395 = vst [vmem:[%s3972_s29 + $0x530] sm:$0xff] %v3139_v48  ;;  %v3140_v57 = vmax.f32 %v2884_v49, 0.0  ;;  %v2373_v58 = vmul.f32 %v3927_v12, %v2116_v50  ;;  %v1347_v59 = vmul.f32 %v3917_v5, %v1090_v51  ;;  %v579_v60 = vmul.f32 %v3911_v1, %v322_v47 }
 0x221   : > { %v2885_v61 = vadd.f32 %v3931_v15, %v2628_v52  ;;  %v2117_v62 = vmax.f32 %v1861_v53, 0.0  ;;  %v1091_v63 = vmax.f32 %v835_v54, 0.0  ;;  %v1862_v0 = vadd.f32 %v3925_v11, %v1605_v55 }
 0x222   : > { %3396 = vst [vmem:[%s3972_s29 + $0x538] sm:$0xff] %v3140_v57  ;;  %v2629_v3 = vadd.f32 %v2373_v58, %v1346_v44  ;;  %v836_v4 = vadd.f32 %v3913_v2, %v579_v60  ;;  %v1606_v7 = vmul.f32 %v3919_v6, %v322_v47  ;;  %v580_v8 = vmul.f32 %v3911_v1, %v323_v56  ;;  %v327_v47 = vld [vmem:[%s3904_s14 + $0x588] sm:$0xff]  ;;  %v328_v60 = vld [vmem:[%s3904_s14 + $0x590] sm:$0xff] }
 0x223   : > { %v3141_v10 = vmax.f32 %v2885_v61, 0.0  ;;  %v2374_v13 = vmul.f32 %v3927_v12, %v2117_v62  ;;  %v1348_v14 = vmul.f32 %v3917_v5, %v1091_v63  ;;  %v2118_v16 = vmax.f32 %v1862_v0, 0.0 }
 0x224   : > { %v2886_v17 = vadd.f32 %v3931_v15, %v2629_v3  ;;  %v1092_v18 = vmax.f32 %v836_v4, 0.0  ;;  %v1863_v19 = vadd.f32 %v3925_v11, %v1606_v7  ;;  %v837_v20 = vadd.f32 %v3913_v2, %v580_v8 }
 0x225   : > { %3397 = vst [vmem:[%s3972_s29 + $0x540] sm:$0xff] %v3141_v10  ;;  %v2630_v21 = vadd.f32 %v2374_v13, %v1347_v59  ;;  %v2375_v22 = vmul.f32 %v3927_v12, %v2118_v16  ;;  %v1607_v23 = vmul.f32 %v3919_v6, %v323_v56  ;;  %v581_v24 = vmul.f32 %v3911_v1, %v324_v9  ;;  %v329_v16 = vld [vmem:[%s3904_s14 + $0x598] sm:$0xff] }
 0x226   : > { %v3142_v26 = vmax.f32 %v2886_v17, 0.0  ;;  %v1349_v27 = vmul.f32 %v3917_v5, %v1092_v18  ;;  %v2119_v28 = vmax.f32 %v1863_v19, 0.0  ;;  %v1093_v29 = vmax.f32 %v837_v20, 0.0 }
 0x227   : > { %v2887_v30 = vadd.f32 %v3931_v15, %v2630_v21  ;;  %v2631_v31 = vadd.f32 %v2375_v22, %v1348_v14  ;;  %v1864_v32 = vadd.f32 %v3925_v11, %v1607_v23  ;;  %v838_v33 = vadd.f32 %v3913_v2, %v581_v24 }
 0x228   : > { %3398 = vst [vmem:[%s3972_s29 + $0x548] sm:$0xff] %v3142_v26  ;;  %v2376_v34 = vmul.f32 %v3927_v12, %v2119_v28  ;;  %v1350_v35 = vmul.f32 %v3917_v5, %v1093_v29  ;;  %v1608_v36 = vmul.f32 %v3919_v6, %v324_v9  ;;  %v582_v37 = vmul.f32 %v3911_v1, %v325_v25  ;;  %v330_v29 = vld [vmem:[%s3904_s14 + $0x5a0] sm:$0xff] }
 0x229   : > { %v3143_v39 = vmax.f32 %v2887_v30, 0.0  ;;  %v2888_v40 = vadd.f32 %v3931_v15, %v2631_v31  ;;  %v2120_v41 = vmax.f32 %v1864_v32, 0.0  ;;  %v1094_v42 = vmax.f32 %v838_v33, 0.0 }
 0x22a   : > { %v2632_v43 = vadd.f32 %v2376_v34, %v1349_v27  ;;  %v1865_v44 = vadd.f32 %v3925_v11, %v1608_v36  ;;  %v839_v45 = vadd.f32 %v3913_v2, %v582_v37  ;;  %v1609_v46 = vmul.f32 %v3919_v6, %v325_v25 }
 0x22b   : > { %3399 = vst [vmem:[%s3972_s29 + $0x550] sm:$0xff] %v3143_v39  ;;  %v3144_v48 = vmax.f32 %v2888_v40, 0.0  ;;  %v2377_v49 = vmul.f32 %v3927_v12, %v2120_v41  ;;  %v1351_v50 = vmul.f32 %v3917_v5, %v1094_v42  ;;  %v583_v51 = vmul.f32 %v3911_v1, %v326_v38 }
 0x22c   : > { %v2889_v52 = vadd.f32 %v3931_v15, %v2632_v43  ;;  %v2121_v53 = vmax.f32 %v1865_v44, 0.0  ;;  %v1095_v54 = vmax.f32 %v839_v45, 0.0  ;;  %v1866_v55 = vadd.f32 %v3925_v11, %v1609_v46 }
 0x22d   : > { %3400 = vst [vmem:[%s3972_s29 + $0x558] sm:$0xff] %v3144_v48  ;;  %v2633_v56 = vadd.f32 %v2377_v49, %v1350_v35  ;;  %v840_v57 = vadd.f32 %v3913_v2, %v583_v51  ;;  %v1610_v58 = vmul.f32 %v3919_v6, %v326_v38  ;;  %v584_v59 = vmul.f32 %v3911_v1, %v327_v47  ;;  %v331_v38 = vld [vmem:[%s3904_s14 + $0x5a8] sm:$0xff]  ;;  %v332_v51 = vld [vmem:[%s3904_s14 + $0x5b0] sm:$0xff] }
 0x22e   : > { %v3145_v61 = vmax.f32 %v2889_v52, 0.0  ;;  %v2378_v62 = vmul.f32 %v3927_v12, %v2121_v53  ;;  %v1352_v63 = vmul.f32 %v3917_v5, %v1095_v54  ;;  %v2122_v0 = vmax.f32 %v1866_v55, 0.0 }
 0x22f   : > { %v2890_v3 = vadd.f32 %v3931_v15, %v2633_v56  ;;  %v1096_v4 = vmax.f32 %v840_v57, 0.0  ;;  %v1867_v7 = vadd.f32 %v3925_v11, %v1610_v58  ;;  %v841_v8 = vadd.f32 %v3913_v2, %v584_v59 }
 0x230   : > { %3401 = vst [vmem:[%s3972_s29 + $0x560] sm:$0xff] %v3145_v61  ;;  %v2634_v9 = vadd.f32 %v2378_v62, %v1351_v50  ;;  %v2379_v10 = vmul.f32 %v3927_v12, %v2122_v0  ;;  %v1611_v13 = vmul.f32 %v3919_v6, %v327_v47  ;;  %v585_v14 = vmul.f32 %v3911_v1, %v328_v60  ;;  %v333_v0 = vld [vmem:[%s3904_s14 + $0x5b8] sm:$0xff] }
 0x231   : > { %v3146_v17 = vmax.f32 %v2890_v3, 0.0  ;;  %v1353_v18 = vmul.f32 %v3917_v5, %v1096_v4  ;;  %v2123_v19 = vmax.f32 %v1867_v7, 0.0  ;;  %v1097_v20 = vmax.f32 %v841_v8, 0.0 }
 0x232   : > { %v2891_v21 = vadd.f32 %v3931_v15, %v2634_v9  ;;  %v2635_v22 = vadd.f32 %v2379_v10, %v1352_v63  ;;  %v1868_v23 = vadd.f32 %v3925_v11, %v1611_v13  ;;  %v842_v24 = vadd.f32 %v3913_v2, %v585_v14 }
 0x233   : > { %3402 = vst [vmem:[%s3972_s29 + $0x568] sm:$0xff] %v3146_v17  ;;  %v2380_v25 = vmul.f32 %v3927_v12, %v2123_v19  ;;  %v1354_v26 = vmul.f32 %v3917_v5, %v1097_v20  ;;  %v1612_v27 = vmul.f32 %v3919_v6, %v328_v60  ;;  %v586_v28 = vmul.f32 %v3911_v1, %v329_v16  ;;  %v334_v20 = vld [vmem:[%s3904_s14 + $0x5c0] sm:$0xff] }
 0x234   : > { %v3147_v30 = vmax.f32 %v2891_v21, 0.0  ;;  %v2892_v31 = vadd.f32 %v3931_v15, %v2635_v22  ;;  %v2124_v32 = vmax.f32 %v1868_v23, 0.0  ;;  %v1098_v33 = vmax.f32 %v842_v24, 0.0 }
 0x235   : > { %v2636_v34 = vadd.f32 %v2380_v25, %v1353_v18  ;;  %v1869_v35 = vadd.f32 %v3925_v11, %v1612_v27  ;;  %v843_v36 = vadd.f32 %v3913_v2, %v586_v28  ;;  %v1613_v37 = vmul.f32 %v3919_v6, %v329_v16 }
 0x236   : > { %3403 = vst [vmem:[%s3972_s29 + $0x570] sm:$0xff] %v3147_v30  ;;  %v3148_v39 = vmax.f32 %v2892_v31, 0.0  ;;  %v2381_v40 = vmul.f32 %v3927_v12, %v2124_v32  ;;  %v1355_v41 = vmul.f32 %v3917_v5, %v1098_v33  ;;  %v587_v42 = vmul.f32 %v3911_v1, %v330_v29 }
 0x237   : > { %v2893_v43 = vadd.f32 %v3931_v15, %v2636_v34  ;;  %v2125_v44 = vmax.f32 %v1869_v35, 0.0  ;;  %v1099_v45 = vmax.f32 %v843_v36, 0.0  ;;  %v1870_v46 = vadd.f32 %v3925_v11, %v1613_v37 }
 0x238   : > { %3404 = vst [vmem:[%s3972_s29 + $0x578] sm:$0xff] %v3148_v39  ;;  %v2637_v47 = vadd.f32 %v2381_v40, %v1354_v26  ;;  %v844_v48 = vadd.f32 %v3913_v2, %v587_v42  ;;  %v1614_v49 = vmul.f32 %v3919_v6, %v330_v29  ;;  %v588_v50 = vmul.f32 %v3911_v1, %v331_v38  ;;  %v335_v29 = vld [vmem:[%s3904_s14 + $0x5c8] sm:$0xff]  ;;  %v336_v42 = vld [vmem:[%s3904_s14 + $0x5d0] sm:$0xff] }
 0x239   : > { %v3149_v52 = vmax.f32 %v2893_v43, 0.0  ;;  %v2382_v53 = vmul.f32 %v3927_v12, %v2125_v44  ;;  %v1356_v54 = vmul.f32 %v3917_v5, %v1099_v45  ;;  %v2126_v55 = vmax.f32 %v1870_v46, 0.0 }
 0x23a   : > { %v2894_v56 = vadd.f32 %v3931_v15, %v2637_v47  ;;  %v1100_v57 = vmax.f32 %v844_v48, 0.0  ;;  %v1871_v58 = vadd.f32 %v3925_v11, %v1614_v49  ;;  %v845_v59 = vadd.f32 %v3913_v2, %v588_v50 }
 0x23b   : > { %3405 = vst [vmem:[%s3972_s29 + $0x580] sm:$0xff] %v3149_v52  ;;  %v2638_v60 = vadd.f32 %v2382_v53, %v1355_v41  ;;  %v2383_v61 = vmul.f32 %v3927_v12, %v2126_v55  ;;  %v1615_v62 = vmul.f32 %v3919_v6, %v331_v38  ;;  %v589_v63 = vmul.f32 %v3911_v1, %v332_v51  ;;  %v337_v55 = vld [vmem:[%s3904_s14 + $0x5d8] sm:$0xff] }
 0x23c   : > { %v3150_v3 = vmax.f32 %v2894_v56, 0.0  ;;  %v1357_v4 = vmul.f32 %v3917_v5, %v1100_v57  ;;  %v2127_v7 = vmax.f32 %v1871_v58, 0.0  ;;  %v1101_v8 = vmax.f32 %v845_v59, 0.0 }
 0x23d   : > { %v2895_v9 = vadd.f32 %v3931_v15, %v2638_v60  ;;  %v2639_v10 = vadd.f32 %v2383_v61, %v1356_v54  ;;  %v1872_v13 = vadd.f32 %v3925_v11, %v1615_v62  ;;  %v846_v14 = vadd.f32 %v3913_v2, %v589_v63 }
 0x23e   : > { %3406 = vst [vmem:[%s3972_s29 + $0x588] sm:$0xff] %v3150_v3  ;;  %v2384_v16 = vmul.f32 %v3927_v12, %v2127_v7  ;;  %v1358_v17 = vmul.f32 %v3917_v5, %v1101_v8  ;;  %v1616_v18 = vmul.f32 %v3919_v6, %v332_v51  ;;  %v590_v19 = vmul.f32 %v3911_v1, %v333_v0  ;;  %v338_v8 = vld [vmem:[%s3904_s14 + $0x5e0] sm:$0xff] }
 0x23f   : > { %v3151_v21 = vmax.f32 %v2895_v9, 0.0  ;;  %v2896_v22 = vadd.f32 %v3931_v15, %v2639_v10  ;;  %v2128_v23 = vmax.f32 %v1872_v13, 0.0  ;;  %v1102_v24 = vmax.f32 %v846_v14, 0.0 }
 0x240   : > { %v2640_v25 = vadd.f32 %v2384_v16, %v1357_v4  ;;  %v1873_v26 = vadd.f32 %v3925_v11, %v1616_v18  ;;  %v847_v27 = vadd.f32 %v3913_v2, %v590_v19  ;;  %v1617_v28 = vmul.f32 %v3919_v6, %v333_v0 }
 0x241   : > { %3407 = vst [vmem:[%s3972_s29 + $0x590] sm:$0xff] %v3151_v21  ;;  %v3152_v30 = vmax.f32 %v2896_v22, 0.0  ;;  %v2385_v31 = vmul.f32 %v3927_v12, %v2128_v23  ;;  %v1359_v32 = vmul.f32 %v3917_v5, %v1102_v24  ;;  %v591_v33 = vmul.f32 %v3911_v1, %v334_v20 }
 0x242   : > { %v2897_v34 = vadd.f32 %v3931_v15, %v2640_v25  ;;  %v2129_v35 = vmax.f32 %v1873_v26, 0.0  ;;  %v1103_v36 = vmax.f32 %v847_v27, 0.0  ;;  %v1874_v37 = vadd.f32 %v3925_v11, %v1617_v28 }
 0x243   : > { %3408 = vst [vmem:[%s3972_s29 + $0x598] sm:$0xff] %v3152_v30  ;;  %v2641_v38 = vadd.f32 %v2385_v31, %v1358_v17  ;;  %v848_v39 = vadd.f32 %v3913_v2, %v591_v33  ;;  %v1618_v40 = vmul.f32 %v3919_v6, %v334_v20  ;;  %v592_v41 = vmul.f32 %v3911_v1, %v335_v29  ;;  %v339_v20 = vld [vmem:[%s3904_s14 + $0x5e8] sm:$0xff]  ;;  %v340_v33 = vld [vmem:[%s3904_s14 + $0x5f0] sm:$0xff] }
 0x244   : > { %v3153_v43 = vmax.f32 %v2897_v34, 0.0  ;;  %v2386_v44 = vmul.f32 %v3927_v12, %v2129_v35  ;;  %v1360_v45 = vmul.f32 %v3917_v5, %v1103_v36  ;;  %v2130_v46 = vmax.f32 %v1874_v37, 0.0 }
 0x245   : > { %v2898_v47 = vadd.f32 %v3931_v15, %v2641_v38  ;;  %v1104_v48 = vmax.f32 %v848_v39, 0.0  ;;  %v1875_v49 = vadd.f32 %v3925_v11, %v1618_v40  ;;  %v849_v50 = vadd.f32 %v3913_v2, %v592_v41 }
 0x246   : > { %3409 = vst [vmem:[%s3972_s29 + $0x5a0] sm:$0xff] %v3153_v43  ;;  %v2642_v51 = vadd.f32 %v2386_v44, %v1359_v32  ;;  %v2387_v52 = vmul.f32 %v3927_v12, %v2130_v46  ;;  %v1619_v53 = vmul.f32 %v3919_v6, %v335_v29  ;;  %v593_v54 = vmul.f32 %v3911_v1, %v336_v42  ;;  %v341_v46 = vld [vmem:[%s3904_s14 + $0x5f8] sm:$0xff] }
 0x247   : > { %v3154_v56 = vmax.f32 %v2898_v47, 0.0  ;;  %v1361_v57 = vmul.f32 %v3917_v5, %v1104_v48  ;;  %v2131_v58 = vmax.f32 %v1875_v49, 0.0  ;;  %v1105_v59 = vmax.f32 %v849_v50, 0.0 }
 0x248   : > { %v2899_v60 = vadd.f32 %v3931_v15, %v2642_v51  ;;  %v2643_v61 = vadd.f32 %v2387_v52, %v1360_v45  ;;  %v1876_v62 = vadd.f32 %v3925_v11, %v1619_v53  ;;  %v850_v63 = vadd.f32 %v3913_v2, %v593_v54 }
 0x249   : > { %3410 = vst [vmem:[%s3972_s29 + $0x5a8] sm:$0xff] %v3154_v56  ;;  %v2388_v0 = vmul.f32 %v3927_v12, %v2131_v58  ;;  %v1362_v3 = vmul.f32 %v3917_v5, %v1105_v59  ;;  %v1620_v4 = vmul.f32 %v3919_v6, %v336_v42  ;;  %v594_v7 = vmul.f32 %v3911_v1, %v337_v55  ;;  %v342_v59 = vld [vmem:[%s3904_s14 + $0x600] sm:$0xff] }
 0x24a   : > { %v3155_v9 = vmax.f32 %v2899_v60, 0.0  ;;  %v2900_v10 = vadd.f32 %v3931_v15, %v2643_v61  ;;  %v2132_v13 = vmax.f32 %v1876_v62, 0.0  ;;  %v1106_v14 = vmax.f32 %v850_v63, 0.0 }
 0x24b   : > { %v2644_v16 = vadd.f32 %v2388_v0, %v1361_v57  ;;  %v1877_v17 = vadd.f32 %v3925_v11, %v1620_v4  ;;  %v851_v18 = vadd.f32 %v3913_v2, %v594_v7  ;;  %v1621_v19 = vmul.f32 %v3919_v6, %v337_v55 }
 0x24c   : > { %3411 = vst [vmem:[%s3972_s29 + $0x5b0] sm:$0xff] %v3155_v9  ;;  %v3156_v21 = vmax.f32 %v2900_v10, 0.0  ;;  %v2389_v22 = vmul.f32 %v3927_v12, %v2132_v13  ;;  %v1363_v23 = vmul.f32 %v3917_v5, %v1106_v14  ;;  %v595_v24 = vmul.f32 %v3911_v1, %v338_v8 }
 0x24d   : > { %v2901_v25 = vadd.f32 %v3931_v15, %v2644_v16  ;;  %v2133_v26 = vmax.f32 %v1877_v17, 0.0  ;;  %v1107_v27 = vmax.f32 %v851_v18, 0.0  ;;  %v1878_v28 = vadd.f32 %v3925_v11, %v1621_v19 }
 0x24e   : > { %3412 = vst [vmem:[%s3972_s29 + $0x5b8] sm:$0xff] %v3156_v21  ;;  %v2645_v29 = vadd.f32 %v2389_v22, %v1362_v3  ;;  %v852_v30 = vadd.f32 %v3913_v2, %v595_v24  ;;  %v1622_v31 = vmul.f32 %v3919_v6, %v338_v8  ;;  %v596_v32 = vmul.f32 %v3911_v1, %v339_v20  ;;  %v343_v8 = vld [vmem:[%s3904_s14 + $0x608] sm:$0xff]  ;;  %v344_v24 = vld [vmem:[%s3904_s14 + $0x610] sm:$0xff] }
 0x24f   : > { %v3157_v34 = vmax.f32 %v2901_v25, 0.0  ;;  %v2390_v35 = vmul.f32 %v3927_v12, %v2133_v26  ;;  %v1364_v36 = vmul.f32 %v3917_v5, %v1107_v27  ;;  %v2134_v37 = vmax.f32 %v1878_v28, 0.0 }
 0x250   : > { %v2902_v38 = vadd.f32 %v3931_v15, %v2645_v29  ;;  %v1108_v39 = vmax.f32 %v852_v30, 0.0  ;;  %v1879_v40 = vadd.f32 %v3925_v11, %v1622_v31  ;;  %v853_v41 = vadd.f32 %v3913_v2, %v596_v32 }
 0x251   : > { %3413 = vst [vmem:[%s3972_s29 + $0x5c0] sm:$0xff] %v3157_v34  ;;  %v2646_v42 = vadd.f32 %v2390_v35, %v1363_v23  ;;  %v2391_v43 = vmul.f32 %v3927_v12, %v2134_v37  ;;  %v1623_v44 = vmul.f32 %v3919_v6, %v339_v20  ;;  %v597_v45 = vmul.f32 %v3911_v1, %v340_v33  ;;  %v345_v37 = vld [vmem:[%s3904_s14 + $0x618] sm:$0xff] }
 0x252   : > { %v3158_v47 = vmax.f32 %v2902_v38, 0.0  ;;  %v1365_v48 = vmul.f32 %v3917_v5, %v1108_v39  ;;  %v2135_v49 = vmax.f32 %v1879_v40, 0.0  ;;  %v1109_v50 = vmax.f32 %v853_v41, 0.0 }
 0x253   : > { %v2903_v51 = vadd.f32 %v3931_v15, %v2646_v42  ;;  %v2647_v52 = vadd.f32 %v2391_v43, %v1364_v36  ;;  %v1880_v53 = vadd.f32 %v3925_v11, %v1623_v44  ;;  %v854_v54 = vadd.f32 %v3913_v2, %v597_v45 }
 0x254   : > { %3414 = vst [vmem:[%s3972_s29 + $0x5c8] sm:$0xff] %v3158_v47  ;;  %v2392_v55 = vmul.f32 %v3927_v12, %v2135_v49  ;;  %v1366_v56 = vmul.f32 %v3917_v5, %v1109_v50  ;;  %v1624_v57 = vmul.f32 %v3919_v6, %v340_v33  ;;  %v598_v58 = vmul.f32 %v3911_v1, %v341_v46  ;;  %v346_v50 = vld [vmem:[%s3904_s14 + $0x620] sm:$0xff] }
 0x255   : > { %v3159_v60 = vmax.f32 %v2903_v51, 0.0  ;;  %v2904_v61 = vadd.f32 %v3931_v15, %v2647_v52  ;;  %v2136_v62 = vmax.f32 %v1880_v53, 0.0  ;;  %v1110_v63 = vmax.f32 %v854_v54, 0.0 }
 0x256   : > { %v2648_v0 = vadd.f32 %v2392_v55, %v1365_v48  ;;  %v1881_v3 = vadd.f32 %v3925_v11, %v1624_v57  ;;  %v855_v4 = vadd.f32 %v3913_v2, %v598_v58  ;;  %v1625_v7 = vmul.f32 %v3919_v6, %v341_v46 }
 0x257   : > { %3415 = vst [vmem:[%s3972_s29 + $0x5d0] sm:$0xff] %v3159_v60  ;;  %v3160_v9 = vmax.f32 %v2904_v61, 0.0  ;;  %v2393_v10 = vmul.f32 %v3927_v12, %v2136_v62  ;;  %v1367_v13 = vmul.f32 %v3917_v5, %v1110_v63  ;;  %v599_v14 = vmul.f32 %v3911_v1, %v342_v59 }
 0x258   : > { %v2905_v16 = vadd.f32 %v3931_v15, %v2648_v0  ;;  %v2137_v17 = vmax.f32 %v1881_v3, 0.0  ;;  %v1111_v18 = vmax.f32 %v855_v4, 0.0  ;;  %v1882_v19 = vadd.f32 %v3925_v11, %v1625_v7 }
 0x259   : > { %3416 = vst [vmem:[%s3972_s29 + $0x5d8] sm:$0xff] %v3160_v9  ;;  %v2649_v20 = vadd.f32 %v2393_v10, %v1366_v56  ;;  %v856_v21 = vadd.f32 %v3913_v2, %v599_v14  ;;  %v1626_v22 = vmul.f32 %v3919_v6, %v342_v59  ;;  %v600_v23 = vmul.f32 %v3911_v1, %v343_v8  ;;  %v347_v59 = vld [vmem:[%s3904_s14 + $0x628] sm:$0xff]  ;;  %v348_v14 = vld [vmem:[%s3904_s14 + $0x630] sm:$0xff] }
 0x25a   : > { %v3161_v25 = vmax.f32 %v2905_v16, 0.0  ;;  %v2394_v26 = vmul.f32 %v3927_v12, %v2137_v17  ;;  %v1368_v27 = vmul.f32 %v3917_v5, %v1111_v18  ;;  %v2138_v28 = vmax.f32 %v1882_v19, 0.0 }
 0x25b   : > { %v2906_v29 = vadd.f32 %v3931_v15, %v2649_v20  ;;  %v1112_v30 = vmax.f32 %v856_v21, 0.0  ;;  %v1883_v31 = vadd.f32 %v3925_v11, %v1626_v22  ;;  %v857_v32 = vadd.f32 %v3913_v2, %v600_v23 }
 0x25c   : > { %3417 = vst [vmem:[%s3972_s29 + $0x5e0] sm:$0xff] %v3161_v25  ;;  %v2650_v33 = vadd.f32 %v2394_v26, %v1367_v13  ;;  %v2395_v34 = vmul.f32 %v3927_v12, %v2138_v28  ;;  %v1627_v35 = vmul.f32 %v3919_v6, %v343_v8  ;;  %v601_v36 = vmul.f32 %v3911_v1, %v344_v24  ;;  %v349_v28 = vld [vmem:[%s3904_s14 + $0x638] sm:$0xff] }
 0x25d   : > { %v3162_v38 = vmax.f32 %v2906_v29, 0.0  ;;  %v1369_v39 = vmul.f32 %v3917_v5, %v1112_v30  ;;  %v2139_v40 = vmax.f32 %v1883_v31, 0.0  ;;  %v1113_v41 = vmax.f32 %v857_v32, 0.0 }
 0x25e   : > { %v2907_v42 = vadd.f32 %v3931_v15, %v2650_v33  ;;  %v2651_v43 = vadd.f32 %v2395_v34, %v1368_v27  ;;  %v1884_v44 = vadd.f32 %v3925_v11, %v1627_v35  ;;  %v858_v45 = vadd.f32 %v3913_v2, %v601_v36 }
 0x25f   : > { %3418 = vst [vmem:[%s3972_s29 + $0x5e8] sm:$0xff] %v3162_v38  ;;  %v2396_v46 = vmul.f32 %v3927_v12, %v2139_v40  ;;  %v1370_v47 = vmul.f32 %v3917_v5, %v1113_v41  ;;  %v1628_v48 = vmul.f32 %v3919_v6, %v344_v24  ;;  %v602_v49 = vmul.f32 %v3911_v1, %v345_v37  ;;  %v350_v41 = vld [vmem:[%s3904_s14 + $0x640] sm:$0xff] }
 0x260   : > { %v3163_v51 = vmax.f32 %v2907_v42, 0.0  ;;  %v2908_v52 = vadd.f32 %v3931_v15, %v2651_v43  ;;  %v2140_v53 = vmax.f32 %v1884_v44, 0.0  ;;  %v1114_v54 = vmax.f32 %v858_v45, 0.0 }
 0x261   : > { %v2652_v55 = vadd.f32 %v2396_v46, %v1369_v39  ;;  %v1885_v56 = vadd.f32 %v3925_v11, %v1628_v48  ;;  %v859_v57 = vadd.f32 %v3913_v2, %v602_v49  ;;  %v1629_v58 = vmul.f32 %v3919_v6, %v345_v37 }
 0x262   : > { %3419 = vst [vmem:[%s3972_s29 + $0x5f0] sm:$0xff] %v3163_v51  ;;  %v3164_v60 = vmax.f32 %v2908_v52, 0.0  ;;  %v2397_v61 = vmul.f32 %v3927_v12, %v2140_v53  ;;  %v1371_v62 = vmul.f32 %v3917_v5, %v1114_v54  ;;  %v603_v63 = vmul.f32 %v3911_v1, %v346_v50 }
 0x263   : > { %v2909_v0 = vadd.f32 %v3931_v15, %v2652_v55  ;;  %v2141_v3 = vmax.f32 %v1885_v56, 0.0  ;;  %v1115_v4 = vmax.f32 %v859_v57, 0.0  ;;  %v1886_v7 = vadd.f32 %v3925_v11, %v1629_v58 }
 0x264   : > { %3420 = vst [vmem:[%s3972_s29 + $0x5f8] sm:$0xff] %v3164_v60  ;;  %v2653_v8 = vadd.f32 %v2397_v61, %v1370_v47  ;;  %v860_v9 = vadd.f32 %v3913_v2, %v603_v63  ;;  %v1630_v10 = vmul.f32 %v3919_v6, %v346_v50  ;;  %v604_v13 = vmul.f32 %v3911_v1, %v347_v59  ;;  %v351_v50 = vld [vmem:[%s3904_s14 + $0x648] sm:$0xff]  ;;  %v352_v63 = vld [vmem:[%s3904_s14 + $0x650] sm:$0xff] }
 0x265   : > { %v3165_v16 = vmax.f32 %v2909_v0, 0.0  ;;  %v2398_v17 = vmul.f32 %v3927_v12, %v2141_v3  ;;  %v1372_v18 = vmul.f32 %v3917_v5, %v1115_v4  ;;  %v2142_v19 = vmax.f32 %v1886_v7, 0.0 }
 0x266   : > { %v2910_v20 = vadd.f32 %v3931_v15, %v2653_v8  ;;  %v1116_v21 = vmax.f32 %v860_v9, 0.0  ;;  %v1887_v22 = vadd.f32 %v3925_v11, %v1630_v10  ;;  %v861_v23 = vadd.f32 %v3913_v2, %v604_v13 }
 0x267   : > { %3421 = vst [vmem:[%s3972_s29 + $0x600] sm:$0xff] %v3165_v16  ;;  %v2654_v24 = vadd.f32 %v2398_v17, %v1371_v62  ;;  %v2399_v25 = vmul.f32 %v3927_v12, %v2142_v19  ;;  %v1631_v26 = vmul.f32 %v3919_v6, %v347_v59  ;;  %v605_v27 = vmul.f32 %v3911_v1, %v348_v14  ;;  %v353_v19 = vld [vmem:[%s3904_s14 + $0x658] sm:$0xff] }
 0x268   : > { %v3166_v29 = vmax.f32 %v2910_v20, 0.0  ;;  %v1373_v30 = vmul.f32 %v3917_v5, %v1116_v21  ;;  %v2143_v31 = vmax.f32 %v1887_v22, 0.0  ;;  %v1117_v32 = vmax.f32 %v861_v23, 0.0 }
 0x269   : > { %v2911_v33 = vadd.f32 %v3931_v15, %v2654_v24  ;;  %v2655_v34 = vadd.f32 %v2399_v25, %v1372_v18  ;;  %v1888_v35 = vadd.f32 %v3925_v11, %v1631_v26  ;;  %v862_v36 = vadd.f32 %v3913_v2, %v605_v27 }
 0x26a   : > { %3422 = vst [vmem:[%s3972_s29 + $0x608] sm:$0xff] %v3166_v29  ;;  %v2400_v37 = vmul.f32 %v3927_v12, %v2143_v31  ;;  %v1374_v38 = vmul.f32 %v3917_v5, %v1117_v32  ;;  %v1632_v39 = vmul.f32 %v3919_v6, %v348_v14  ;;  %v606_v40 = vmul.f32 %v3911_v1, %v349_v28  ;;  %v354_v32 = vld [vmem:[%s3904_s14 + $0x660] sm:$0xff] }
 0x26b   : > { %v3167_v42 = vmax.f32 %v2911_v33, 0.0  ;;  %v2912_v43 = vadd.f32 %v3931_v15, %v2655_v34  ;;  %v2144_v44 = vmax.f32 %v1888_v35, 0.0  ;;  %v1118_v45 = vmax.f32 %v862_v36, 0.0 }
 0x26c   : > { %v2656_v46 = vadd.f32 %v2400_v37, %v1373_v30  ;;  %v1889_v47 = vadd.f32 %v3925_v11, %v1632_v39  ;;  %v863_v48 = vadd.f32 %v3913_v2, %v606_v40  ;;  %v1633_v49 = vmul.f32 %v3919_v6, %v349_v28 }
 0x26d   : > { %3423 = vst [vmem:[%s3972_s29 + $0x610] sm:$0xff] %v3167_v42  ;;  %v3168_v51 = vmax.f32 %v2912_v43, 0.0  ;;  %v2401_v52 = vmul.f32 %v3927_v12, %v2144_v44  ;;  %v1375_v53 = vmul.f32 %v3917_v5, %v1118_v45  ;;  %v607_v54 = vmul.f32 %v3911_v1, %v350_v41 }
 0x26e   : > { %v2913_v55 = vadd.f32 %v3931_v15, %v2656_v46  ;;  %v2145_v56 = vmax.f32 %v1889_v47, 0.0  ;;  %v1119_v57 = vmax.f32 %v863_v48, 0.0  ;;  %v1890_v58 = vadd.f32 %v3925_v11, %v1633_v49 }
 0x26f   : > { %3424 = vst [vmem:[%s3972_s29 + $0x618] sm:$0xff] %v3168_v51  ;;  %v2657_v59 = vadd.f32 %v2401_v52, %v1374_v38  ;;  %v864_v60 = vadd.f32 %v3913_v2, %v607_v54  ;;  %v1634_v61 = vmul.f32 %v3919_v6, %v350_v41  ;;  %v608_v62 = vmul.f32 %v3911_v1, %v351_v50  ;;  %v355_v41 = vld [vmem:[%s3904_s14 + $0x668] sm:$0xff]  ;;  %v356_v54 = vld [vmem:[%s3904_s14 + $0x670] sm:$0xff] }
 0x270   : > { %v3169_v0 = vmax.f32 %v2913_v55, 0.0  ;;  %v2402_v3 = vmul.f32 %v3927_v12, %v2145_v56  ;;  %v1376_v4 = vmul.f32 %v3917_v5, %v1119_v57  ;;  %v2146_v7 = vmax.f32 %v1890_v58, 0.0 }
 0x271   : > { %v2914_v8 = vadd.f32 %v3931_v15, %v2657_v59  ;;  %v1120_v9 = vmax.f32 %v864_v60, 0.0  ;;  %v1891_v10 = vadd.f32 %v3925_v11, %v1634_v61  ;;  %v865_v13 = vadd.f32 %v3913_v2, %v608_v62 }
 0x272   : > { %3425 = vst [vmem:[%s3972_s29 + $0x620] sm:$0xff] %v3169_v0  ;;  %v2658_v14 = vadd.f32 %v2402_v3, %v1375_v53  ;;  %v2403_v16 = vmul.f32 %v3927_v12, %v2146_v7  ;;  %v1635_v17 = vmul.f32 %v3919_v6, %v351_v50  ;;  %v609_v18 = vmul.f32 %v3911_v1, %v352_v63  ;;  %v357_v7 = vld [vmem:[%s3904_s14 + $0x678] sm:$0xff] }
 0x273   : > { %v3170_v20 = vmax.f32 %v2914_v8, 0.0  ;;  %v1377_v21 = vmul.f32 %v3917_v5, %v1120_v9  ;;  %v2147_v22 = vmax.f32 %v1891_v10, 0.0  ;;  %v1121_v23 = vmax.f32 %v865_v13, 0.0 }
 0x274   : > { %v2915_v24 = vadd.f32 %v3931_v15, %v2658_v14  ;;  %v2659_v25 = vadd.f32 %v2403_v16, %v1376_v4  ;;  %v1892_v26 = vadd.f32 %v3925_v11, %v1635_v17  ;;  %v866_v27 = vadd.f32 %v3913_v2, %v609_v18 }
 0x275   : > { %3426 = vst [vmem:[%s3972_s29 + $0x628] sm:$0xff] %v3170_v20  ;;  %v2404_v28 = vmul.f32 %v3927_v12, %v2147_v22  ;;  %v1378_v29 = vmul.f32 %v3917_v5, %v1121_v23  ;;  %v1636_v30 = vmul.f32 %v3919_v6, %v352_v63  ;;  %v610_v31 = vmul.f32 %v3911_v1, %v353_v19  ;;  %v358_v23 = vld [vmem:[%s3904_s14 + $0x680] sm:$0xff] }
 0x276   : > { %v3171_v33 = vmax.f32 %v2915_v24, 0.0  ;;  %v2916_v34 = vadd.f32 %v3931_v15, %v2659_v25  ;;  %v2148_v35 = vmax.f32 %v1892_v26, 0.0  ;;  %v1122_v36 = vmax.f32 %v866_v27, 0.0 }
 0x277   : > { %v2660_v37 = vadd.f32 %v2404_v28, %v1377_v21  ;;  %v1893_v38 = vadd.f32 %v3925_v11, %v1636_v30  ;;  %v867_v39 = vadd.f32 %v3913_v2, %v610_v31  ;;  %v1637_v40 = vmul.f32 %v3919_v6, %v353_v19 }
 0x278   : > { %3427 = vst [vmem:[%s3972_s29 + $0x630] sm:$0xff] %v3171_v33  ;;  %v3172_v42 = vmax.f32 %v2916_v34, 0.0  ;;  %v2405_v43 = vmul.f32 %v3927_v12, %v2148_v35  ;;  %v1379_v44 = vmul.f32 %v3917_v5, %v1122_v36  ;;  %v611_v45 = vmul.f32 %v3911_v1, %v354_v32 }
 0x279   : > { %v2917_v46 = vadd.f32 %v3931_v15, %v2660_v37  ;;  %v2149_v47 = vmax.f32 %v1893_v38, 0.0  ;;  %v1123_v48 = vmax.f32 %v867_v39, 0.0  ;;  %v1894_v49 = vadd.f32 %v3925_v11, %v1637_v40 }
 0x27a   : > { %3428 = vst [vmem:[%s3972_s29 + $0x638] sm:$0xff] %v3172_v42  ;;  %v2661_v50 = vadd.f32 %v2405_v43, %v1378_v29  ;;  %v868_v51 = vadd.f32 %v3913_v2, %v611_v45  ;;  %v1638_v52 = vmul.f32 %v3919_v6, %v354_v32  ;;  %v612_v53 = vmul.f32 %v3911_v1, %v355_v41  ;;  %v359_v32 = vld [vmem:[%s3904_s14 + $0x688] sm:$0xff]  ;;  %v360_v45 = vld [vmem:[%s3904_s14 + $0x690] sm:$0xff] }
 0x27b   : > { %v3173_v55 = vmax.f32 %v2917_v46, 0.0  ;;  %v2406_v56 = vmul.f32 %v3927_v12, %v2149_v47  ;;  %v1380_v57 = vmul.f32 %v3917_v5, %v1123_v48  ;;  %v2150_v58 = vmax.f32 %v1894_v49, 0.0 }
 0x27c   : > { %v2918_v59 = vadd.f32 %v3931_v15, %v2661_v50  ;;  %v1124_v60 = vmax.f32 %v868_v51, 0.0  ;;  %v1895_v61 = vadd.f32 %v3925_v11, %v1638_v52  ;;  %v869_v62 = vadd.f32 %v3913_v2, %v612_v53 }
 0x27d   : > { %3429 = vst [vmem:[%s3972_s29 + $0x640] sm:$0xff] %v3173_v55  ;;  %v2662_v63 = vadd.f32 %v2406_v56, %v1379_v44  ;;  %v2407_v0 = vmul.f32 %v3927_v12, %v2150_v58  ;;  %v1639_v3 = vmul.f32 %v3919_v6, %v355_v41  ;;  %v613_v4 = vmul.f32 %v3911_v1, %v356_v54  ;;  %v361_v58 = vld [vmem:[%s3904_s14 + $0x698] sm:$0xff] }
 0x27e   : > { %v3174_v8 = vmax.f32 %v2918_v59, 0.0  ;;  %v1381_v9 = vmul.f32 %v3917_v5, %v1124_v60  ;;  %v2151_v10 = vmax.f32 %v1895_v61, 0.0  ;;  %v1125_v13 = vmax.f32 %v869_v62, 0.0 }
 0x27f   : > { %v2919_v14 = vadd.f32 %v3931_v15, %v2662_v63  ;;  %v2663_v16 = vadd.f32 %v2407_v0, %v1380_v57  ;;  %v1896_v17 = vadd.f32 %v3925_v11, %v1639_v3  ;;  %v870_v18 = vadd.f32 %v3913_v2, %v613_v4 }
 0x280   : > { %3430 = vst [vmem:[%s3972_s29 + $0x648] sm:$0xff] %v3174_v8  ;;  %v2408_v19 = vmul.f32 %v3927_v12, %v2151_v10  ;;  %v1382_v20 = vmul.f32 %v3917_v5, %v1125_v13  ;;  %v1640_v21 = vmul.f32 %v3919_v6, %v356_v54  ;;  %v614_v22 = vmul.f32 %v3911_v1, %v357_v7  ;;  %v362_v13 = vld [vmem:[%s3904_s14 + $0x6a0] sm:$0xff] }
 0x281   : > { %v3175_v24 = vmax.f32 %v2919_v14, 0.0  ;;  %v2920_v25 = vadd.f32 %v3931_v15, %v2663_v16  ;;  %v2152_v26 = vmax.f32 %v1896_v17, 0.0  ;;  %v1126_v27 = vmax.f32 %v870_v18, 0.0 }
 0x282   : > { %v2664_v28 = vadd.f32 %v2408_v19, %v1381_v9  ;;  %v1897_v29 = vadd.f32 %v3925_v11, %v1640_v21  ;;  %v871_v30 = vadd.f32 %v3913_v2, %v614_v22  ;;  %v1641_v31 = vmul.f32 %v3919_v6, %v357_v7 }
 0x283   : > { %3431 = vst [vmem:[%s3972_s29 + $0x650] sm:$0xff] %v3175_v24  ;;  %v3176_v33 = vmax.f32 %v2920_v25, 0.0  ;;  %v2409_v34 = vmul.f32 %v3927_v12, %v2152_v26  ;;  %v1383_v35 = vmul.f32 %v3917_v5, %v1126_v27  ;;  %v615_v36 = vmul.f32 %v3911_v1, %v358_v23 }
 0x284   : > { %v2921_v37 = vadd.f32 %v3931_v15, %v2664_v28  ;;  %v2153_v38 = vmax.f32 %v1897_v29, 0.0  ;;  %v1127_v39 = vmax.f32 %v871_v30, 0.0  ;;  %v1898_v40 = vadd.f32 %v3925_v11, %v1641_v31 }
 0x285   : > { %3432 = vst [vmem:[%s3972_s29 + $0x658] sm:$0xff] %v3176_v33  ;;  %v2665_v41 = vadd.f32 %v2409_v34, %v1382_v20  ;;  %v872_v42 = vadd.f32 %v3913_v2, %v615_v36  ;;  %v1642_v43 = vmul.f32 %v3919_v6, %v358_v23  ;;  %v616_v44 = vmul.f32 %v3911_v1, %v359_v32  ;;  %v363_v23 = vld [vmem:[%s3904_s14 + $0x6a8] sm:$0xff]  ;;  %v364_v36 = vld [vmem:[%s3904_s14 + $0x6b0] sm:$0xff] }
 0x286   : > { %v3177_v46 = vmax.f32 %v2921_v37, 0.0  ;;  %v2410_v47 = vmul.f32 %v3927_v12, %v2153_v38  ;;  %v1384_v48 = vmul.f32 %v3917_v5, %v1127_v39  ;;  %v2154_v49 = vmax.f32 %v1898_v40, 0.0 }
 0x287   : > { %v2922_v50 = vadd.f32 %v3931_v15, %v2665_v41  ;;  %v1128_v51 = vmax.f32 %v872_v42, 0.0  ;;  %v1899_v52 = vadd.f32 %v3925_v11, %v1642_v43  ;;  %v873_v53 = vadd.f32 %v3913_v2, %v616_v44 }
 0x288   : > { %3433 = vst [vmem:[%s3972_s29 + $0x660] sm:$0xff] %v3177_v46  ;;  %v2666_v54 = vadd.f32 %v2410_v47, %v1383_v35  ;;  %v2411_v55 = vmul.f32 %v3927_v12, %v2154_v49  ;;  %v1643_v56 = vmul.f32 %v3919_v6, %v359_v32  ;;  %v617_v57 = vmul.f32 %v3911_v1, %v360_v45  ;;  %v365_v49 = vld [vmem:[%s3904_s14 + $0x6b8] sm:$0xff] }
 0x289   : > { %v3178_v59 = vmax.f32 %v2922_v50, 0.0  ;;  %v1385_v60 = vmul.f32 %v3917_v5, %v1128_v51  ;;  %v2155_v61 = vmax.f32 %v1899_v52, 0.0  ;;  %v1129_v62 = vmax.f32 %v873_v53, 0.0 }
 0x28a   : > { %v2923_v63 = vadd.f32 %v3931_v15, %v2666_v54  ;;  %v2667_v0 = vadd.f32 %v2411_v55, %v1384_v48  ;;  %v1900_v3 = vadd.f32 %v3925_v11, %v1643_v56  ;;  %v874_v4 = vadd.f32 %v3913_v2, %v617_v57 }
 0x28b   : > { %3434 = vst [vmem:[%s3972_s29 + $0x668] sm:$0xff] %v3178_v59  ;;  %v2412_v7 = vmul.f32 %v3927_v12, %v2155_v61  ;;  %v1386_v8 = vmul.f32 %v3917_v5, %v1129_v62  ;;  %v1644_v9 = vmul.f32 %v3919_v6, %v360_v45  ;;  %v618_v10 = vmul.f32 %v3911_v1, %v361_v58  ;;  %v366_v62 = vld [vmem:[%s3904_s14 + $0x6c0] sm:$0xff] }
 0x28c   : > { %v3179_v14 = vmax.f32 %v2923_v63, 0.0  ;;  %v2924_v16 = vadd.f32 %v3931_v15, %v2667_v0  ;;  %v2156_v17 = vmax.f32 %v1900_v3, 0.0  ;;  %v1130_v18 = vmax.f32 %v874_v4, 0.0 }
 0x28d   : > { %v2668_v19 = vadd.f32 %v2412_v7, %v1385_v60  ;;  %v1901_v20 = vadd.f32 %v3925_v11, %v1644_v9  ;;  %v875_v21 = vadd.f32 %v3913_v2, %v618_v10  ;;  %v1645_v22 = vmul.f32 %v3919_v6, %v361_v58 }
 0x28e   : > { %3435 = vst [vmem:[%s3972_s29 + $0x670] sm:$0xff] %v3179_v14  ;;  %v3180_v24 = vmax.f32 %v2924_v16, 0.0  ;;  %v2413_v25 = vmul.f32 %v3927_v12, %v2156_v17  ;;  %v1387_v26 = vmul.f32 %v3917_v5, %v1130_v18  ;;  %v619_v27 = vmul.f32 %v3911_v1, %v362_v13 }
 0x28f   : > { %v2925_v28 = vadd.f32 %v3931_v15, %v2668_v19  ;;  %v2157_v29 = vmax.f32 %v1901_v20, 0.0  ;;  %v1131_v30 = vmax.f32 %v875_v21, 0.0  ;;  %v1902_v31 = vadd.f32 %v3925_v11, %v1645_v22 }
 0x290   : > { %3436 = vst [vmem:[%s3972_s29 + $0x678] sm:$0xff] %v3180_v24  ;;  %v2669_v32 = vadd.f32 %v2413_v25, %v1386_v8  ;;  %v876_v33 = vadd.f32 %v3913_v2, %v619_v27  ;;  %v1646_v34 = vmul.f32 %v3919_v6, %v362_v13  ;;  %v620_v35 = vmul.f32 %v3911_v1, %v363_v23  ;;  %v367_v13 = vld [vmem:[%s3904_s14 + $0x6c8] sm:$0xff]  ;;  %v368_v27 = vld [vmem:[%s3904_s14 + $0x6d0] sm:$0xff] }
 0x291   : > { %v3181_v37 = vmax.f32 %v2925_v28, 0.0  ;;  %v2414_v38 = vmul.f32 %v3927_v12, %v2157_v29  ;;  %v1388_v39 = vmul.f32 %v3917_v5, %v1131_v30  ;;  %v2158_v40 = vmax.f32 %v1902_v31, 0.0 }
 0x292   : > { %v2926_v41 = vadd.f32 %v3931_v15, %v2669_v32  ;;  %v1132_v42 = vmax.f32 %v876_v33, 0.0  ;;  %v1903_v43 = vadd.f32 %v3925_v11, %v1646_v34  ;;  %v877_v44 = vadd.f32 %v3913_v2, %v620_v35 }
 0x293   : > { %3437 = vst [vmem:[%s3972_s29 + $0x680] sm:$0xff] %v3181_v37  ;;  %v2670_v45 = vadd.f32 %v2414_v38, %v1387_v26  ;;  %v2415_v46 = vmul.f32 %v3927_v12, %v2158_v40  ;;  %v1647_v47 = vmul.f32 %v3919_v6, %v363_v23  ;;  %v621_v48 = vmul.f32 %v3911_v1, %v364_v36  ;;  %v369_v40 = vld [vmem:[%s3904_s14 + $0x6d8] sm:$0xff] }
 0x294   : > { %v3182_v50 = vmax.f32 %v2926_v41, 0.0  ;;  %v1389_v51 = vmul.f32 %v3917_v5, %v1132_v42  ;;  %v2159_v52 = vmax.f32 %v1903_v43, 0.0  ;;  %v1133_v53 = vmax.f32 %v877_v44, 0.0 }
 0x295   : > { %v2927_v54 = vadd.f32 %v3931_v15, %v2670_v45  ;;  %v2671_v55 = vadd.f32 %v2415_v46, %v1388_v39  ;;  %v1904_v56 = vadd.f32 %v3925_v11, %v1647_v47  ;;  %v878_v57 = vadd.f32 %v3913_v2, %v621_v48 }
 0x296   : > { %3438 = vst [vmem:[%s3972_s29 + $0x688] sm:$0xff] %v3182_v50  ;;  %v2416_v58 = vmul.f32 %v3927_v12, %v2159_v52  ;;  %v1390_v59 = vmul.f32 %v3917_v5, %v1133_v53  ;;  %v1648_v60 = vmul.f32 %v3919_v6, %v364_v36  ;;  %v622_v61 = vmul.f32 %v3911_v1, %v365_v49  ;;  %v370_v53 = vld [vmem:[%s3904_s14 + $0x6e0] sm:$0xff] }
 0x297   : > { %v3183_v63 = vmax.f32 %v2927_v54, 0.0  ;;  %v2928_v0 = vadd.f32 %v3931_v15, %v2671_v55  ;;  %v2160_v3 = vmax.f32 %v1904_v56, 0.0  ;;  %v1134_v4 = vmax.f32 %v878_v57, 0.0 }
 0x298   : > { %v2672_v7 = vadd.f32 %v2416_v58, %v1389_v51  ;;  %v1905_v8 = vadd.f32 %v3925_v11, %v1648_v60  ;;  %v879_v9 = vadd.f32 %v3913_v2, %v622_v61  ;;  %v1649_v10 = vmul.f32 %v3919_v6, %v365_v49 }
 0x299   : > { %3439 = vst [vmem:[%s3972_s29 + $0x690] sm:$0xff] %v3183_v63  ;;  %v3184_v14 = vmax.f32 %v2928_v0, 0.0  ;;  %v2417_v16 = vmul.f32 %v3927_v12, %v2160_v3  ;;  %v1391_v17 = vmul.f32 %v3917_v5, %v1134_v4  ;;  %v623_v18 = vmul.f32 %v3911_v1, %v366_v62 }
 0x29a   : > { %v2929_v19 = vadd.f32 %v3931_v15, %v2672_v7  ;;  %v2161_v20 = vmax.f32 %v1905_v8, 0.0  ;;  %v1135_v21 = vmax.f32 %v879_v9, 0.0  ;;  %v1906_v22 = vadd.f32 %v3925_v11, %v1649_v10 }
 0x29b   : > { %3440 = vst [vmem:[%s3972_s29 + $0x698] sm:$0xff] %v3184_v14  ;;  %v2673_v23 = vadd.f32 %v2417_v16, %v1390_v59  ;;  %v880_v24 = vadd.f32 %v3913_v2, %v623_v18  ;;  %v1650_v25 = vmul.f32 %v3919_v6, %v366_v62  ;;  %v624_v26 = vmul.f32 %v3911_v1, %v367_v13  ;;  %v371_v62 = vld [vmem:[%s3904_s14 + $0x6e8] sm:$0xff]  ;;  %v372_v18 = vld [vmem:[%s3904_s14 + $0x6f0] sm:$0xff] }
 0x29c   : > { %v3185_v28 = vmax.f32 %v2929_v19, 0.0  ;;  %v2418_v29 = vmul.f32 %v3927_v12, %v2161_v20  ;;  %v1392_v30 = vmul.f32 %v3917_v5, %v1135_v21  ;;  %v2162_v31 = vmax.f32 %v1906_v22, 0.0 }
 0x29d   : > { %v2930_v32 = vadd.f32 %v3931_v15, %v2673_v23  ;;  %v1136_v33 = vmax.f32 %v880_v24, 0.0  ;;  %v1907_v34 = vadd.f32 %v3925_v11, %v1650_v25  ;;  %v881_v35 = vadd.f32 %v3913_v2, %v624_v26 }
 0x29e   : > { %3441 = vst [vmem:[%s3972_s29 + $0x6a0] sm:$0xff] %v3185_v28  ;;  %v2674_v36 = vadd.f32 %v2418_v29, %v1391_v17  ;;  %v2419_v37 = vmul.f32 %v3927_v12, %v2162_v31  ;;  %v1651_v38 = vmul.f32 %v3919_v6, %v367_v13  ;;  %v625_v39 = vmul.f32 %v3911_v1, %v368_v27  ;;  %v373_v31 = vld [vmem:[%s3904_s14 + $0x6f8] sm:$0xff] }
 0x29f   : > { %v3186_v41 = vmax.f32 %v2930_v32, 0.0  ;;  %v1393_v42 = vmul.f32 %v3917_v5, %v1136_v33  ;;  %v2163_v43 = vmax.f32 %v1907_v34, 0.0  ;;  %v1137_v44 = vmax.f32 %v881_v35, 0.0 }
 0x2a0   : > { %v2931_v45 = vadd.f32 %v3931_v15, %v2674_v36  ;;  %v2675_v46 = vadd.f32 %v2419_v37, %v1392_v30  ;;  %v1908_v47 = vadd.f32 %v3925_v11, %v1651_v38  ;;  %v882_v48 = vadd.f32 %v3913_v2, %v625_v39 }
 0x2a1   : > { %3442 = vst [vmem:[%s3972_s29 + $0x6a8] sm:$0xff] %v3186_v41  ;;  %v2420_v49 = vmul.f32 %v3927_v12, %v2163_v43  ;;  %v1394_v50 = vmul.f32 %v3917_v5, %v1137_v44  ;;  %v1652_v51 = vmul.f32 %v3919_v6, %v368_v27  ;;  %v626_v52 = vmul.f32 %v3911_v1, %v369_v40  ;;  %v374_v44 = vld [vmem:[%s3904_s14 + $0x700] sm:$0xff] }
 0x2a2   : > { %v3187_v54 = vmax.f32 %v2931_v45, 0.0  ;;  %v2932_v55 = vadd.f32 %v3931_v15, %v2675_v46  ;;  %v2164_v56 = vmax.f32 %v1908_v47, 0.0  ;;  %v1138_v57 = vmax.f32 %v882_v48, 0.0 }
 0x2a3   : > { %v2676_v58 = vadd.f32 %v2420_v49, %v1393_v42  ;;  %v1909_v59 = vadd.f32 %v3925_v11, %v1652_v51  ;;  %v883_v60 = vadd.f32 %v3913_v2, %v626_v52  ;;  %v1653_v61 = vmul.f32 %v3919_v6, %v369_v40 }
 0x2a4   : > { %3443 = vst [vmem:[%s3972_s29 + $0x6b0] sm:$0xff] %v3187_v54  ;;  %v3188_v63 = vmax.f32 %v2932_v55, 0.0  ;;  %v2421_v0 = vmul.f32 %v3927_v12, %v2164_v56  ;;  %v1395_v3 = vmul.f32 %v3917_v5, %v1138_v57  ;;  %v627_v4 = vmul.f32 %v3911_v1, %v370_v53 }
 0x2a5   : > { %v2933_v7 = vadd.f32 %v3931_v15, %v2676_v58  ;;  %v2165_v8 = vmax.f32 %v1909_v59, 0.0  ;;  %v1139_v9 = vmax.f32 %v883_v60, 0.0  ;;  %v1910_v10 = vadd.f32 %v3925_v11, %v1653_v61 }
 0x2a6   : > { %3444 = vst [vmem:[%s3972_s29 + $0x6b8] sm:$0xff] %v3188_v63  ;;  %v2677_v13 = vadd.f32 %v2421_v0, %v1394_v50  ;;  %v884_v14 = vadd.f32 %v3913_v2, %v627_v4  ;;  %v1654_v16 = vmul.f32 %v3919_v6, %v370_v53  ;;  %v628_v17 = vmul.f32 %v3911_v1, %v371_v62  ;;  %v375_v53 = vld [vmem:[%s3904_s14 + $0x708] sm:$0xff]  ;;  %v376_v4 = vld [vmem:[%s3904_s14 + $0x710] sm:$0xff] }
 0x2a7   : > { %v3189_v19 = vmax.f32 %v2933_v7, 0.0  ;;  %v2422_v20 = vmul.f32 %v3927_v12, %v2165_v8  ;;  %v1396_v21 = vmul.f32 %v3917_v5, %v1139_v9  ;;  %v2166_v22 = vmax.f32 %v1910_v10, 0.0 }
 0x2a8   : > { %v2934_v23 = vadd.f32 %v3931_v15, %v2677_v13  ;;  %v1140_v24 = vmax.f32 %v884_v14, 0.0  ;;  %v1911_v25 = vadd.f32 %v3925_v11, %v1654_v16  ;;  %v885_v26 = vadd.f32 %v3913_v2, %v628_v17 }
 0x2a9   : > { %3445 = vst [vmem:[%s3972_s29 + $0x6c0] sm:$0xff] %v3189_v19  ;;  %v2678_v27 = vadd.f32 %v2422_v20, %v1395_v3  ;;  %v2423_v28 = vmul.f32 %v3927_v12, %v2166_v22  ;;  %v1655_v29 = vmul.f32 %v3919_v6, %v371_v62  ;;  %v629_v30 = vmul.f32 %v3911_v1, %v372_v18  ;;  %v377_v22 = vld [vmem:[%s3904_s14 + $0x718] sm:$0xff] }
 0x2aa   : > { %v3190_v32 = vmax.f32 %v2934_v23, 0.0  ;;  %v1397_v33 = vmul.f32 %v3917_v5, %v1140_v24  ;;  %v2167_v34 = vmax.f32 %v1911_v25, 0.0  ;;  %v1141_v35 = vmax.f32 %v885_v26, 0.0 }
 0x2ab   : > { %v2935_v36 = vadd.f32 %v3931_v15, %v2678_v27  ;;  %v2679_v37 = vadd.f32 %v2423_v28, %v1396_v21  ;;  %v1912_v38 = vadd.f32 %v3925_v11, %v1655_v29  ;;  %v886_v39 = vadd.f32 %v3913_v2, %v629_v30 }
 0x2ac   : > { %3446 = vst [vmem:[%s3972_s29 + $0x6c8] sm:$0xff] %v3190_v32  ;;  %v2424_v40 = vmul.f32 %v3927_v12, %v2167_v34  ;;  %v1398_v41 = vmul.f32 %v3917_v5, %v1141_v35  ;;  %v1656_v42 = vmul.f32 %v3919_v6, %v372_v18  ;;  %v630_v43 = vmul.f32 %v3911_v1, %v373_v31  ;;  %v378_v35 = vld [vmem:[%s3904_s14 + $0x720] sm:$0xff] }
 0x2ad   : > { %v3191_v45 = vmax.f32 %v2935_v36, 0.0  ;;  %v2936_v46 = vadd.f32 %v3931_v15, %v2679_v37  ;;  %v2168_v47 = vmax.f32 %v1912_v38, 0.0  ;;  %v1142_v48 = vmax.f32 %v886_v39, 0.0 }
 0x2ae   : > { %v2680_v49 = vadd.f32 %v2424_v40, %v1397_v33  ;;  %v1913_v50 = vadd.f32 %v3925_v11, %v1656_v42  ;;  %v887_v51 = vadd.f32 %v3913_v2, %v630_v43  ;;  %v1657_v52 = vmul.f32 %v3919_v6, %v373_v31 }
 0x2af   : > { %3447 = vst [vmem:[%s3972_s29 + $0x6d0] sm:$0xff] %v3191_v45  ;;  %v3192_v54 = vmax.f32 %v2936_v46, 0.0  ;;  %v2425_v55 = vmul.f32 %v3927_v12, %v2168_v47  ;;  %v1399_v56 = vmul.f32 %v3917_v5, %v1142_v48  ;;  %v631_v57 = vmul.f32 %v3911_v1, %v374_v44 }
 0x2b0   : > { %v2937_v58 = vadd.f32 %v3931_v15, %v2680_v49  ;;  %v2169_v59 = vmax.f32 %v1913_v50, 0.0  ;;  %v1143_v60 = vmax.f32 %v887_v51, 0.0  ;;  %v1914_v61 = vadd.f32 %v3925_v11, %v1657_v52 }
 0x2b1   : > { %3448 = vst [vmem:[%s3972_s29 + $0x6d8] sm:$0xff] %v3192_v54  ;;  %v2681_v62 = vadd.f32 %v2425_v55, %v1398_v41  ;;  %v888_v63 = vadd.f32 %v3913_v2, %v631_v57  ;;  %v1658_v0 = vmul.f32 %v3919_v6, %v374_v44  ;;  %v632_v3 = vmul.f32 %v3911_v1, %v375_v53  ;;  %v379_v44 = vld [vmem:[%s3904_s14 + $0x728] sm:$0xff]  ;;  %v380_v57 = vld [vmem:[%s3904_s14 + $0x730] sm:$0xff] }
 0x2b2   : > { %v3193_v7 = vmax.f32 %v2937_v58, 0.0  ;;  %v2426_v8 = vmul.f32 %v3927_v12, %v2169_v59  ;;  %v1400_v9 = vmul.f32 %v3917_v5, %v1143_v60  ;;  %v2170_v10 = vmax.f32 %v1914_v61, 0.0 }
 0x2b3   : > { %v2938_v13 = vadd.f32 %v3931_v15, %v2681_v62  ;;  %v1144_v14 = vmax.f32 %v888_v63, 0.0  ;;  %v1915_v16 = vadd.f32 %v3925_v11, %v1658_v0  ;;  %v889_v17 = vadd.f32 %v3913_v2, %v632_v3 }
 0x2b4   : > { %3449 = vst [vmem:[%s3972_s29 + $0x6e0] sm:$0xff] %v3193_v7  ;;  %v2682_v18 = vadd.f32 %v2426_v8, %v1399_v56  ;;  %v2427_v19 = vmul.f32 %v3927_v12, %v2170_v10  ;;  %v1659_v20 = vmul.f32 %v3919_v6, %v375_v53  ;;  %v633_v21 = vmul.f32 %v3911_v1, %v376_v4  ;;  %v381_v10 = vld [vmem:[%s3904_s14 + $0x738] sm:$0xff] }
 0x2b5   : > { %v3194_v23 = vmax.f32 %v2938_v13, 0.0  ;;  %v1401_v24 = vmul.f32 %v3917_v5, %v1144_v14  ;;  %v2171_v25 = vmax.f32 %v1915_v16, 0.0  ;;  %v1145_v26 = vmax.f32 %v889_v17, 0.0 }
 0x2b6   : > { %v2939_v27 = vadd.f32 %v3931_v15, %v2682_v18  ;;  %v2683_v28 = vadd.f32 %v2427_v19, %v1400_v9  ;;  %v1916_v29 = vadd.f32 %v3925_v11, %v1659_v20  ;;  %v890_v30 = vadd.f32 %v3913_v2, %v633_v21 }
 0x2b7   : > { %3450 = vst [vmem:[%s3972_s29 + $0x6e8] sm:$0xff] %v3194_v23  ;;  %v2428_v31 = vmul.f32 %v3927_v12, %v2171_v25  ;;  %v1402_v32 = vmul.f32 %v3917_v5, %v1145_v26  ;;  %v1660_v33 = vmul.f32 %v3919_v6, %v376_v4  ;;  %v634_v34 = vmul.f32 %v3911_v1, %v377_v22  ;;  %v382_v26 = vld [vmem:[%s3904_s14 + $0x740] sm:$0xff] }
 0x2b8   : > { %v3195_v36 = vmax.f32 %v2939_v27, 0.0  ;;  %v2940_v37 = vadd.f32 %v3931_v15, %v2683_v28  ;;  %v2172_v38 = vmax.f32 %v1916_v29, 0.0  ;;  %v1146_v39 = vmax.f32 %v890_v30, 0.0 }
 0x2b9   : > { %v2684_v40 = vadd.f32 %v2428_v31, %v1401_v24  ;;  %v1917_v41 = vadd.f32 %v3925_v11, %v1660_v33  ;;  %v891_v42 = vadd.f32 %v3913_v2, %v634_v34  ;;  %v1661_v43 = vmul.f32 %v3919_v6, %v377_v22 }
 0x2ba   : > { %3451 = vst [vmem:[%s3972_s29 + $0x6f0] sm:$0xff] %v3195_v36  ;;  %v3196_v45 = vmax.f32 %v2940_v37, 0.0  ;;  %v2429_v46 = vmul.f32 %v3927_v12, %v2172_v38  ;;  %v1403_v47 = vmul.f32 %v3917_v5, %v1146_v39  ;;  %v635_v48 = vmul.f32 %v3911_v1, %v378_v35 }
 0x2bb   : > { %v2941_v49 = vadd.f32 %v3931_v15, %v2684_v40  ;;  %v2173_v50 = vmax.f32 %v1917_v41, 0.0  ;;  %v1147_v51 = vmax.f32 %v891_v42, 0.0  ;;  %v1918_v52 = vadd.f32 %v3925_v11, %v1661_v43 }
 0x2bc   : > { %3452 = vst [vmem:[%s3972_s29 + $0x6f8] sm:$0xff] %v3196_v45  ;;  %v2685_v53 = vadd.f32 %v2429_v46, %v1402_v32  ;;  %v892_v54 = vadd.f32 %v3913_v2, %v635_v48  ;;  %v1662_v55 = vmul.f32 %v3919_v6, %v378_v35  ;;  %v636_v56 = vmul.f32 %v3911_v1, %v379_v44  ;;  %v383_v35 = vld [vmem:[%s3904_s14 + $0x748] sm:$0xff]  ;;  %v384_v48 = vld [vmem:[%s3904_s14 + $0x750] sm:$0xff] }
 0x2bd   : > { %v3197_v58 = vmax.f32 %v2941_v49, 0.0  ;;  %v2430_v59 = vmul.f32 %v3927_v12, %v2173_v50  ;;  %v1404_v60 = vmul.f32 %v3917_v5, %v1147_v51  ;;  %v2174_v61 = vmax.f32 %v1918_v52, 0.0 }
 0x2be   : > { %v2942_v62 = vadd.f32 %v3931_v15, %v2685_v53  ;;  %v1148_v63 = vmax.f32 %v892_v54, 0.0  ;;  %v1919_v0 = vadd.f32 %v3925_v11, %v1662_v55  ;;  %v893_v3 = vadd.f32 %v3913_v2, %v636_v56 }
 0x2bf   : > { %3453 = vst [vmem:[%s3972_s29 + $0x700] sm:$0xff] %v3197_v58  ;;  %v2686_v4 = vadd.f32 %v2430_v59, %v1403_v47  ;;  %v2431_v7 = vmul.f32 %v3927_v12, %v2174_v61  ;;  %v1663_v8 = vmul.f32 %v3919_v6, %v379_v44  ;;  %v637_v9 = vmul.f32 %v3911_v1, %v380_v57  ;;  %v385_v61 = vld [vmem:[%s3904_s14 + $0x758] sm:$0xff] }
 0x2c0   : > { %v3198_v13 = vmax.f32 %v2942_v62, 0.0  ;;  %v1405_v14 = vmul.f32 %v3917_v5, %v1148_v63  ;;  %v2175_v16 = vmax.f32 %v1919_v0, 0.0  ;;  %v1149_v17 = vmax.f32 %v893_v3, 0.0 }
 0x2c1   : > { %v2943_v18 = vadd.f32 %v3931_v15, %v2686_v4  ;;  %v2687_v19 = vadd.f32 %v2431_v7, %v1404_v60  ;;  %v1920_v20 = vadd.f32 %v3925_v11, %v1663_v8  ;;  %v894_v21 = vadd.f32 %v3913_v2, %v637_v9 }
 0x2c2   : > { %3454 = vst [vmem:[%s3972_s29 + $0x708] sm:$0xff] %v3198_v13  ;;  %v2432_v22 = vmul.f32 %v3927_v12, %v2175_v16  ;;  %v1406_v23 = vmul.f32 %v3917_v5, %v1149_v17  ;;  %v1664_v24 = vmul.f32 %v3919_v6, %v380_v57  ;;  %v638_v25 = vmul.f32 %v3911_v1, %v381_v10  ;;  %v386_v17 = vld [vmem:[%s3904_s14 + $0x760] sm:$0xff] }
 0x2c3   : > { %v3199_v27 = vmax.f32 %v2943_v18, 0.0  ;;  %v2944_v28 = vadd.f32 %v3931_v15, %v2687_v19  ;;  %v2176_v29 = vmax.f32 %v1920_v20, 0.0  ;;  %v1150_v30 = vmax.f32 %v894_v21, 0.0 }
 0x2c4   : > { %v2688_v31 = vadd.f32 %v2432_v22, %v1405_v14  ;;  %v1921_v32 = vadd.f32 %v3925_v11, %v1664_v24  ;;  %v895_v33 = vadd.f32 %v3913_v2, %v638_v25  ;;  %v1665_v34 = vmul.f32 %v3919_v6, %v381_v10 }
 0x2c5   : > { %3455 = vst [vmem:[%s3972_s29 + $0x710] sm:$0xff] %v3199_v27  ;;  %v3200_v36 = vmax.f32 %v2944_v28, 0.0  ;;  %v2433_v37 = vmul.f32 %v3927_v12, %v2176_v29  ;;  %v1407_v38 = vmul.f32 %v3917_v5, %v1150_v30  ;;  %v639_v39 = vmul.f32 %v3911_v1, %v382_v26 }
 0x2c6   : > { %v2945_v40 = vadd.f32 %v3931_v15, %v2688_v31  ;;  %v2177_v41 = vmax.f32 %v1921_v32, 0.0  ;;  %v1151_v42 = vmax.f32 %v895_v33, 0.0  ;;  %v1922_v43 = vadd.f32 %v3925_v11, %v1665_v34 }
 0x2c7   : > { %3456 = vst [vmem:[%s3972_s29 + $0x718] sm:$0xff] %v3200_v36  ;;  %v2689_v44 = vadd.f32 %v2433_v37, %v1406_v23  ;;  %v896_v45 = vadd.f32 %v3913_v2, %v639_v39  ;;  %v1666_v46 = vmul.f32 %v3919_v6, %v382_v26  ;;  %v640_v47 = vmul.f32 %v3911_v1, %v383_v35  ;;  %v387_v26 = vld [vmem:[%s3904_s14 + $0x768] sm:$0xff]  ;;  %v388_v39 = vld [vmem:[%s3904_s14 + $0x770] sm:$0xff] }
 0x2c8   : > { %v3201_v49 = vmax.f32 %v2945_v40, 0.0  ;;  %v2434_v50 = vmul.f32 %v3927_v12, %v2177_v41  ;;  %v1408_v51 = vmul.f32 %v3917_v5, %v1151_v42  ;;  %v2178_v52 = vmax.f32 %v1922_v43, 0.0 }
 0x2c9   : > { %v2946_v53 = vadd.f32 %v3931_v15, %v2689_v44  ;;  %v1152_v54 = vmax.f32 %v896_v45, 0.0  ;;  %v1923_v55 = vadd.f32 %v3925_v11, %v1666_v46  ;;  %v897_v56 = vadd.f32 %v3913_v2, %v640_v47 }
 0x2ca   : > { %3457 = vst [vmem:[%s3972_s29 + $0x720] sm:$0xff] %v3201_v49  ;;  %v2690_v57 = vadd.f32 %v2434_v50, %v1407_v38  ;;  %v2435_v58 = vmul.f32 %v3927_v12, %v2178_v52  ;;  %v1667_v59 = vmul.f32 %v3919_v6, %v383_v35  ;;  %v641_v60 = vmul.f32 %v3911_v1, %v384_v48  ;;  %v389_v52 = vld [vmem:[%s3904_s14 + $0x778] sm:$0xff] }
 0x2cb   : > { %v3202_v62 = vmax.f32 %v2946_v53, 0.0  ;;  %v1409_v63 = vmul.f32 %v3917_v5, %v1152_v54  ;;  %v2179_v0 = vmax.f32 %v1923_v55, 0.0  ;;  %v1153_v3 = vmax.f32 %v897_v56, 0.0 }
 0x2cc   : > { %v2947_v4 = vadd.f32 %v3931_v15, %v2690_v57  ;;  %v2691_v7 = vadd.f32 %v2435_v58, %v1408_v51  ;;  %v1924_v8 = vadd.f32 %v3925_v11, %v1667_v59  ;;  %v898_v9 = vadd.f32 %v3913_v2, %v641_v60 }
 0x2cd   : > { %3458 = vst [vmem:[%s3972_s29 + $0x728] sm:$0xff] %v3202_v62  ;;  %v2436_v10 = vmul.f32 %v3927_v12, %v2179_v0  ;;  %v1410_v13 = vmul.f32 %v3917_v5, %v1153_v3  ;;  %v1668_v14 = vmul.f32 %v3919_v6, %v384_v48  ;;  %v642_v16 = vmul.f32 %v3911_v1, %v385_v61  ;;  %v390_v3 = vld [vmem:[%s3904_s14 + $0x780] sm:$0xff] }
 0x2ce   : > { %v3203_v18 = vmax.f32 %v2947_v4, 0.0  ;;  %v2948_v19 = vadd.f32 %v3931_v15, %v2691_v7  ;;  %v2180_v20 = vmax.f32 %v1924_v8, 0.0  ;;  %v1154_v21 = vmax.f32 %v898_v9, 0.0 }
 0x2cf   : > { %v2692_v22 = vadd.f32 %v2436_v10, %v1409_v63  ;;  %v1925_v23 = vadd.f32 %v3925_v11, %v1668_v14  ;;  %v899_v24 = vadd.f32 %v3913_v2, %v642_v16  ;;  %v1669_v25 = vmul.f32 %v3919_v6, %v385_v61 }
 0x2d0   : > { %3459 = vst [vmem:[%s3972_s29 + $0x730] sm:$0xff] %v3203_v18  ;;  %v3204_v27 = vmax.f32 %v2948_v19, 0.0  ;;  %v2437_v28 = vmul.f32 %v3927_v12, %v2180_v20  ;;  %v1411_v29 = vmul.f32 %v3917_v5, %v1154_v21  ;;  %v643_v30 = vmul.f32 %v3911_v1, %v386_v17 }
 0x2d1   : > { %v2949_v31 = vadd.f32 %v3931_v15, %v2692_v22  ;;  %v2181_v32 = vmax.f32 %v1925_v23, 0.0  ;;  %v1155_v33 = vmax.f32 %v899_v24, 0.0  ;;  %v1926_v34 = vadd.f32 %v3925_v11, %v1669_v25 }
 0x2d2   : > { %3460 = vst [vmem:[%s3972_s29 + $0x738] sm:$0xff] %v3204_v27  ;;  %v2693_v35 = vadd.f32 %v2437_v28, %v1410_v13  ;;  %v900_v36 = vadd.f32 %v3913_v2, %v643_v30  ;;  %v1670_v37 = vmul.f32 %v3919_v6, %v386_v17  ;;  %v644_v38 = vmul.f32 %v3911_v1, %v387_v26  ;;  %v391_v17 = vld [vmem:[%s3904_s14 + $0x788] sm:$0xff]  ;;  %v392_v30 = vld [vmem:[%s3904_s14 + $0x790] sm:$0xff] }
 0x2d3   : > { %v3205_v40 = vmax.f32 %v2949_v31, 0.0  ;;  %v2438_v41 = vmul.f32 %v3927_v12, %v2181_v32  ;;  %v1412_v42 = vmul.f32 %v3917_v5, %v1155_v33  ;;  %v2182_v43 = vmax.f32 %v1926_v34, 0.0 }
 0x2d4   : > { %v2950_v44 = vadd.f32 %v3931_v15, %v2693_v35  ;;  %v1156_v45 = vmax.f32 %v900_v36, 0.0  ;;  %v1927_v46 = vadd.f32 %v3925_v11, %v1670_v37  ;;  %v901_v47 = vadd.f32 %v3913_v2, %v644_v38 }
 0x2d5   : > { %3461 = vst [vmem:[%s3972_s29 + $0x740] sm:$0xff] %v3205_v40  ;;  %v2694_v48 = vadd.f32 %v2438_v41, %v1411_v29  ;;  %v2439_v49 = vmul.f32 %v3927_v12, %v2182_v43  ;;  %v1671_v50 = vmul.f32 %v3919_v6, %v387_v26  ;;  %v645_v51 = vmul.f32 %v3911_v1, %v388_v39  ;;  %v393_v43 = vld [vmem:[%s3904_s14 + $0x798] sm:$0xff] }
 0x2d6   : > { %v3206_v53 = vmax.f32 %v2950_v44, 0.0  ;;  %v1413_v54 = vmul.f32 %v3917_v5, %v1156_v45  ;;  %v2183_v55 = vmax.f32 %v1927_v46, 0.0  ;;  %v1157_v56 = vmax.f32 %v901_v47, 0.0 }
 0x2d7   : > { %v2951_v57 = vadd.f32 %v3931_v15, %v2694_v48  ;;  %v2695_v58 = vadd.f32 %v2439_v49, %v1412_v42  ;;  %v1928_v59 = vadd.f32 %v3925_v11, %v1671_v50  ;;  %v902_v60 = vadd.f32 %v3913_v2, %v645_v51 }
 0x2d8   : > { %3462 = vst [vmem:[%s3972_s29 + $0x748] sm:$0xff] %v3206_v53  ;;  %v2440_v61 = vmul.f32 %v3927_v12, %v2183_v55  ;;  %v1414_v62 = vmul.f32 %v3917_v5, %v1157_v56  ;;  %v1672_v63 = vmul.f32 %v3919_v6, %v388_v39  ;;  %v646_v0 = vmul.f32 %v3911_v1, %v389_v52  ;;  %v394_v56 = vld [vmem:[%s3904_s14 + $0x7a0] sm:$0xff] }
 0x2d9   : > { %v3207_v4 = vmax.f32 %v2951_v57, 0.0  ;;  %v2952_v7 = vadd.f32 %v3931_v15, %v2695_v58  ;;  %v2184_v8 = vmax.f32 %v1928_v59, 0.0  ;;  %v1158_v9 = vmax.f32 %v902_v60, 0.0 }
 0x2da   : > { %v2696_v10 = vadd.f32 %v2440_v61, %v1413_v54  ;;  %v1929_v13 = vadd.f32 %v3925_v11, %v1672_v63  ;;  %v903_v14 = vadd.f32 %v3913_v2, %v646_v0  ;;  %v1673_v16 = vmul.f32 %v3919_v6, %v389_v52 }
 0x2db   : > { %3463 = vst [vmem:[%s3972_s29 + $0x750] sm:$0xff] %v3207_v4  ;;  %v3208_v18 = vmax.f32 %v2952_v7, 0.0  ;;  %v2441_v19 = vmul.f32 %v3927_v12, %v2184_v8  ;;  %v1415_v20 = vmul.f32 %v3917_v5, %v1158_v9  ;;  %v647_v21 = vmul.f32 %v3911_v1, %v390_v3 }
 0x2dc   : > { %v2953_v22 = vadd.f32 %v3931_v15, %v2696_v10  ;;  %v2185_v23 = vmax.f32 %v1929_v13, 0.0  ;;  %v1159_v24 = vmax.f32 %v903_v14, 0.0  ;;  %v1930_v25 = vadd.f32 %v3925_v11, %v1673_v16 }
 0x2dd   : > { %3464 = vst [vmem:[%s3972_s29 + $0x758] sm:$0xff] %v3208_v18  ;;  %v2697_v26 = vadd.f32 %v2441_v19, %v1414_v62  ;;  %v904_v27 = vadd.f32 %v3913_v2, %v647_v21  ;;  %v1674_v28 = vmul.f32 %v3919_v6, %v390_v3  ;;  %v648_v29 = vmul.f32 %v3911_v1, %v391_v17  ;;  %v395_v3 = vld [vmem:[%s3904_s14 + $0x7a8] sm:$0xff]  ;;  %v396_v21 = vld [vmem:[%s3904_s14 + $0x7b0] sm:$0xff] }
 0x2de   : > { %v3209_v31 = vmax.f32 %v2953_v22, 0.0  ;;  %v2442_v32 = vmul.f32 %v3927_v12, %v2185_v23  ;;  %v1416_v33 = vmul.f32 %v3917_v5, %v1159_v24  ;;  %v2186_v34 = vmax.f32 %v1930_v25, 0.0 }
 0x2df   : > { %v2954_v35 = vadd.f32 %v3931_v15, %v2697_v26  ;;  %v1160_v36 = vmax.f32 %v904_v27, 0.0  ;;  %v1931_v37 = vadd.f32 %v3925_v11, %v1674_v28  ;;  %v905_v38 = vadd.f32 %v3913_v2, %v648_v29 }
 0x2e0   : > { %3465 = vst [vmem:[%s3972_s29 + $0x760] sm:$0xff] %v3209_v31  ;;  %v2698_v39 = vadd.f32 %v2442_v32, %v1415_v20  ;;  %v2443_v40 = vmul.f32 %v3927_v12, %v2186_v34  ;;  %v1675_v41 = vmul.f32 %v3919_v6, %v391_v17  ;;  %v649_v42 = vmul.f32 %v3911_v1, %v392_v30  ;;  %v397_v34 = vld [vmem:[%s3904_s14 + $0x7b8] sm:$0xff] }
 0x2e1   : > { %v3210_v44 = vmax.f32 %v2954_v35, 0.0  ;;  %v1417_v45 = vmul.f32 %v3917_v5, %v1160_v36  ;;  %v2187_v46 = vmax.f32 %v1931_v37, 0.0  ;;  %v1161_v47 = vmax.f32 %v905_v38, 0.0 }
 0x2e2   : > { %v2955_v48 = vadd.f32 %v3931_v15, %v2698_v39  ;;  %v2699_v49 = vadd.f32 %v2443_v40, %v1416_v33  ;;  %v1932_v50 = vadd.f32 %v3925_v11, %v1675_v41  ;;  %v906_v51 = vadd.f32 %v3913_v2, %v649_v42 }
 0x2e3   : > { %3466 = vst [vmem:[%s3972_s29 + $0x768] sm:$0xff] %v3210_v44  ;;  %v2444_v52 = vmul.f32 %v3927_v12, %v2187_v46  ;;  %v1418_v53 = vmul.f32 %v3917_v5, %v1161_v47  ;;  %v1676_v54 = vmul.f32 %v3919_v6, %v392_v30  ;;  %v650_v55 = vmul.f32 %v3911_v1, %v393_v43  ;;  %v398_v47 = vld [vmem:[%s3904_s14 + $0x7c0] sm:$0xff] }
 0x2e4   : > { %v3211_v57 = vmax.f32 %v2955_v48, 0.0  ;;  %v2956_v58 = vadd.f32 %v3931_v15, %v2699_v49  ;;  %v2188_v59 = vmax.f32 %v1932_v50, 0.0  ;;  %v1162_v60 = vmax.f32 %v906_v51, 0.0 }
 0x2e5   : > { %v2700_v61 = vadd.f32 %v2444_v52, %v1417_v45  ;;  %v1933_v62 = vadd.f32 %v3925_v11, %v1676_v54  ;;  %v907_v63 = vadd.f32 %v3913_v2, %v650_v55  ;;  %v1677_v0 = vmul.f32 %v3919_v6, %v393_v43 }
 0x2e6   : > { %3467 = vst [vmem:[%s3972_s29 + $0x770] sm:$0xff] %v3211_v57  ;;  %v3212_v4 = vmax.f32 %v2956_v58, 0.0  ;;  %v2445_v7 = vmul.f32 %v3927_v12, %v2188_v59  ;;  %v1419_v8 = vmul.f32 %v3917_v5, %v1162_v60  ;;  %v651_v9 = vmul.f32 %v3911_v1, %v394_v56 }
 0x2e7   : > { %v2957_v10 = vadd.f32 %v3931_v15, %v2700_v61  ;;  %v2189_v13 = vmax.f32 %v1933_v62, 0.0  ;;  %v1163_v14 = vmax.f32 %v907_v63, 0.0  ;;  %v1934_v16 = vadd.f32 %v3925_v11, %v1677_v0 }
 0x2e8   : > { %3468 = vst [vmem:[%s3972_s29 + $0x778] sm:$0xff] %v3212_v4  ;;  %v2701_v17 = vadd.f32 %v2445_v7, %v1418_v53  ;;  %v908_v18 = vadd.f32 %v3913_v2, %v651_v9  ;;  %v1678_v19 = vmul.f32 %v3919_v6, %v394_v56  ;;  %v652_v20 = vmul.f32 %v3911_v1, %v395_v3  ;;  %v399_v56 = vld [vmem:[%s3904_s14 + $0x7c8] sm:$0xff]  ;;  %v400_v9 = vld [vmem:[%s3904_s14 + $0x7d0] sm:$0xff] }
 0x2e9   : > { %v3213_v22 = vmax.f32 %v2957_v10, 0.0  ;;  %v2446_v23 = vmul.f32 %v3927_v12, %v2189_v13  ;;  %v1420_v24 = vmul.f32 %v3917_v5, %v1163_v14  ;;  %v2190_v25 = vmax.f32 %v1934_v16, 0.0 }
 0x2ea   : > { %v2958_v26 = vadd.f32 %v3931_v15, %v2701_v17  ;;  %v1164_v27 = vmax.f32 %v908_v18, 0.0  ;;  %v1935_v28 = vadd.f32 %v3925_v11, %v1678_v19  ;;  %v909_v29 = vadd.f32 %v3913_v2, %v652_v20 }
 0x2eb   : > { %3469 = vst [vmem:[%s3972_s29 + $0x780] sm:$0xff] %v3213_v22  ;;  %v2702_v30 = vadd.f32 %v2446_v23, %v1419_v8  ;;  %v2447_v31 = vmul.f32 %v3927_v12, %v2190_v25  ;;  %v1679_v32 = vmul.f32 %v3919_v6, %v395_v3  ;;  %v653_v33 = vmul.f32 %v3911_v1, %v396_v21  ;;  %v401_v25 = vld [vmem:[%s3904_s14 + $0x7d8] sm:$0xff] }
 0x2ec   : > { %v3214_v35 = vmax.f32 %v2958_v26, 0.0  ;;  %v1421_v36 = vmul.f32 %v3917_v5, %v1164_v27  ;;  %v2191_v37 = vmax.f32 %v1935_v28, 0.0  ;;  %v1165_v38 = vmax.f32 %v909_v29, 0.0 }
 0x2ed   : > { %v2959_v39 = vadd.f32 %v3931_v15, %v2702_v30  ;;  %v2703_v40 = vadd.f32 %v2447_v31, %v1420_v24  ;;  %v1936_v41 = vadd.f32 %v3925_v11, %v1679_v32  ;;  %v910_v42 = vadd.f32 %v3913_v2, %v653_v33 }
 0x2ee   : > { %3470 = vst [vmem:[%s3972_s29 + $0x788] sm:$0xff] %v3214_v35  ;;  %v2448_v43 = vmul.f32 %v3927_v12, %v2191_v37  ;;  %v1422_v44 = vmul.f32 %v3917_v5, %v1165_v38  ;;  %v1680_v45 = vmul.f32 %v3919_v6, %v396_v21  ;;  %v654_v46 = vmul.f32 %v3911_v1, %v397_v34  ;;  %v402_v38 = vld [vmem:[%s3904_s14 + $0x7e0] sm:$0xff] }
 0x2ef   : > { %v3215_v48 = vmax.f32 %v2959_v39, 0.0  ;;  %v2960_v49 = vadd.f32 %v3931_v15, %v2703_v40  ;;  %v2192_v50 = vmax.f32 %v1936_v41, 0.0  ;;  %v1166_v51 = vmax.f32 %v910_v42, 0.0 }
 0x2f0   : > { %v2704_v52 = vadd.f32 %v2448_v43, %v1421_v36  ;;  %v1937_v53 = vadd.f32 %v3925_v11, %v1680_v45  ;;  %v911_v54 = vadd.f32 %v3913_v2, %v654_v46  ;;  %v1681_v55 = vmul.f32 %v3919_v6, %v397_v34 }
 0x2f1   : > { %3471 = vst [vmem:[%s3972_s29 + $0x790] sm:$0xff] %v3215_v48  ;;  %v3216_v57 = vmax.f32 %v2960_v49, 0.0  ;;  %v2449_v58 = vmul.f32 %v3927_v12, %v2192_v50  ;;  %v1423_v59 = vmul.f32 %v3917_v5, %v1166_v51  ;;  %v655_v60 = vmul.f32 %v3911_v1, %v398_v47 }
 0x2f2   : > { %v2961_v61 = vadd.f32 %v3931_v15, %v2704_v52  ;;  %v2193_v62 = vmax.f32 %v1937_v53, 0.0  ;;  %v1167_v63 = vmax.f32 %v911_v54, 0.0  ;;  %v1938_v0 = vadd.f32 %v3925_v11, %v1681_v55 }
 0x2f3   : > { %3472 = vst [vmem:[%s3972_s29 + $0x798] sm:$0xff] %v3216_v57  ;;  %v2705_v3 = vadd.f32 %v2449_v58, %v1422_v44  ;;  %v912_v4 = vadd.f32 %v3913_v2, %v655_v60  ;;  %v1682_v7 = vmul.f32 %v3919_v6, %v398_v47  ;;  %v656_v8 = vmul.f32 %v3911_v1, %v399_v56  ;;  %v403_v47 = vld [vmem:[%s3904_s14 + $0x7e8] sm:$0xff]  ;;  %v404_v60 = vld [vmem:[%s3904_s14 + $0x7f0] sm:$0xff] }
 0x2f4   : > { %v3217_v10 = vmax.f32 %v2961_v61, 0.0  ;;  %v2450_v13 = vmul.f32 %v3927_v12, %v2193_v62  ;;  %v1424_v14 = vmul.f32 %v3917_v5, %v1167_v63  ;;  %v2194_v16 = vmax.f32 %v1938_v0, 0.0 }
 0x2f5   : > { %v2962_v17 = vadd.f32 %v3931_v15, %v2705_v3  ;;  %v1168_v18 = vmax.f32 %v912_v4, 0.0  ;;  %v1939_v19 = vadd.f32 %v3925_v11, %v1682_v7  ;;  %v913_v20 = vadd.f32 %v3913_v2, %v656_v8 }
 0x2f6   : > { %3473 = vst [vmem:[%s3972_s29 + $0x7a0] sm:$0xff] %v3217_v10  ;;  %v2706_v21 = vadd.f32 %v2450_v13, %v1423_v59  ;;  %v2451_v22 = vmul.f32 %v3927_v12, %v2194_v16  ;;  %v1683_v23 = vmul.f32 %v3919_v6, %v399_v56  ;;  %v657_v24 = vmul.f32 %v3911_v1, %v400_v9  ;;  %v405_v16 = vld [vmem:[%s3904_s14 + $0x7f8] sm:$0xff] }
 0x2f7   : > { %v3218_v26 = vmax.f32 %v2962_v17, 0.0  ;;  %v1425_v27 = vmul.f32 %v3917_v5, %v1168_v18  ;;  %v2195_v28 = vmax.f32 %v1939_v19, 0.0  ;;  %v1169_v29 = vmax.f32 %v913_v20, 0.0 }
 0x2f8   : > { %v2963_v30 = vadd.f32 %v3931_v15, %v2706_v21  ;;  %v2707_v31 = vadd.f32 %v2451_v22, %v1424_v14  ;;  %v1940_v32 = vadd.f32 %v3925_v11, %v1683_v23  ;;  %v914_v33 = vadd.f32 %v3913_v2, %v657_v24 }
 0x2f9   : > { %3474 = vst [vmem:[%s3972_s29 + $0x7a8] sm:$0xff] %v3218_v26  ;;  %v2452_v34 = vmul.f32 %v3927_v12, %v2195_v28  ;;  %v1426_v35 = vmul.f32 %v3917_v5, %v1169_v29  ;;  %v1684_v36 = vmul.f32 %v3919_v6, %v400_v9  ;;  %v658_v37 = vmul.f32 %v3911_v1, %v401_v25 }
 0x2fa   : > { %v3219_v39 = vmax.f32 %v2963_v30, 0.0  ;;  %v2964_v40 = vadd.f32 %v3931_v15, %v2707_v31  ;;  %v2196_v41 = vmax.f32 %v1940_v32, 0.0  ;;  %v1170_v42 = vmax.f32 %v914_v33, 0.0 }
 0x2fb   : > { %v2708_v43 = vadd.f32 %v2452_v34, %v1425_v27  ;;  %v1941_v44 = vadd.f32 %v3925_v11, %v1684_v36  ;;  %v915_v45 = vadd.f32 %v3913_v2, %v658_v37  ;;  %v1685_v46 = vmul.f32 %v3919_v6, %v401_v25 }
 0x2fc   : > { %3475 = vst [vmem:[%s3972_s29 + $0x7b0] sm:$0xff] %v3219_v39  ;;  %v3220_v48 = vmax.f32 %v2964_v40, 0.0  ;;  %v2453_v49 = vmul.f32 %v3927_v12, %v2196_v41  ;;  %v1427_v50 = vmul.f32 %v3917_v5, %v1170_v42  ;;  %v659_v51 = vmul.f32 %v3911_v1, %v402_v38 }
 0x2fd   : > { %v2965_v52 = vadd.f32 %v3931_v15, %v2708_v43  ;;  %v2197_v53 = vmax.f32 %v1941_v44, 0.0  ;;  %v1171_v54 = vmax.f32 %v915_v45, 0.0  ;;  %v1942_v55 = vadd.f32 %v3925_v11, %v1685_v46 }
 0x2fe   : > { %3476 = vst [vmem:[%s3972_s29 + $0x7b8] sm:$0xff] %v3220_v48  ;;  %v2709_v56 = vadd.f32 %v2453_v49, %v1426_v35  ;;  %v916_v57 = vadd.f32 %v3913_v2, %v659_v51  ;;  %v1686_v58 = vmul.f32 %v3919_v6, %v402_v38  ;;  %v660_v59 = vmul.f32 %v3911_v1, %v403_v47 }
 0x2ff   : > { %v3221_v61 = vmax.f32 %v2965_v52, 0.0  ;;  %v2454_v62 = vmul.f32 %v3927_v12, %v2197_v53  ;;  %v1428_v63 = vmul.f32 %v3917_v5, %v1171_v54  ;;  %v2198_v0 = vmax.f32 %v1942_v55, 0.0 }
 0x300   : > { %v2966_v3 = vadd.f32 %v3931_v15, %v2709_v56  ;;  %v1172_v4 = vmax.f32 %v916_v57, 0.0  ;;  %v1943_v7 = vadd.f32 %v3925_v11, %v1686_v58  ;;  %v917_v8 = vadd.f32 %v3913_v2, %v660_v59 }
 0x301   : > { %3477 = vst [vmem:[%s3972_s29 + $0x7c0] sm:$0xff] %v3221_v61  ;;  %v2710_v9 = vadd.f32 %v2454_v62, %v1427_v50  ;;  %v2455_v10 = vmul.f32 %v3927_v12, %v2198_v0  ;;  %v1687_v13 = vmul.f32 %v3919_v6, %v403_v47  ;;  %v661_v14 = vmul.f32 %v3911_v1, %v404_v60 }
 0x302   : > { %v3222_v17 = vmax.f32 %v2966_v3, 0.0  ;;  %v1429_v18 = vmul.f32 %v3917_v5, %v1172_v4  ;;  %v2199_v19 = vmax.f32 %v1943_v7, 0.0  ;;  %v1173_v20 = vmax.f32 %v917_v8, 0.0 }
 0x303   : > { %v2967_v21 = vadd.f32 %v3931_v15, %v2710_v9  ;;  %v2711_v22 = vadd.f32 %v2455_v10, %v1428_v63  ;;  %v1944_v23 = vadd.f32 %v3925_v11, %v1687_v13  ;;  %v918_v24 = vadd.f32 %v3913_v2, %v661_v14 }
 0x304   : > { %3478 = vst [vmem:[%s3972_s29 + $0x7c8] sm:$0xff] %v3222_v17  ;;  %v2456_v25 = vmul.f32 %v3927_v12, %v2199_v19  ;;  %v1430_v26 = vmul.f32 %v3917_v5, %v1173_v20  ;;  %v1688_v27 = vmul.f32 %v3919_v6, %v404_v60  ;;  %v662_v28 = vmul.f32 %v3911_v1, %v405_v16 }
 0x305   : > { %v3223_v29 = vmax.f32 %v2967_v21, 0.0  ;;  %v2968_v30 = vadd.f32 %v3931_v15, %v2711_v22  ;;  %v2200_v31 = vmax.f32 %v1944_v23, 0.0  ;;  %v1174_v32 = vmax.f32 %v918_v24, 0.0 }
 0x306   : > { %v2712_v33 = vadd.f32 %v2456_v25, %v1429_v18  ;;  %v1945_v34 = vadd.f32 %v3925_v11, %v1688_v27  ;;  %v919_v35 = vadd.f32 %v3913_v2, %v662_v28  ;;  %v1689_v36 = vmul.f32 %v3919_v6, %v405_v16 }
 0x307   : > { %3479 = vst [vmem:[%s3972_s29 + $0x7d0] sm:$0xff] %v3223_v29  ;;  %v3224_v37 = vmax.f32 %v2968_v30, 0.0  ;;  %v2457_v38 = vmul.f32 %v3927_v12, %v2200_v31  ;;  %v1431_v1 = vmul.f32 %v3917_v5, %v1174_v32 }
 0x308   : > { %v2969_v39 = vadd.f32 %v3931_v15, %v2712_v33  ;;  %v2201_v40 = vmax.f32 %v1945_v34, 0.0  ;;  %v1175_v41 = vmax.f32 %v919_v35, 0.0  ;;  %v1946_v42 = vadd.f32 %v3925_v11, %v1689_v36 }
 0x309   : > { %3480 = vst [vmem:[%s3972_s29 + $0x7d8] sm:$0xff] %v3224_v37  ;;  %v2713_v2 = vadd.f32 %v2457_v38, %v1430_v26 }
 0x30a   : > { %v3225_v43 = vmax.f32 %v2969_v39, 0.0  ;;  %v2458_v6 = vmul.f32 %v3927_v12, %v2201_v40  ;;  %v1432_v44 = vmul.f32 %v3917_v5, %v1175_v41  ;;  %v2202_v45 = vmax.f32 %v1946_v42, 0.0 }
 0x30b   : > { %v2970_v46 = vadd.f32 %v3931_v15, %v2713_v2 }
 0x30c   : > { %3481 = vst [vmem:[%s3972_s29 + $0x7e0] sm:$0xff] %v3225_v43  ;;  %v2714_v47 = vadd.f32 %v2458_v6, %v1431_v1  ;;  %v2459_v48 = vmul.f32 %v3927_v12, %v2202_v45 }
 0x30d   : > { %v3226_v49 = vmax.f32 %v2970_v46, 0.0 }
 0x30e   : > { %v2971_v11 = vadd.f32 %v3931_v15, %v2714_v47  ;;  %v2715_v50 = vadd.f32 %v2459_v48, %v1432_v44 }
 0x30f   : > { %3482 = vst [vmem:[%s3972_s29 + $0x7e8] sm:$0xff] %v3226_v49 }
 0x310   : > { %v3227_v51 = vmax.f32 %v2971_v11, 0.0  ;;  %v2972_v5 = vadd.f32 %v3931_v15, %v2715_v50 }
 0x312   : > { %3483 = vst [vmem:[%s3972_s29 + $0x7f0] sm:$0xff] %v3227_v51  ;;  %v3228_v12 = vmax.f32 %v2972_v5, 0.0 }
 0x314   : > { %3484 = vst [vmem:[%s3972_s29 + $0x7f8] sm:$0xff] %v3228_v12 }
 0x315   : > { %3703 = shalt.err (!%p3700_p5)
}
 0x316   : > { %s3704_s10 = scalar_lea.hbm %s6235_s28, 32768  ;;  %s3708_s11 = scalar_lea.hbm %s6285_s2, 65536 }
 0x317   : > { %p3705_p7 = scmp.ne.s32.totalorder %s6235_s28, %s3704_s10  ;;  %p3709_p12 = scmp.lt.u32.totalorder %s6235_s28, %s6285_s2 }
 0x318   : > { %p3710_p4 = scmp.lt.u32.totalorder %s3708_s11, %s3704_s10  ;;  %p3712_p9 = scmp.lt.u32.totalorder %s3704_s10, %s6235_s28 }
 0x319   : > { %p3706_p8 = pnand %p3705_p7, %p6292_p0 }
 0x31a   : > { %p3711_p6 = por %p3710_p4, %p3709_p12 }
 0x31b   : > { %p3707_p10 = pneg %p3706_p8 }
 0x31c   : > { %p3713_p1 = por %p3712_p9, %p3711_p6 }
 0x31e   : > { %p3714_p2 = pnand %p3713_p1, %p3707_p10 }
 0x320   : > { %3717 = shalt.err (!%p3714_p2)
}
 0x321   : > { %s3765_s15 = smov 512   ;;  %s3766_s16 = smov 32  }
 0x322   : > { %3601 = dma.vmem_to_hbm [thread:$0]  (%p6292_p0), %s6237_s23, 32768, %s6235_s28, %s3486_s4, %s3765_s15, %s3765_s15, %s3766_s16  }
 0x323 PF: > { %s3515_s17 = sand.u32 1, %s3746_s19   ;;  %p6293_p11 = scmp.ne.s32.totalorder %s6290_s3, 0 }
 0x324   : > { %p6294_p13 = scmp.ge.s32.totalorder %s3758_s22, 2  ;;  %s3516_s29 = scalar_lea.sflag [#allocation6], %s3515_s17 }
 0x326   : > { %p3608_p3 = pnand %p6294_p13, %p6293_p11 }
 0x328   : > { %3741 = dma.done.wait (!%p3608_p3), %s3516_s29, 32768  }
 0x329   : > { %3743 = vsyncadd (!%p3608_p3), %s3516_s29, 4294934528  ;;  %p19_p5 = scmp.ge.s32.totalorder %s3819_s24, 4   ;;  %s6295_s19 = smov %s3750_s20 }
 0x32a   : > { %s6296_s20 = smov %s3754_s21  ;;  %s6297_s21 = smov %s3831_s27 }
 0x32b   : > { %s6298_s22 = smov %s3819_s24  ;;  %21 = sbr.rel (!%p19_p5) target bundleno = 17 (0x11), region = 69 }
 0x332   :  { %3521 = vsyncpa [#allocation5], 1 }
 0x333   :  { %3523 = vsyncpa [#allocation5 + $0x1], 1 }
 0x334   :  { %3524 = vsyncpa [#allocation6], 1 }
 0x335   :  { %3526 = vsyncpa [#allocation6 + $0x1], 1 }

</bundles_post_ra>
